<compile_context>
chip_gen: v6e
topology: v6e:2x2x1
jax: 0.10.0
libtpu: 0.0.40
codegen_flags: <defaults>
</compile_context>

<pallas_src>
import functools

import jax
import jax.numpy as jnp
from jax import lax
from jax.experimental import pallas as pl
from jax.experimental.pallas import tpu as pltpu


def _round_up(n, m):
    return ((n + m - 1) // m) * m


def _largest_divisor_at_most(n, cap):
    c = min(n, cap)
    while n % c != 0:
        c -= 1
    return c


# ----------------------------- Pallas kernel -----------------------------

def _gru_base_kernel(gi1_ref, whh1_ref, bhh1n_ref, wih2_ref, whh2_ref,
                     b2i_ref, b2hn_ref, h2_out_ref, state_scr,
                     *, hp, bp, t_chunk):
    """One chunk of the 2-layer GRU recurrence; [h1|h2] carried across chunks.

    gi1_ref  : (Tc, Bp, 3Hp) bf16  precomputed x @ W_ih1 + b_ih1 + b_hh1[r,z]
    whh1_ref : (Hp, 3Hp)     bf16  layer-1 recurrent weights (per-gate padded)
    bhh1n_ref: (1, Hp)       f32   layer-1 hidden n-gate bias (stays under r*)
    wih2_ref : (Hp, 3Hp)     bf16  layer-2 input-path weights
    whh2_ref : (Hp, 3Hp)     bf16  layer-2 recurrent weights
    b2i_ref  : (1, 3Hp)      f32   b_ih2 (all gates) + b_hh2 (r,z gates)
    b2hn_ref : (1, Hp)       f32   layer-2 hidden n-gate bias
    h2_out   : (Bp, Hp)      f32   layer-2 hidden state after this chunk
    state_scr: (Bp, 2Hp)     f32   [h1 | h2] carried across chunks
    """
    Hp, Bp = hp, bp
    c = pl.program_id(0)

    @pl.when(c == 0)
    def _init():
        state_scr[...] = jnp.zeros_like(state_scr)

    # Loop-invariant bias broadcasts hoisted out of the unrolled time loop.
    bhh1n = jnp.broadcast_to(bhh1n_ref[...], (Bp, Hp))
    b2i = jnp.broadcast_to(b2i_ref[...], (Bp, 3 * Hp))
    b2hn = jnp.broadcast_to(b2hn_ref[...], (Bp, Hp))

    h1_0 = state_scr[:, 0:Hp]
    h2_0 = state_scr[:, Hp:2 * Hp]

    def step(t, carry):
        h1, h2 = carry                                        # f32, vreg-resident

        # Both recurrent matmuls depend only on the previous state: issue them
        # back-to-back so gh2's MXU work overlaps the layer-1 sigmoid/tanh.
        gh1 = jnp.dot(h1.astype(jnp.bfloat16), whh1_ref[...],
                      preferred_element_type=jnp.float32)     # (Bp, 3Hp)
        gh2 = jnp.dot(h2.astype(jnp.bfloat16), whh2_ref[...],
                      preferred_element_type=jnp.float32)     # (Bp, 3Hp)

        gi1 = gi1_ref[t]                                      # (Bp, 3Hp) bf16

        # ---- layer 1 ---- (gi1 already holds b_ih1 + b_hh1[r,z])
        rz1 = jax.nn.sigmoid(gi1[:, 0:2 * Hp] + gh1[:, 0:2 * Hp])
        r1, z1 = rz1[:, 0:Hp], rz1[:, Hp:2 * Hp]
        n1 = jnp.tanh(gi1[:, 2 * Hp:3 * Hp]
                      + r1 * (gh1[:, 2 * Hp:3 * Hp] + bhh1n))
        h1_new = (1.0 - z1) * n1 + z1 * h1

        # ---- layer 2 ---- (b2i = b_ih2 + b_hh2[r,z]; b2hn stays under r2*)
        gi2 = jnp.dot(h1_new.astype(jnp.bfloat16), wih2_ref[...],
                      preferred_element_type=jnp.float32) + b2i
        rz2 = jax.nn.sigmoid(gi2[:, 0:2 * Hp] + gh2[:, 0:2 * Hp])
        r2, z2 = rz2[:, 0:Hp], rz2[:, Hp:2 * Hp]
        n2 = jnp.tanh(gi2[:, 2 * Hp:3 * Hp]
                      + r2 * (gh2[:, 2 * Hp:3 * Hp] + b2hn))
        h2_new = (1.0 - z2) * n2 + z2 * h2
        return h1_new, h2_new

    unroll = t_chunk if t_chunk <= 16 else 8
    h1_f, h2_f = lax.fori_loop(0, t_chunk, step, (h1_0, h2_0), unroll=unroll)

    state_scr[:, 0:Hp] = h1_f
    state_scr[:, Hp:2 * Hp] = h2_f
    h2_out_ref[...] = h2_f


# ----------------------------- weight plumbing -----------------------------

def _pad_gate_cols(w, H, Hp):
    """(K, 3H) with gates [r|z|n] -> (K, 3Hp), each gate zero-padded to Hp."""
    parts = [w[:, g * H:(g + 1) * H] for g in range(3)]
    parts = [jnp.pad(p, ((0, 0), (0, Hp - H))) for p in parts]
    return jnp.concatenate(parts, axis=1)


def _pad_rows(w, Kp):
    return jnp.pad(w, ((0, Kp - w.shape[0]), (0, 0)))


# ----------------------------- public wrapper -----------------------------

def gru_base_forward(x, params):
    """x: (B, T, F) batch_first (PyTorch convention). Returns (B, predict_len)."""
    B, T, F = x.shape
    H = params["w_hh1"].shape[0]            # (H, 3H)
    Hp = _round_up(H, 128)
    Bp = _round_up(max(B, 8), 8)

    f32, bf16 = jnp.float32, jnp.bfloat16

    # Per-gate zero padding to Hp lanes keeps padded hidden lanes exactly 0
    # (padded z = sigmoid(0) = 0.5 but updates 0.5*0 + 0.5*0 = 0).
    wih1_p = _pad_gate_cols(params["w_ih1"].astype(f32), H, Hp)           # (F, 3Hp)
    bih1_p = _pad_gate_cols(params["b_ih1"].astype(f32), H, Hp)           # (1, 3Hp)
    bhh1_p = _pad_gate_cols(params["b_hh1"].astype(f32), H, Hp)           # (1, 3Hp)
    whh1_p = _pad_rows(_pad_gate_cols(params["w_hh1"].astype(f32), H, Hp),
                       Hp).astype(bf16)                                   # (Hp, 3Hp)

    wih2_p = _pad_rows(_pad_gate_cols(params["w_ih2"].astype(f32), H, Hp),
                       Hp).astype(bf16)                                   # (Hp, 3Hp)
    whh2_p = _pad_rows(_pad_gate_cols(params["w_hh2"].astype(f32), H, Hp),
                       Hp).astype(bf16)                                   # (Hp, 3Hp)
    bih2_p = _pad_gate_cols(params["b_ih2"].astype(f32), H, Hp)
    bhh2_p = _pad_gate_cols(params["b_hh2"].astype(f32), H, Hp)

    # Bias folding:
    #   r,z: sigmoid((xW_ir+b_ir) + (hW_hr+b_hr))  -> fold hidden r,z biases
    #   n  : tanh((xW_in+b_in) + r*(hW_hn+b_hn))   -> hidden n bias stays apart
    b_gi1 = jnp.concatenate(
        [bih1_p[:, 0:2 * Hp] + bhh1_p[:, 0:2 * Hp], bih1_p[:, 2 * Hp:]], axis=1)
    bhh1n = bhh1_p[:, 2 * Hp:3 * Hp]                                      # (1, Hp)
    b2i = jnp.concatenate(
        [bih2_p[:, 0:2 * Hp] + bhh2_p[:, 0:2 * Hp], bih2_p[:, 2 * Hp:]], axis=1)
    b2hn = bhh2_p[:, 2 * Hp:3 * Hp]                                       # (1, Hp)

    # Hoist layer-1 input projection over ALL timesteps (one big XLA matmul),
    # pad batch to full sublanes, and stream it to the kernel in bf16.
    x_tm = jnp.transpose(x, (1, 0, 2)).astype(f32)                        # (T, B, F)
    x_tm = jnp.pad(x_tm, ((0, 0), (0, Bp - B), (0, 0)))                   # (T, Bp, F)
    gi1 = (jnp.dot(x_tm, wih1_p) + b_gi1).astype(bf16)                    # (T, Bp, 3Hp)

    tc = _largest_divisor_at_most(T, 64)      # keep each gi1 block small in VMEM
    kernel = functools.partial(_gru_base_kernel, hp=Hp, bp=Bp, t_chunk=tc)

    h2_final = pl.pallas_call(
        kernel,
        out_shape=jax.ShapeDtypeStruct((Bp, Hp), f32),
        grid_spec=pltpu.PrefetchScalarGridSpec(
            num_scalar_prefetch=0,
            grid=(T // tc,),
            in_specs=[
                pl.BlockSpec((tc, Bp, 3 * Hp), lambda c: (c, 0, 0)),      # gi1
                pl.BlockSpec((Hp, 3 * Hp), lambda c: (0, 0)),             # whh1
                pl.BlockSpec((1, Hp), lambda c: (0, 0)),                  # bhh1 n
                pl.BlockSpec((Hp, 3 * Hp), lambda c: (0, 0)),             # wih2
                pl.BlockSpec((Hp, 3 * Hp), lambda c: (0, 0)),             # whh2
                pl.BlockSpec((1, 3 * Hp), lambda c: (0, 0)),              # b2i
                pl.BlockSpec((1, Hp), lambda c: (0, 0)),                  # b2hn
            ],
            out_specs=pl.BlockSpec((Bp, Hp), lambda c: (0, 0)),
            scratch_shapes=[pltpu.VMEM((Bp, 2 * Hp), f32)],               # [h1|h2]
        ),
        compiler_params=pltpu.CompilerParams(
            dimension_semantics=("arbitrary",)),
    )(gi1, whh1_p, bhh1n, wih2_p, whh2_p, b2i, b2hn)

    # Final Linear on the last timestep's h2 (runs once; plain XLA).
    y = jnp.dot(h2_final[:B, :H], params["w_out"]) + params["b_out"]
    return y


# ----------------------------- pure-JAX reference -----------------------------

def _gru_cell_ref(x, h, w_ih, w_hh, b_ih, b_hh, hidden_size):
    gi = jnp.dot(x, w_ih) + b_ih
    gh = jnp.dot(h, w_hh) + b_hh
    H = hidden_size
    i_r, i_z, i_n = gi[:, 0:H], gi[:, H:2 * H], gi[:, 2 * H:3 * H]
    h_r, h_z, h_n = gh[:, 0:H], gh[:, H:2 * H], gh[:, 2 * H:3 * H]
    r = jax.nn.sigmoid(i_r + h_r)
    z = jax.nn.sigmoid(i_z + h_z)
    n = jnp.tanh(i_n + r * h_n)
    return (1.0 - z) * n + z * h


def gru_base_reference(x, params):
    """Pure-JAX f32 reference matching torch.nn.GRU(num_layers=2) + Linear."""
    B, T, F = x.shape
    H = params["w_hh1"].shape[0]
    h1 = jnp.zeros((B, H), jnp.float32)
    h2 = jnp.zeros((B, H), jnp.float32)
    for t in range(T):
        x_t = x[:, t, :].astype(jnp.float32)
        h1 = _gru_cell_ref(x_t, h1, params["w_ih1"], params["w_hh1"],
                           params["b_ih1"], params["b_hh1"], H)
        h2 = _gru_cell_ref(h1, h2, params["w_ih2"], params["w_hh2"],
                           params["b_ih2"], params["b_hh2"], H)
    return jnp.dot(h2, params["w_out"]) + params["b_out"]


def init_params(key, input_feature_size, hidden_size, predict_len):
    """Deterministic init mirroring PyTorch's U(-1/sqrt(H), 1/sqrt(H))."""
    H = hidden_size
    bound = 1.0 / jnp.sqrt(jnp.float32(H))
    keys = jax.random.split(key, 10)
    u = lambda k, shape: jax.random.uniform(k, shape, jnp.float32, -bound, bound)
    # Stored pre-transposed: W_ih -> (Fin, 3H), W_hh -> (H, 3H), W_out -> (H, P).
    return {
        "w_ih1": u(keys[0], (input_feature_size, 3 * H)),
        "w_hh1": u(keys[1], (H, 3 * H)),
        "b_ih1": u(keys[2], (1, 3 * H)),
        "b_hh1": u(keys[3], (1, 3 * H)),
        "w_ih2": u(keys[4], (H, 3 * H)),
        "w_hh2": u(keys[5], (H, 3 * H)),
        "b_ih2": u(keys[6], (1, 3 * H)),
        "b_hh2": u(keys[7], (1, 3 * H)),
        "w_out": u(keys[8], (H, predict_len)),
        "b_out": u(keys[9], (1, predict_len)),
    }


if __name__ == "__main__":
    # Small shapes consistent with the module's forward:
    # x: (batch=4, seq=8, input_feature_size=18), hidden=32, predict_len=8.
    B, T, F = 4, 8, 18
    HIDDEN, PRED = 32, 8

    key = jax.random.PRNGKey(0)
    k_x, k_p = jax.random.split(key)
    x = jax.random.normal(k_x, (B, T, F), jnp.float32)
    params = init_params(k_p, F, HIDDEN, PRED)

    fwd = jax.jit(gru_base_forward)
    out = fwd(x, params)
    out = jax.block_until_ready(out)

    ref = gru_base_reference(x, params)
    assert out.shape == (B, PRED)
    # bf16 weight/activation streaming => looser tolerance vs the f32 reference.
    assert jnp.allclose(out, ref, atol=3e-2, rtol=3e-2), "mismatch vs reference"

    print("KERNEL_OK")
</pallas_src>

<mosaic_0001>
module attributes {stable_mosaic.version = 11 : i64} {
  func.func @_gru_base_kernel(%arg0: i32, %arg1: memref<8x8x384xbf16, #tpu.memory_space<vmem>>, %arg2: memref<128x384xbf16, #tpu.memory_space<vmem>>, %arg3: memref<1x128xf32, #tpu.memory_space<vmem>>, %arg4: memref<128x384xbf16, #tpu.memory_space<vmem>>, %arg5: memref<128x384xbf16, #tpu.memory_space<vmem>>, %arg6: memref<1x384xf32, #tpu.memory_space<vmem>>, %arg7: memref<1x128xf32, #tpu.memory_space<vmem>>, %arg8: memref<8x128xf32, #tpu.memory_space<vmem>>, %arg9: memref<8x256xf32, #tpu.memory_space<vmem>>) attributes {dimension_semantics = [#tpu.dimension_semantics<arbitrary>], iteration_bounds = array<i64: 1>, scalar_prefetch = 0 : i64, scratch_operands = 1 : i64, tpu.core_type = #tpu.core_type<tc>, window_params = [{transform_indices = @transform_0, window_bounds = array<i64: 8, 8, 384>}, {pipeline_mode = #tpu.pipeline_mode<synchronous>, transform_indices = @transform_1, window_bounds = array<i64: 128, 384>}, {pipeline_mode = #tpu.pipeline_mode<synchronous>, transform_indices = @transform_2, window_bounds = array<i64: 1, 128>}, {pipeline_mode = #tpu.pipeline_mode<synchronous>, transform_indices = @transform_3, window_bounds = array<i64: 128, 384>}, {pipeline_mode = #tpu.pipeline_mode<synchronous>, transform_indices = @transform_4, window_bounds = array<i64: 128, 384>}, {pipeline_mode = #tpu.pipeline_mode<synchronous>, transform_indices = @transform_5, window_bounds = array<i64: 1, 384>}, {pipeline_mode = #tpu.pipeline_mode<synchronous>, transform_indices = @transform_6, window_bounds = array<i64: 1, 128>}, {pipeline_mode = #tpu.pipeline_mode<synchronous>, transform_indices = @transform_7, window_bounds = array<i64: 8, 128>}]} {
    %c0_i32 = arith.constant 0 : i32
    %0 = arith.cmpi eq, %arg0, %c0_i32 : i32
    %1 = arith.extui %0 : i1 to i32
    %c0_i32_0 = arith.constant 0 : i32
    %2 = arith.cmpi ne, %1, %c0_i32_0 : i32
    scf.if %2 {
      %cst_135 = arith.constant 0.000000e+00 : f32
      %473 = vector.broadcast %cst_135 : f32 to vector<8x256xf32>
      %c0_136 = arith.constant 0 : index
      %c0_137 = arith.constant 0 : index
      %474 = vector.load %arg9[%c0_136, %c0_137] : memref<8x256xf32, #tpu.memory_space<vmem>>, vector<8x256xf32>
      tpu.vector_store %arg9[%c0_136, %c0_137], %473 {strides = array<i32>} : memref<8x256xf32, #tpu.memory_space<vmem>>, vector<8x256xf32>,
    } else {
    }
    %c0 = arith.constant 0 : index
    %c0_1 = arith.constant 0 : index
    %3 = vector.load %arg3[%c0, %c0_1] : memref<1x128xf32, #tpu.memory_space<vmem>>, vector<1x128xf32>
    %4 = vector.shape_cast %3 : vector<1x128xf32> to vector<1x128xf32>
    %5 = vector.broadcast %4 : vector<1x128xf32> to vector<8x128xf32>
    %c0_2 = arith.constant 0 : index
    %c0_3 = arith.constant 0 : index
    %6 = vector.load %arg6[%c0_2, %c0_3] : memref<1x384xf32, #tpu.memory_space<vmem>>, vector<1x384xf32>
    %7 = vector.shape_cast %6 : vector<1x384xf32> to vector<1x384xf32>
    %8 = vector.broadcast %7 : vector<1x384xf32> to vector<8x384xf32>
    %c0_4 = arith.constant 0 : index
    %c0_5 = arith.constant 0 : index
    %9 = vector.load %arg7[%c0_4, %c0_5] : memref<1x128xf32, #tpu.memory_space<vmem>>, vector<1x128xf32>
    %10 = vector.shape_cast %9 : vector<1x128xf32> to vector<1x128xf32>
    %11 = vector.broadcast %10 : vector<1x128xf32> to vector<8x128xf32>
    %c0_6 = arith.constant 0 : index
    %c0_7 = arith.constant 0 : index
    %12 = vector.load %arg9[%c0_6, %c0_7] : memref<8x256xf32, #tpu.memory_space<vmem>>, vector<8x128xf32>
    %c0_8 = arith.constant 0 : index
    %c128 = arith.constant 128 : index
    %13 = vector.load %arg9[%c0_8, %c128] : memref<8x256xf32, #tpu.memory_space<vmem>>, vector<8x128xf32>
    %c0_i32_9 = arith.constant 0 : i32
    %14 = arith.truncf %12 : vector<8x128xf32> to vector<8x128xbf16>
    %c0_10 = arith.constant 0 : index
    %c0_11 = arith.constant 0 : index
    %15 = vector.load %arg2[%c0_10, %c0_11] : memref<128x384xbf16, #tpu.memory_space<vmem>>, vector<128x384xbf16>
    %cst = arith.constant dense<0.000000e+00> : vector<8x384xf32>
    %16 = tpu.matmul %14, %15, %cst {dimension_numbers = #tpu.dot_dimension_numbers<[1], [0], [0], [1], [0, 0, 1, 1], [], []>} : vector<8x128xbf16>, vector<128x384xbf16>, vector<8x384xf32> -> vector<8x384xf32>
    %17 = arith.truncf %13 : vector<8x128xf32> to vector<8x128xbf16>
    %c0_12 = arith.constant 0 : index
    %c0_13 = arith.constant 0 : index
    %18 = vector.load %arg5[%c0_12, %c0_13] : memref<128x384xbf16, #tpu.memory_space<vmem>>, vector<128x384xbf16>
    %cst_14 = arith.constant dense<0.000000e+00> : vector<8x384xf32>
    %19 = tpu.matmul %17, %18, %cst_14 {dimension_numbers = #tpu.dot_dimension_numbers<[1], [0], [0], [1], [0, 0, 1, 1], [], []>} : vector<8x128xbf16>, vector<128x384xbf16>, vector<8x384xf32> -> vector<8x384xf32>
    %20 = arith.index_cast %c0_i32_9 : i32 to index
    %c0_15 = arith.constant 0 : index
    %c0_16 = arith.constant 0 : index
    %21 = vector.load %arg1[%20, %c0_15, %c0_16] : memref<8x8x384xbf16, #tpu.memory_space<vmem>>, vector<1x8x384xbf16>
    %22 = vector.shape_cast %21 : vector<1x8x384xbf16> to vector<8x384xbf16>
    %23 = vector.extract_strided_slice %22 {offsets = [0, 0], sizes = [8, 256], strides = [1, 1]} : vector<8x384xbf16> to vector<8x256xbf16>
    %24 = vector.extract_strided_slice %16 {offsets = [0, 0], sizes = [8, 256], strides = [1, 1]} : vector<8x384xf32> to vector<8x256xf32>
    %25 = arith.extf %23 : vector<8x256xbf16> to vector<8x256xf32>
    %26 = arith.addf %25, %24 : vector<8x256xf32>
    %27 = arith.negf %26 : vector<8x256xf32>
    %28 = math.exp %27 : vector<8x256xf32>
    %cst_17 = arith.constant 1.000000e+00 : f32
    %29 = vector.broadcast %cst_17 : f32 to vector<8x256xf32>
    %30 = arith.addf %29, %28 : vector<8x256xf32>
    %31 = arith.divf %29, %30 : vector<8x256xf32>
    %32 = vector.extract_strided_slice %31 {offsets = [0, 0], sizes = [8, 128], strides = [1, 1]} : vector<8x256xf32> to vector<8x128xf32>
    %33 = vector.extract_strided_slice %31 {offsets = [0, 128], sizes = [8, 128], strides = [1, 1]} : vector<8x256xf32> to vector<8x128xf32>
    %34 = vector.extract_strided_slice %22 {offsets = [0, 256], sizes = [8, 128], strides = [1, 1]} : vector<8x384xbf16> to vector<8x128xbf16>
    %35 = vector.extract_strided_slice %16 {offsets = [0, 256], sizes = [8, 128], strides = [1, 1]} : vector<8x384xf32> to vector<8x128xf32>
    %36 = arith.addf %35, %5 : vector<8x128xf32>
    %37 = arith.mulf %32, %36 : vector<8x128xf32>
    %38 = arith.extf %34 : vector<8x128xbf16> to vector<8x128xf32>
    %39 = arith.addf %38, %37 : vector<8x128xf32>
    %40 = math.tanh %39 : vector<8x128xf32>
    %cst_18 = arith.constant 1.000000e+00 : f32
    %41 = vector.broadcast %cst_18 : f32 to vector<8x128xf32>
    %42 = arith.subf %41, %33 : vector<8x128xf32>
    %43 = arith.mulf %42, %40 : vector<8x128xf32>
    %44 = arith.mulf %33, %12 : vector<8x128xf32>
    %45 = arith.addf %43, %44 : vector<8x128xf32>
    %46 = arith.truncf %45 : vector<8x128xf32> to vector<8x128xbf16>
    %c0_19 = arith.constant 0 : index
    %c0_20 = arith.constant 0 : index
    %47 = vector.load %arg4[%c0_19, %c0_20] : memref<128x384xbf16, #tpu.memory_space<vmem>>, vector<128x384xbf16>
    %cst_21 = arith.constant dense<0.000000e+00> : vector<8x384xf32>
    %48 = tpu.matmul %46, %47, %cst_21 {dimension_numbers = #tpu.dot_dimension_numbers<[1], [0], [0], [1], [0, 0, 1, 1], [], []>} : vector<8x128xbf16>, vector<128x384xbf16>, vector<8x384xf32> -> vector<8x384xf32>
    %49 = arith.addf %48, %8 : vector<8x384xf32>
    %50 = vector.extract_strided_slice %49 {offsets = [0, 0], sizes = [8, 256], strides = [1, 1]} : vector<8x384xf32> to vector<8x256xf32>
    %51 = vector.extract_strided_slice %19 {offsets = [0, 0], sizes = [8, 256], strides = [1, 1]} : vector<8x384xf32> to vector<8x256xf32>
    %52 = arith.addf %50, %51 : vector<8x256xf32>
    %53 = arith.negf %52 : vector<8x256xf32>
    %54 = math.exp %53 : vector<8x256xf32>
    %cst_22 = arith.constant 1.000000e+00 : f32
    %55 = vector.broadcast %cst_22 : f32 to vector<8x256xf32>
    %56 = arith.addf %55, %54 : vector<8x256xf32>
    %57 = arith.divf %55, %56 : vector<8x256xf32>
    %58 = vector.extract_strided_slice %57 {offsets = [0, 0], sizes = [8, 128], strides = [1, 1]} : vector<8x256xf32> to vector<8x128xf32>
    %59 = vector.extract_strided_slice %57 {offsets = [0, 128], sizes = [8, 128], strides = [1, 1]} : vector<8x256xf32> to vector<8x128xf32>
    %60 = vector.extract_strided_slice %49 {offsets = [0, 256], sizes = [8, 128], strides = [1, 1]} : vector<8x384xf32> to vector<8x128xf32>
    %61 = vector.extract_strided_slice %19 {offsets = [0, 256], sizes = [8, 128], strides = [1, 1]} : vector<8x384xf32> to vector<8x128xf32>
    %62 = arith.addf %61, %11 : vector<8x128xf32>
    %63 = arith.mulf %58, %62 : vector<8x128xf32>
    %64 = arith.addf %60, %63 : vector<8x128xf32>
    %65 = math.tanh %64 : vector<8x128xf32>
    %cst_23 = arith.constant 1.000000e+00 : f32
    %66 = vector.broadcast %cst_23 : f32 to vector<8x128xf32>
    %67 = arith.subf %66, %59 : vector<8x128xf32>
    %68 = arith.mulf %67, %65 : vector<8x128xf32>
    %69 = arith.mulf %59, %13 : vector<8x128xf32>
    %70 = arith.addf %68, %69 : vector<8x128xf32>
    %c1_i32 = arith.constant 1 : i32
    %71 = arith.truncf %45 : vector<8x128xf32> to vector<8x128xbf16>
    %c0_24 = arith.constant 0 : index
    %c0_25 = arith.constant 0 : index
    %72 = vector.load %arg2[%c0_24, %c0_25] : memref<128x384xbf16, #tpu.memory_space<vmem>>, vector<128x384xbf16>
    %cst_26 = arith.constant dense<0.000000e+00> : vector<8x384xf32>
    %73 = tpu.matmul %71, %72, %cst_26 {dimension_numbers = #tpu.dot_dimension_numbers<[1], [0], [0], [1], [0, 0, 1, 1], [], []>} : vector<8x128xbf16>, vector<128x384xbf16>, vector<8x384xf32> -> vector<8x384xf32>
    %74 = arith.truncf %70 : vector<8x128xf32> to vector<8x128xbf16>
    %c0_27 = arith.constant 0 : index
    %c0_28 = arith.constant 0 : index
    %75 = vector.load %arg5[%c0_27, %c0_28] : memref<128x384xbf16, #tpu.memory_space<vmem>>, vector<128x384xbf16>
    %cst_29 = arith.constant dense<0.000000e+00> : vector<8x384xf32>
    %76 = tpu.matmul %74, %75, %cst_29 {dimension_numbers = #tpu.dot_dimension_numbers<[1], [0], [0], [1], [0, 0, 1, 1], [], []>} : vector<8x128xbf16>, vector<128x384xbf16>, vector<8x384xf32> -> vector<8x384xf32>
    %77 = arith.index_cast %c1_i32 : i32 to index
    %c0_30 = arith.constant 0 : index
    %c0_31 = arith.constant 0 : index
    %78 = vector.load %arg1[%77, %c0_30, %c0_31] : memref<8x8x384xbf16, #tpu.memory_space<vmem>>, vector<1x8x384xbf16>
    %79 = vector.shape_cast %78 : vector<1x8x384xbf16> to vector<8x384xbf16>
    %80 = vector.extract_strided_slice %79 {offsets = [0, 0], sizes = [8, 256], strides = [1, 1]} : vector<8x384xbf16> to vector<8x256xbf16>
    %81 = vector.extract_strided_slice %73 {offsets = [0, 0], sizes = [8, 256], strides = [1, 1]} : vector<8x384xf32> to vector<8x256xf32>
    %82 = arith.extf %80 : vector<8x256xbf16> to vector<8x256xf32>
    %83 = arith.addf %82, %81 : vector<8x256xf32>
    %84 = arith.negf %83 : vector<8x256xf32>
    %85 = math.exp %84 : vector<8x256xf32>
    %cst_32 = arith.constant 1.000000e+00 : f32
    %86 = vector.broadcast %cst_32 : f32 to vector<8x256xf32>
    %87 = arith.addf %86, %85 : vector<8x256xf32>
    %88 = arith.divf %86, %87 : vector<8x256xf32>
    %89 = vector.extract_strided_slice %88 {offsets = [0, 0], sizes = [8, 128], strides = [1, 1]} : vector<8x256xf32> to vector<8x128xf32>
    %90 = vector.extract_strided_slice %88 {offsets = [0, 128], sizes = [8, 128], strides = [1, 1]} : vector<8x256xf32> to vector<8x128xf32>
    %91 = vector.extract_strided_slice %79 {offsets = [0, 256], sizes = [8, 128], strides = [1, 1]} : vector<8x384xbf16> to vector<8x128xbf16>
    %92 = vector.extract_strided_slice %73 {offsets = [0, 256], sizes = [8, 128], strides = [1, 1]} : vector<8x384xf32> to vector<8x128xf32>
    %93 = arith.addf %92, %5 : vector<8x128xf32>
    %94 = arith.mulf %89, %93 : vector<8x128xf32>
    %95 = arith.extf %91 : vector<8x128xbf16> to vector<8x128xf32>
    %96 = arith.addf %95, %94 : vector<8x128xf32>
    %97 = math.tanh %96 : vector<8x128xf32>
    %cst_33 = arith.constant 1.000000e+00 : f32
    %98 = vector.broadcast %cst_33 : f32 to vector<8x128xf32>
    %99 = arith.subf %98, %90 : vector<8x128xf32>
    %100 = arith.mulf %99, %97 : vector<8x128xf32>
    %101 = arith.mulf %90, %45 : vector<8x128xf32>
    %102 = arith.addf %100, %101 : vector<8x128xf32>
    %103 = arith.truncf %102 : vector<8x128xf32> to vector<8x128xbf16>
    %c0_34 = arith.constant 0 : index
    %c0_35 = arith.constant 0 : index
    %104 = vector.load %arg4[%c0_34, %c0_35] : memref<128x384xbf16, #tpu.memory_space<vmem>>, vector<128x384xbf16>
    %cst_36 = arith.constant dense<0.000000e+00> : vector<8x384xf32>
    %105 = tpu.matmul %103, %104, %cst_36 {dimension_numbers = #tpu.dot_dimension_numbers<[1], [0], [0], [1], [0, 0, 1, 1], [], []>} : vector<8x128xbf16>, vector<128x384xbf16>, vector<8x384xf32> -> vector<8x384xf32>
    %106 = arith.addf %105, %8 : vector<8x384xf32>
    %107 = vector.extract_strided_slice %106 {offsets = [0, 0], sizes = [8, 256], strides = [1, 1]} : vector<8x384xf32> to vector<8x256xf32>
    %108 = vector.extract_strided_slice %76 {offsets = [0, 0], sizes = [8, 256], strides = [1, 1]} : vector<8x384xf32> to vector<8x256xf32>
    %109 = arith.addf %107, %108 : vector<8x256xf32>
    %110 = arith.negf %109 : vector<8x256xf32>
    %111 = math.exp %110 : vector<8x256xf32>
    %cst_37 = arith.constant 1.000000e+00 : f32
    %112 = vector.broadcast %cst_37 : f32 to vector<8x256xf32>
    %113 = arith.addf %112, %111 : vector<8x256xf32>
    %114 = arith.divf %112, %113 : vector<8x256xf32>
    %115 = vector.extract_strided_slice %114 {offsets = [0, 0], sizes = [8, 128], strides = [1, 1]} : vector<8x256xf32> to vector<8x128xf32>
    %116 = vector.extract_strided_slice %114 {offsets = [0, 128], sizes = [8, 128], strides = [1, 1]} : vector<8x256xf32> to vector<8x128xf32>
    %117 = vector.extract_strided_slice %106 {offsets = [0, 256], sizes = [8, 128], strides = [1, 1]} : vector<8x384xf32> to vector<8x128xf32>
    %118 = vector.extract_strided_slice %76 {offsets = [0, 256], sizes = [8, 128], strides = [1, 1]} : vector<8x384xf32> to vector<8x128xf32>
    %119 = arith.addf %118, %11 : vector<8x128xf32>
    %120 = arith.mulf %115, %119 : vector<8x128xf32>
    %121 = arith.addf %117, %120 : vector<8x128xf32>
    %122 = math.tanh %121 : vector<8x128xf32>
    %cst_38 = arith.constant 1.000000e+00 : f32
    %123 = vector.broadcast %cst_38 : f32 to vector<8x128xf32>
    %124 = arith.subf %123, %116 : vector<8x128xf32>
    %125 = arith.mulf %124, %122 : vector<8x128xf32>
    %126 = arith.mulf %116, %70 : vector<8x128xf32>
    %127 = arith.addf %125, %126 : vector<8x128xf32>
    %c2_i32 = arith.constant 2 : i32
    %128 = arith.truncf %102 : vector<8x128xf32> to vector<8x128xbf16>
    %c0_39 = arith.constant 0 : index
    %c0_40 = arith.constant 0 : index
    %129 = vector.load %arg2[%c0_39, %c0_40] : memref<128x384xbf16, #tpu.memory_space<vmem>>, vector<128x384xbf16>
    %cst_41 = arith.constant dense<0.000000e+00> : vector<8x384xf32>
    %130 = tpu.matmul %128, %129, %cst_41 {dimension_numbers = #tpu.dot_dimension_numbers<[1], [0], [0], [1], [0, 0, 1, 1], [], []>} : vector<8x128xbf16>, vector<128x384xbf16>, vector<8x384xf32> -> vector<8x384xf32>
    %131 = arith.truncf %127 : vector<8x128xf32> to vector<8x128xbf16>
    %c0_42 = arith.constant 0 : index
    %c0_43 = arith.constant 0 : index
    %132 = vector.load %arg5[%c0_42, %c0_43] : memref<128x384xbf16, #tpu.memory_space<vmem>>, vector<128x384xbf16>
    %cst_44 = arith.constant dense<0.000000e+00> : vector<8x384xf32>
    %133 = tpu.matmul %131, %132, %cst_44 {dimension_numbers = #tpu.dot_dimension_numbers<[1], [0], [0], [1], [0, 0, 1, 1], [], []>} : vector<8x128xbf16>, vector<128x384xbf16>, vector<8x384xf32> -> vector<8x384xf32>
    %134 = arith.index_cast %c2_i32 : i32 to index
    %c0_45 = arith.constant 0 : index
    %c0_46 = arith.constant 0 : index
    %135 = vector.load %arg1[%134, %c0_45, %c0_46] : memref<8x8x384xbf16, #tpu.memory_space<vmem>>, vector<1x8x384xbf16>
    %136 = vector.shape_cast %135 : vector<1x8x384xbf16> to vector<8x384xbf16>
    %137 = vector.extract_strided_slice %136 {offsets = [0, 0], sizes = [8, 256], strides = [1, 1]} : vector<8x384xbf16> to vector<8x256xbf16>
    %138 = vector.extract_strided_slice %130 {offsets = [0, 0], sizes = [8, 256], strides = [1, 1]} : vector<8x384xf32> to vector<8x256xf32>
    %139 = arith.extf %137 : vector<8x256xbf16> to vector<8x256xf32>
    %140 = arith.addf %139, %138 : vector<8x256xf32>
    %141 = arith.negf %140 : vector<8x256xf32>
    %142 = math.exp %141 : vector<8x256xf32>
    %cst_47 = arith.constant 1.000000e+00 : f32
    %143 = vector.broadcast %cst_47 : f32 to vector<8x256xf32>
    %144 = arith.addf %143, %142 : vector<8x256xf32>
    %145 = arith.divf %143, %144 : vector<8x256xf32>
    %146 = vector.extract_strided_slice %145 {offsets = [0, 0], sizes = [8, 128], strides = [1, 1]} : vector<8x256xf32> to vector<8x128xf32>
    %147 = vector.extract_strided_slice %145 {offsets = [0, 128], sizes = [8, 128], strides = [1, 1]} : vector<8x256xf32> to vector<8x128xf32>
    %148 = vector.extract_strided_slice %136 {offsets = [0, 256], sizes = [8, 128], strides = [1, 1]} : vector<8x384xbf16> to vector<8x128xbf16>
    %149 = vector.extract_strided_slice %130 {offsets = [0, 256], sizes = [8, 128], strides = [1, 1]} : vector<8x384xf32> to vector<8x128xf32>
    %150 = arith.addf %149, %5 : vector<8x128xf32>
    %151 = arith.mulf %146, %150 : vector<8x128xf32>
    %152 = arith.extf %148 : vector<8x128xbf16> to vector<8x128xf32>
    %153 = arith.addf %152, %151 : vector<8x128xf32>
    %154 = math.tanh %153 : vector<8x128xf32>
    %cst_48 = arith.constant 1.000000e+00 : f32
    %155 = vector.broadcast %cst_48 : f32 to vector<8x128xf32>
    %156 = arith.subf %155, %147 : vector<8x128xf32>
    %157 = arith.mulf %156, %154 : vector<8x128xf32>
    %158 = arith.mulf %147, %102 : vector<8x128xf32>
    %159 = arith.addf %157, %158 : vector<8x128xf32>
    %160 = arith.truncf %159 : vector<8x128xf32> to vector<8x128xbf16>
    %c0_49 = arith.constant 0 : index
    %c0_50 = arith.constant 0 : index
    %161 = vector.load %arg4[%c0_49, %c0_50] : memref<128x384xbf16, #tpu.memory_space<vmem>>, vector<128x384xbf16>
    %cst_51 = arith.constant dense<0.000000e+00> : vector<8x384xf32>
    %162 = tpu.matmul %160, %161, %cst_51 {dimension_numbers = #tpu.dot_dimension_numbers<[1], [0], [0], [1], [0, 0, 1, 1], [], []>} : vector<8x128xbf16>, vector<128x384xbf16>, vector<8x384xf32> -> vector<8x384xf32>
    %163 = arith.addf %162, %8 : vector<8x384xf32>
    %164 = vector.extract_strided_slice %163 {offsets = [0, 0], sizes = [8, 256], strides = [1, 1]} : vector<8x384xf32> to vector<8x256xf32>
    %165 = vector.extract_strided_slice %133 {offsets = [0, 0], sizes = [8, 256], strides = [1, 1]} : vector<8x384xf32> to vector<8x256xf32>
    %166 = arith.addf %164, %165 : vector<8x256xf32>
    %167 = arith.negf %166 : vector<8x256xf32>
    %168 = math.exp %167 : vector<8x256xf32>
    %cst_52 = arith.constant 1.000000e+00 : f32
    %169 = vector.broadcast %cst_52 : f32 to vector<8x256xf32>
    %170 = arith.addf %169, %168 : vector<8x256xf32>
    %171 = arith.divf %169, %170 : vector<8x256xf32>
    %172 = vector.extract_strided_slice %171 {offsets = [0, 0], sizes = [8, 128], strides = [1, 1]} : vector<8x256xf32> to vector<8x128xf32>
    %173 = vector.extract_strided_slice %171 {offsets = [0, 128], sizes = [8, 128], strides = [1, 1]} : vector<8x256xf32> to vector<8x128xf32>
    %174 = vector.extract_strided_slice %163 {offsets = [0, 256], sizes = [8, 128], strides = [1, 1]} : vector<8x384xf32> to vector<8x128xf32>
    %175 = vector.extract_strided_slice %133 {offsets = [0, 256], sizes = [8, 128], strides = [1, 1]} : vector<8x384xf32> to vector<8x128xf32>
    %176 = arith.addf %175, %11 : vector<8x128xf32>
    %177 = arith.mulf %172, %176 : vector<8x128xf32>
    %178 = arith.addf %174, %177 : vector<8x128xf32>
    %179 = math.tanh %178 : vector<8x128xf32>
    %cst_53 = arith.constant 1.000000e+00 : f32
    %180 = vector.broadcast %cst_53 : f32 to vector<8x128xf32>
    %181 = arith.subf %180, %173 : vector<8x128xf32>
    %182 = arith.mulf %181, %179 : vector<8x128xf32>
    %183 = arith.mulf %173, %127 : vector<8x128xf32>
    %184 = arith.addf %182, %183 : vector<8x128xf32>
    %c3_i32 = arith.constant 3 : i32
    %185 = arith.truncf %159 : vector<8x128xf32> to vector<8x128xbf16>
    %c0_54 = arith.constant 0 : index
    %c0_55 = arith.constant 0 : index
    %186 = vector.load %arg2[%c0_54, %c0_55] : memref<128x384xbf16, #tpu.memory_space<vmem>>, vector<128x384xbf16>
    %cst_56 = arith.constant dense<0.000000e+00> : vector<8x384xf32>
    %187 = tpu.matmul %185, %186, %cst_56 {dimension_numbers = #tpu.dot_dimension_numbers<[1], [0], [0], [1], [0, 0, 1, 1], [], []>} : vector<8x128xbf16>, vector<128x384xbf16>, vector<8x384xf32> -> vector<8x384xf32>
    %188 = arith.truncf %184 : vector<8x128xf32> to vector<8x128xbf16>
    %c0_57 = arith.constant 0 : index
    %c0_58 = arith.constant 0 : index
    %189 = vector.load %arg5[%c0_57, %c0_58] : memref<128x384xbf16, #tpu.memory_space<vmem>>, vector<128x384xbf16>
    %cst_59 = arith.constant dense<0.000000e+00> : vector<8x384xf32>
    %190 = tpu.matmul %188, %189, %cst_59 {dimension_numbers = #tpu.dot_dimension_numbers<[1], [0], [0], [1], [0, 0, 1, 1], [], []>} : vector<8x128xbf16>, vector<128x384xbf16>, vector<8x384xf32> -> vector<8x384xf32>
    %191 = arith.index_cast %c3_i32 : i32 to index
    %c0_60 = arith.constant 0 : index
    %c0_61 = arith.constant 0 : index
    %192 = vector.load %arg1[%191, %c0_60, %c0_61] : memref<8x8x384xbf16, #tpu.memory_space<vmem>>, vector<1x8x384xbf16>
    %193 = vector.shape_cast %192 : vector<1x8x384xbf16> to vector<8x384xbf16>
    %194 = vector.extract_strided_slice %193 {offsets = [0, 0], sizes = [8, 256], strides = [1, 1]} : vector<8x384xbf16> to vector<8x256xbf16>
    %195 = vector.extract_strided_slice %187 {offsets = [0, 0], sizes = [8, 256], strides = [1, 1]} : vector<8x384xf32> to vector<8x256xf32>
    %196 = arith.extf %194 : vector<8x256xbf16> to vector<8x256xf32>
    %197 = arith.addf %196, %195 : vector<8x256xf32>
    %198 = arith.negf %197 : vector<8x256xf32>
    %199 = math.exp %198 : vector<8x256xf32>
    %cst_62 = arith.constant 1.000000e+00 : f32
    %200 = vector.broadcast %cst_62 : f32 to vector<8x256xf32>
    %201 = arith.addf %200, %199 : vector<8x256xf32>
    %202 = arith.divf %200, %201 : vector<8x256xf32>
    %203 = vector.extract_strided_slice %202 {offsets = [0, 0], sizes = [8, 128], strides = [1, 1]} : vector<8x256xf32> to vector<8x128xf32>
    %204 = vector.extract_strided_slice %202 {offsets = [0, 128], sizes = [8, 128], strides = [1, 1]} : vector<8x256xf32> to vector<8x128xf32>
    %205 = vector.extract_strided_slice %193 {offsets = [0, 256], sizes = [8, 128], strides = [1, 1]} : vector<8x384xbf16> to vector<8x128xbf16>
    %206 = vector.extract_strided_slice %187 {offsets = [0, 256], sizes = [8, 128], strides = [1, 1]} : vector<8x384xf32> to vector<8x128xf32>
    %207 = arith.addf %206, %5 : vector<8x128xf32>
    %208 = arith.mulf %203, %207 : vector<8x128xf32>
    %209 = arith.extf %205 : vector<8x128xbf16> to vector<8x128xf32>
    %210 = arith.addf %209, %208 : vector<8x128xf32>
    %211 = math.tanh %210 : vector<8x128xf32>
    %cst_63 = arith.constant 1.000000e+00 : f32
    %212 = vector.broadcast %cst_63 : f32 to vector<8x128xf32>
    %213 = arith.subf %212, %204 : vector<8x128xf32>
    %214 = arith.mulf %213, %211 : vector<8x128xf32>
    %215 = arith.mulf %204, %159 : vector<8x128xf32>
    %216 = arith.addf %214, %215 : vector<8x128xf32>
    %217 = arith.truncf %216 : vector<8x128xf32> to vector<8x128xbf16>
    %c0_64 = arith.constant 0 : index
    %c0_65 = arith.constant 0 : index
    %218 = vector.load %arg4[%c0_64, %c0_65] : memref<128x384xbf16, #tpu.memory_space<vmem>>, vector<128x384xbf16>
    %cst_66 = arith.constant dense<0.000000e+00> : vector<8x384xf32>
    %219 = tpu.matmul %217, %218, %cst_66 {dimension_numbers = #tpu.dot_dimension_numbers<[1], [0], [0], [1], [0, 0, 1, 1], [], []>} : vector<8x128xbf16>, vector<128x384xbf16>, vector<8x384xf32> -> vector<8x384xf32>
    %220 = arith.addf %219, %8 : vector<8x384xf32>
    %221 = vector.extract_strided_slice %220 {offsets = [0, 0], sizes = [8, 256], strides = [1, 1]} : vector<8x384xf32> to vector<8x256xf32>
    %222 = vector.extract_strided_slice %190 {offsets = [0, 0], sizes = [8, 256], strides = [1, 1]} : vector<8x384xf32> to vector<8x256xf32>
    %223 = arith.addf %221, %222 : vector<8x256xf32>
    %224 = arith.negf %223 : vector<8x256xf32>
    %225 = math.exp %224 : vector<8x256xf32>
    %cst_67 = arith.constant 1.000000e+00 : f32
    %226 = vector.broadcast %cst_67 : f32 to vector<8x256xf32>
    %227 = arith.addf %226, %225 : vector<8x256xf32>
    %228 = arith.divf %226, %227 : vector<8x256xf32>
    %229 = vector.extract_strided_slice %228 {offsets = [0, 0], sizes = [8, 128], strides = [1, 1]} : vector<8x256xf32> to vector<8x128xf32>
    %230 = vector.extract_strided_slice %228 {offsets = [0, 128], sizes = [8, 128], strides = [1, 1]} : vector<8x256xf32> to vector<8x128xf32>
    %231 = vector.extract_strided_slice %220 {offsets = [0, 256], sizes = [8, 128], strides = [1, 1]} : vector<8x384xf32> to vector<8x128xf32>
    %232 = vector.extract_strided_slice %190 {offsets = [0, 256], sizes = [8, 128], strides = [1, 1]} : vector<8x384xf32> to vector<8x128xf32>
    %233 = arith.addf %232, %11 : vector<8x128xf32>
    %234 = arith.mulf %229, %233 : vector<8x128xf32>
    %235 = arith.addf %231, %234 : vector<8x128xf32>
    %236 = math.tanh %235 : vector<8x128xf32>
    %cst_68 = arith.constant 1.000000e+00 : f32
    %237 = vector.broadcast %cst_68 : f32 to vector<8x128xf32>
    %238 = arith.subf %237, %230 : vector<8x128xf32>
    %239 = arith.mulf %238, %236 : vector<8x128xf32>
    %240 = arith.mulf %230, %184 : vector<8x128xf32>
    %241 = arith.addf %239, %240 : vector<8x128xf32>
    %c4_i32 = arith.constant 4 : i32
    %242 = arith.truncf %216 : vector<8x128xf32> to vector<8x128xbf16>
    %c0_69 = arith.constant 0 : index
    %c0_70 = arith.constant 0 : index
    %243 = vector.load %arg2[%c0_69, %c0_70] : memref<128x384xbf16, #tpu.memory_space<vmem>>, vector<128x384xbf16>
    %cst_71 = arith.constant dense<0.000000e+00> : vector<8x384xf32>
    %244 = tpu.matmul %242, %243, %cst_71 {dimension_numbers = #tpu.dot_dimension_numbers<[1], [0], [0], [1], [0, 0, 1, 1], [], []>} : vector<8x128xbf16>, vector<128x384xbf16>, vector<8x384xf32> -> vector<8x384xf32>
    %245 = arith.truncf %241 : vector<8x128xf32> to vector<8x128xbf16>
    %c0_72 = arith.constant 0 : index
    %c0_73 = arith.constant 0 : index
    %246 = vector.load %arg5[%c0_72, %c0_73] : memref<128x384xbf16, #tpu.memory_space<vmem>>, vector<128x384xbf16>
    %cst_74 = arith.constant dense<0.000000e+00> : vector<8x384xf32>
    %247 = tpu.matmul %245, %246, %cst_74 {dimension_numbers = #tpu.dot_dimension_numbers<[1], [0], [0], [1], [0, 0, 1, 1], [], []>} : vector<8x128xbf16>, vector<128x384xbf16>, vector<8x384xf32> -> vector<8x384xf32>
    %248 = arith.index_cast %c4_i32 : i32 to index
    %c0_75 = arith.constant 0 : index
    %c0_76 = arith.constant 0 : index
    %249 = vector.load %arg1[%248, %c0_75, %c0_76] : memref<8x8x384xbf16, #tpu.memory_space<vmem>>, vector<1x8x384xbf16>
    %250 = vector.shape_cast %249 : vector<1x8x384xbf16> to vector<8x384xbf16>
    %251 = vector.extract_strided_slice %250 {offsets = [0, 0], sizes = [8, 256], strides = [1, 1]} : vector<8x384xbf16> to vector<8x256xbf16>
    %252 = vector.extract_strided_slice %244 {offsets = [0, 0], sizes = [8, 256], strides = [1, 1]} : vector<8x384xf32> to vector<8x256xf32>
    %253 = arith.extf %251 : vector<8x256xbf16> to vector<8x256xf32>
    %254 = arith.addf %253, %252 : vector<8x256xf32>
    %255 = arith.negf %254 : vector<8x256xf32>
    %256 = math.exp %255 : vector<8x256xf32>
    %cst_77 = arith.constant 1.000000e+00 : f32
    %257 = vector.broadcast %cst_77 : f32 to vector<8x256xf32>
    %258 = arith.addf %257, %256 : vector<8x256xf32>
    %259 = arith.divf %257, %258 : vector<8x256xf32>
    %260 = vector.extract_strided_slice %259 {offsets = [0, 0], sizes = [8, 128], strides = [1, 1]} : vector<8x256xf32> to vector<8x128xf32>
    %261 = vector.extract_strided_slice %259 {offsets = [0, 128], sizes = [8, 128], strides = [1, 1]} : vector<8x256xf32> to vector<8x128xf32>
    %262 = vector.extract_strided_slice %250 {offsets = [0, 256], sizes = [8, 128], strides = [1, 1]} : vector<8x384xbf16> to vector<8x128xbf16>
    %263 = vector.extract_strided_slice %244 {offsets = [0, 256], sizes = [8, 128], strides = [1, 1]} : vector<8x384xf32> to vector<8x128xf32>
    %264 = arith.addf %263, %5 : vector<8x128xf32>
    %265 = arith.mulf %260, %264 : vector<8x128xf32>
    %266 = arith.extf %262 : vector<8x128xbf16> to vector<8x128xf32>
    %267 = arith.addf %266, %265 : vector<8x128xf32>
    %268 = math.tanh %267 : vector<8x128xf32>
    %cst_78 = arith.constant 1.000000e+00 : f32
    %269 = vector.broadcast %cst_78 : f32 to vector<8x128xf32>
    %270 = arith.subf %269, %261 : vector<8x128xf32>
    %271 = arith.mulf %270, %268 : vector<8x128xf32>
    %272 = arith.mulf %261, %216 : vector<8x128xf32>
    %273 = arith.addf %271, %272 : vector<8x128xf32>
    %274 = arith.truncf %273 : vector<8x128xf32> to vector<8x128xbf16>
    %c0_79 = arith.constant 0 : index
    %c0_80 = arith.constant 0 : index
    %275 = vector.load %arg4[%c0_79, %c0_80] : memref<128x384xbf16, #tpu.memory_space<vmem>>, vector<128x384xbf16>
    %cst_81 = arith.constant dense<0.000000e+00> : vector<8x384xf32>
    %276 = tpu.matmul %274, %275, %cst_81 {dimension_numbers = #tpu.dot_dimension_numbers<[1], [0], [0], [1], [0, 0, 1, 1], [], []>} : vector<8x128xbf16>, vector<128x384xbf16>, vector<8x384xf32> -> vector<8x384xf32>
    %277 = arith.addf %276, %8 : vector<8x384xf32>
    %278 = vector.extract_strided_slice %277 {offsets = [0, 0], sizes = [8, 256], strides = [1, 1]} : vector<8x384xf32> to vector<8x256xf32>
    %279 = vector.extract_strided_slice %247 {offsets = [0, 0], sizes = [8, 256], strides = [1, 1]} : vector<8x384xf32> to vector<8x256xf32>
    %280 = arith.addf %278, %279 : vector<8x256xf32>
    %281 = arith.negf %280 : vector<8x256xf32>
    %282 = math.exp %281 : vector<8x256xf32>
    %cst_82 = arith.constant 1.000000e+00 : f32
    %283 = vector.broadcast %cst_82 : f32 to vector<8x256xf32>
    %284 = arith.addf %283, %282 : vector<8x256xf32>
    %285 = arith.divf %283, %284 : vector<8x256xf32>
    %286 = vector.extract_strided_slice %285 {offsets = [0, 0], sizes = [8, 128], strides = [1, 1]} : vector<8x256xf32> to vector<8x128xf32>
    %287 = vector.extract_strided_slice %285 {offsets = [0, 128], sizes = [8, 128], strides = [1, 1]} : vector<8x256xf32> to vector<8x128xf32>
    %288 = vector.extract_strided_slice %277 {offsets = [0, 256], sizes = [8, 128], strides = [1, 1]} : vector<8x384xf32> to vector<8x128xf32>
    %289 = vector.extract_strided_slice %247 {offsets = [0, 256], sizes = [8, 128], strides = [1, 1]} : vector<8x384xf32> to vector<8x128xf32>
    %290 = arith.addf %289, %11 : vector<8x128xf32>
    %291 = arith.mulf %286, %290 : vector<8x128xf32>
    %292 = arith.addf %288, %291 : vector<8x128xf32>
    %293 = math.tanh %292 : vector<8x128xf32>
    %cst_83 = arith.constant 1.000000e+00 : f32
    %294 = vector.broadcast %cst_83 : f32 to vector<8x128xf32>
    %295 = arith.subf %294, %287 : vector<8x128xf32>
    %296 = arith.mulf %295, %293 : vector<8x128xf32>
    %297 = arith.mulf %287, %241 : vector<8x128xf32>
    %298 = arith.addf %296, %297 : vector<8x128xf32>
    %c5_i32 = arith.constant 5 : i32
    %299 = arith.truncf %273 : vector<8x128xf32> to vector<8x128xbf16>
    %c0_84 = arith.constant 0 : index
    %c0_85 = arith.constant 0 : index
    %300 = vector.load %arg2[%c0_84, %c0_85] : memref<128x384xbf16, #tpu.memory_space<vmem>>, vector<128x384xbf16>
    %cst_86 = arith.constant dense<0.000000e+00> : vector<8x384xf32>
    %301 = tpu.matmul %299, %300, %cst_86 {dimension_numbers = #tpu.dot_dimension_numbers<[1], [0], [0], [1], [0, 0, 1, 1], [], []>} : vector<8x128xbf16>, vector<128x384xbf16>, vector<8x384xf32> -> vector<8x384xf32>
    %302 = arith.truncf %298 : vector<8x128xf32> to vector<8x128xbf16>
    %c0_87 = arith.constant 0 : index
    %c0_88 = arith.constant 0 : index
    %303 = vector.load %arg5[%c0_87, %c0_88] : memref<128x384xbf16, #tpu.memory_space<vmem>>, vector<128x384xbf16>
    %cst_89 = arith.constant dense<0.000000e+00> : vector<8x384xf32>
    %304 = tpu.matmul %302, %303, %cst_89 {dimension_numbers = #tpu.dot_dimension_numbers<[1], [0], [0], [1], [0, 0, 1, 1], [], []>} : vector<8x128xbf16>, vector<128x384xbf16>, vector<8x384xf32> -> vector<8x384xf32>
    %305 = arith.index_cast %c5_i32 : i32 to index
    %c0_90 = arith.constant 0 : index
    %c0_91 = arith.constant 0 : index
    %306 = vector.load %arg1[%305, %c0_90, %c0_91] : memref<8x8x384xbf16, #tpu.memory_space<vmem>>, vector<1x8x384xbf16>
    %307 = vector.shape_cast %306 : vector<1x8x384xbf16> to vector<8x384xbf16>
    %308 = vector.extract_strided_slice %307 {offsets = [0, 0], sizes = [8, 256], strides = [1, 1]} : vector<8x384xbf16> to vector<8x256xbf16>
    %309 = vector.extract_strided_slice %301 {offsets = [0, 0], sizes = [8, 256], strides = [1, 1]} : vector<8x384xf32> to vector<8x256xf32>
    %310 = arith.extf %308 : vector<8x256xbf16> to vector<8x256xf32>
    %311 = arith.addf %310, %309 : vector<8x256xf32>
    %312 = arith.negf %311 : vector<8x256xf32>
    %313 = math.exp %312 : vector<8x256xf32>
    %cst_92 = arith.constant 1.000000e+00 : f32
    %314 = vector.broadcast %cst_92 : f32 to vector<8x256xf32>
    %315 = arith.addf %314, %313 : vector<8x256xf32>
    %316 = arith.divf %314, %315 : vector<8x256xf32>
    %317 = vector.extract_strided_slice %316 {offsets = [0, 0], sizes = [8, 128], strides = [1, 1]} : vector<8x256xf32> to vector<8x128xf32>
    %318 = vector.extract_strided_slice %316 {offsets = [0, 128], sizes = [8, 128], strides = [1, 1]} : vector<8x256xf32> to vector<8x128xf32>
    %319 = vector.extract_strided_slice %307 {offsets = [0, 256], sizes = [8, 128], strides = [1, 1]} : vector<8x384xbf16> to vector<8x128xbf16>
    %320 = vector.extract_strided_slice %301 {offsets = [0, 256], sizes = [8, 128], strides = [1, 1]} : vector<8x384xf32> to vector<8x128xf32>
    %321 = arith.addf %320, %5 : vector<8x128xf32>
    %322 = arith.mulf %317, %321 : vector<8x128xf32>
    %323 = arith.extf %319 : vector<8x128xbf16> to vector<8x128xf32>
    %324 = arith.addf %323, %322 : vector<8x128xf32>
    %325 = math.tanh %324 : vector<8x128xf32>
    %cst_93 = arith.constant 1.000000e+00 : f32
    %326 = vector.broadcast %cst_93 : f32 to vector<8x128xf32>
    %327 = arith.subf %326, %318 : vector<8x128xf32>
    %328 = arith.mulf %327, %325 : vector<8x128xf32>
    %329 = arith.mulf %318, %273 : vector<8x128xf32>
    %330 = arith.addf %328, %329 : vector<8x128xf32>
    %331 = arith.truncf %330 : vector<8x128xf32> to vector<8x128xbf16>
    %c0_94 = arith.constant 0 : index
    %c0_95 = arith.constant 0 : index
    %332 = vector.load %arg4[%c0_94, %c0_95] : memref<128x384xbf16, #tpu.memory_space<vmem>>, vector<128x384xbf16>
    %cst_96 = arith.constant dense<0.000000e+00> : vector<8x384xf32>
    %333 = tpu.matmul %331, %332, %cst_96 {dimension_numbers = #tpu.dot_dimension_numbers<[1], [0], [0], [1], [0, 0, 1, 1], [], []>} : vector<8x128xbf16>, vector<128x384xbf16>, vector<8x384xf32> -> vector<8x384xf32>
    %334 = arith.addf %333, %8 : vector<8x384xf32>
    %335 = vector.extract_strided_slice %334 {offsets = [0, 0], sizes = [8, 256], strides = [1, 1]} : vector<8x384xf32> to vector<8x256xf32>
    %336 = vector.extract_strided_slice %304 {offsets = [0, 0], sizes = [8, 256], strides = [1, 1]} : vector<8x384xf32> to vector<8x256xf32>
    %337 = arith.addf %335, %336 : vector<8x256xf32>
    %338 = arith.negf %337 : vector<8x256xf32>
    %339 = math.exp %338 : vector<8x256xf32>
    %cst_97 = arith.constant 1.000000e+00 : f32
    %340 = vector.broadcast %cst_97 : f32 to vector<8x256xf32>
    %341 = arith.addf %340, %339 : vector<8x256xf32>
    %342 = arith.divf %340, %341 : vector<8x256xf32>
    %343 = vector.extract_strided_slice %342 {offsets = [0, 0], sizes = [8, 128], strides = [1, 1]} : vector<8x256xf32> to vector<8x128xf32>
    %344 = vector.extract_strided_slice %342 {offsets = [0, 128], sizes = [8, 128], strides = [1, 1]} : vector<8x256xf32> to vector<8x128xf32>
    %345 = vector.extract_strided_slice %334 {offsets = [0, 256], sizes = [8, 128], strides = [1, 1]} : vector<8x384xf32> to vector<8x128xf32>
    %346 = vector.extract_strided_slice %304 {offsets = [0, 256], sizes = [8, 128], strides = [1, 1]} : vector<8x384xf32> to vector<8x128xf32>
    %347 = arith.addf %346, %11 : vector<8x128xf32>
    %348 = arith.mulf %343, %347 : vector<8x128xf32>
    %349 = arith.addf %345, %348 : vector<8x128xf32>
    %350 = math.tanh %349 : vector<8x128xf32>
    %cst_98 = arith.constant 1.000000e+00 : f32
    %351 = vector.broadcast %cst_98 : f32 to vector<8x128xf32>
    %352 = arith.subf %351, %344 : vector<8x128xf32>
    %353 = arith.mulf %352, %350 : vector<8x128xf32>
    %354 = arith.mulf %344, %298 : vector<8x128xf32>
    %355 = arith.addf %353, %354 : vector<8x128xf32>
    %c6_i32 = arith.constant 6 : i32
    %356 = arith.truncf %330 : vector<8x128xf32> to vector<8x128xbf16>
    %c0_99 = arith.constant 0 : index
    %c0_100 = arith.constant 0 : index
    %357 = vector.load %arg2[%c0_99, %c0_100] : memref<128x384xbf16, #tpu.memory_space<vmem>>, vector<128x384xbf16>
    %cst_101 = arith.constant dense<0.000000e+00> : vector<8x384xf32>
    %358 = tpu.matmul %356, %357, %cst_101 {dimension_numbers = #tpu.dot_dimension_numbers<[1], [0], [0], [1], [0, 0, 1, 1], [], []>} : vector<8x128xbf16>, vector<128x384xbf16>, vector<8x384xf32> -> vector<8x384xf32>
    %359 = arith.truncf %355 : vector<8x128xf32> to vector<8x128xbf16>
    %c0_102 = arith.constant 0 : index
    %c0_103 = arith.constant 0 : index
    %360 = vector.load %arg5[%c0_102, %c0_103] : memref<128x384xbf16, #tpu.memory_space<vmem>>, vector<128x384xbf16>
    %cst_104 = arith.constant dense<0.000000e+00> : vector<8x384xf32>
    %361 = tpu.matmul %359, %360, %cst_104 {dimension_numbers = #tpu.dot_dimension_numbers<[1], [0], [0], [1], [0, 0, 1, 1], [], []>} : vector<8x128xbf16>, vector<128x384xbf16>, vector<8x384xf32> -> vector<8x384xf32>
    %362 = arith.index_cast %c6_i32 : i32 to index
    %c0_105 = arith.constant 0 : index
    %c0_106 = arith.constant 0 : index
    %363 = vector.load %arg1[%362, %c0_105, %c0_106] : memref<8x8x384xbf16, #tpu.memory_space<vmem>>, vector<1x8x384xbf16>
    %364 = vector.shape_cast %363 : vector<1x8x384xbf16> to vector<8x384xbf16>
    %365 = vector.extract_strided_slice %364 {offsets = [0, 0], sizes = [8, 256], strides = [1, 1]} : vector<8x384xbf16> to vector<8x256xbf16>
    %366 = vector.extract_strided_slice %358 {offsets = [0, 0], sizes = [8, 256], strides = [1, 1]} : vector<8x384xf32> to vector<8x256xf32>
    %367 = arith.extf %365 : vector<8x256xbf16> to vector<8x256xf32>
    %368 = arith.addf %367, %366 : vector<8x256xf32>
    %369 = arith.negf %368 : vector<8x256xf32>
    %370 = math.exp %369 : vector<8x256xf32>
    %cst_107 = arith.constant 1.000000e+00 : f32
    %371 = vector.broadcast %cst_107 : f32 to vector<8x256xf32>
    %372 = arith.addf %371, %370 : vector<8x256xf32>
    %373 = arith.divf %371, %372 : vector<8x256xf32>
    %374 = vector.extract_strided_slice %373 {offsets = [0, 0], sizes = [8, 128], strides = [1, 1]} : vector<8x256xf32> to vector<8x128xf32>
    %375 = vector.extract_strided_slice %373 {offsets = [0, 128], sizes = [8, 128], strides = [1, 1]} : vector<8x256xf32> to vector<8x128xf32>
    %376 = vector.extract_strided_slice %364 {offsets = [0, 256], sizes = [8, 128], strides = [1, 1]} : vector<8x384xbf16> to vector<8x128xbf16>
    %377 = vector.extract_strided_slice %358 {offsets = [0, 256], sizes = [8, 128], strides = [1, 1]} : vector<8x384xf32> to vector<8x128xf32>
    %378 = arith.addf %377, %5 : vector<8x128xf32>
    %379 = arith.mulf %374, %378 : vector<8x128xf32>
    %380 = arith.extf %376 : vector<8x128xbf16> to vector<8x128xf32>
    %381 = arith.addf %380, %379 : vector<8x128xf32>
    %382 = math.tanh %381 : vector<8x128xf32>
    %cst_108 = arith.constant 1.000000e+00 : f32
    %383 = vector.broadcast %cst_108 : f32 to vector<8x128xf32>
    %384 = arith.subf %383, %375 : vector<8x128xf32>
    %385 = arith.mulf %384, %382 : vector<8x128xf32>
    %386 = arith.mulf %375, %330 : vector<8x128xf32>
    %387 = arith.addf %385, %386 : vector<8x128xf32>
    %388 = arith.truncf %387 : vector<8x128xf32> to vector<8x128xbf16>
    %c0_109 = arith.constant 0 : index
    %c0_110 = arith.constant 0 : index
    %389 = vector.load %arg4[%c0_109, %c0_110] : memref<128x384xbf16, #tpu.memory_space<vmem>>, vector<128x384xbf16>
    %cst_111 = arith.constant dense<0.000000e+00> : vector<8x384xf32>
    %390 = tpu.matmul %388, %389, %cst_111 {dimension_numbers = #tpu.dot_dimension_numbers<[1], [0], [0], [1], [0, 0, 1, 1], [], []>} : vector<8x128xbf16>, vector<128x384xbf16>, vector<8x384xf32> -> vector<8x384xf32>
    %391 = arith.addf %390, %8 : vector<8x384xf32>
    %392 = vector.extract_strided_slice %391 {offsets = [0, 0], sizes = [8, 256], strides = [1, 1]} : vector<8x384xf32> to vector<8x256xf32>
    %393 = vector.extract_strided_slice %361 {offsets = [0, 0], sizes = [8, 256], strides = [1, 1]} : vector<8x384xf32> to vector<8x256xf32>
    %394 = arith.addf %392, %393 : vector<8x256xf32>
    %395 = arith.negf %394 : vector<8x256xf32>
    %396 = math.exp %395 : vector<8x256xf32>
    %cst_112 = arith.constant 1.000000e+00 : f32
    %397 = vector.broadcast %cst_112 : f32 to vector<8x256xf32>
    %398 = arith.addf %397, %396 : vector<8x256xf32>
    %399 = arith.divf %397, %398 : vector<8x256xf32>
    %400 = vector.extract_strided_slice %399 {offsets = [0, 0], sizes = [8, 128], strides = [1, 1]} : vector<8x256xf32> to vector<8x128xf32>
    %401 = vector.extract_strided_slice %399 {offsets = [0, 128], sizes = [8, 128], strides = [1, 1]} : vector<8x256xf32> to vector<8x128xf32>
    %402 = vector.extract_strided_slice %391 {offsets = [0, 256], sizes = [8, 128], strides = [1, 1]} : vector<8x384xf32> to vector<8x128xf32>
    %403 = vector.extract_strided_slice %361 {offsets = [0, 256], sizes = [8, 128], strides = [1, 1]} : vector<8x384xf32> to vector<8x128xf32>
    %404 = arith.addf %403, %11 : vector<8x128xf32>
    %405 = arith.mulf %400, %404 : vector<8x128xf32>
    %406 = arith.addf %402, %405 : vector<8x128xf32>
    %407 = math.tanh %406 : vector<8x128xf32>
    %cst_113 = arith.constant 1.000000e+00 : f32
    %408 = vector.broadcast %cst_113 : f32 to vector<8x128xf32>
    %409 = arith.subf %408, %401 : vector<8x128xf32>
    %410 = arith.mulf %409, %407 : vector<8x128xf32>
    %411 = arith.mulf %401, %355 : vector<8x128xf32>
    %412 = arith.addf %410, %411 : vector<8x128xf32>
    %c7_i32 = arith.constant 7 : i32
    %413 = arith.truncf %387 : vector<8x128xf32> to vector<8x128xbf16>
    %c0_114 = arith.constant 0 : index
    %c0_115 = arith.constant 0 : index
    %414 = vector.load %arg2[%c0_114, %c0_115] : memref<128x384xbf16, #tpu.memory_space<vmem>>, vector<128x384xbf16>
    %cst_116 = arith.constant dense<0.000000e+00> : vector<8x384xf32>
    %415 = tpu.matmul %413, %414, %cst_116 {dimension_numbers = #tpu.dot_dimension_numbers<[1], [0], [0], [1], [0, 0, 1, 1], [], []>} : vector<8x128xbf16>, vector<128x384xbf16>, vector<8x384xf32> -> vector<8x384xf32>
    %416 = arith.truncf %412 : vector<8x128xf32> to vector<8x128xbf16>
    %c0_117 = arith.constant 0 : index
    %c0_118 = arith.constant 0 : index
    %417 = vector.load %arg5[%c0_117, %c0_118] : memref<128x384xbf16, #tpu.memory_space<vmem>>, vector<128x384xbf16>
    %cst_119 = arith.constant dense<0.000000e+00> : vector<8x384xf32>
    %418 = tpu.matmul %416, %417, %cst_119 {dimension_numbers = #tpu.dot_dimension_numbers<[1], [0], [0], [1], [0, 0, 1, 1], [], []>} : vector<8x128xbf16>, vector<128x384xbf16>, vector<8x384xf32> -> vector<8x384xf32>
    %419 = arith.index_cast %c7_i32 : i32 to index
    %c0_120 = arith.constant 0 : index
    %c0_121 = arith.constant 0 : index
    %420 = vector.load %arg1[%419, %c0_120, %c0_121] : memref<8x8x384xbf16, #tpu.memory_space<vmem>>, vector<1x8x384xbf16>
    %421 = vector.shape_cast %420 : vector<1x8x384xbf16> to vector<8x384xbf16>
    %422 = vector.extract_strided_slice %421 {offsets = [0, 0], sizes = [8, 256], strides = [1, 1]} : vector<8x384xbf16> to vector<8x256xbf16>
    %423 = vector.extract_strided_slice %415 {offsets = [0, 0], sizes = [8, 256], strides = [1, 1]} : vector<8x384xf32> to vector<8x256xf32>
    %424 = arith.extf %422 : vector<8x256xbf16> to vector<8x256xf32>
    %425 = arith.addf %424, %423 : vector<8x256xf32>
    %426 = arith.negf %425 : vector<8x256xf32>
    %427 = math.exp %426 : vector<8x256xf32>
    %cst_122 = arith.constant 1.000000e+00 : f32
    %428 = vector.broadcast %cst_122 : f32 to vector<8x256xf32>
    %429 = arith.addf %428, %427 : vector<8x256xf32>
    %430 = arith.divf %428, %429 : vector<8x256xf32>
    %431 = vector.extract_strided_slice %430 {offsets = [0, 0], sizes = [8, 128], strides = [1, 1]} : vector<8x256xf32> to vector<8x128xf32>
    %432 = vector.extract_strided_slice %430 {offsets = [0, 128], sizes = [8, 128], strides = [1, 1]} : vector<8x256xf32> to vector<8x128xf32>
    %433 = vector.extract_strided_slice %421 {offsets = [0, 256], sizes = [8, 128], strides = [1, 1]} : vector<8x384xbf16> to vector<8x128xbf16>
    %434 = vector.extract_strided_slice %415 {offsets = [0, 256], sizes = [8, 128], strides = [1, 1]} : vector<8x384xf32> to vector<8x128xf32>
    %435 = arith.addf %434, %5 : vector<8x128xf32>
    %436 = arith.mulf %431, %435 : vector<8x128xf32>
    %437 = arith.extf %433 : vector<8x128xbf16> to vector<8x128xf32>
    %438 = arith.addf %437, %436 : vector<8x128xf32>
    %439 = math.tanh %438 : vector<8x128xf32>
    %cst_123 = arith.constant 1.000000e+00 : f32
    %440 = vector.broadcast %cst_123 : f32 to vector<8x128xf32>
    %441 = arith.subf %440, %432 : vector<8x128xf32>
    %442 = arith.mulf %441, %439 : vector<8x128xf32>
    %443 = arith.mulf %432, %387 : vector<8x128xf32>
    %444 = arith.addf %442, %443 : vector<8x128xf32>
    %445 = arith.truncf %444 : vector<8x128xf32> to vector<8x128xbf16>
    %c0_124 = arith.constant 0 : index
    %c0_125 = arith.constant 0 : index
    %446 = vector.load %arg4[%c0_124, %c0_125] : memref<128x384xbf16, #tpu.memory_space<vmem>>, vector<128x384xbf16>
    %cst_126 = arith.constant dense<0.000000e+00> : vector<8x384xf32>
    %447 = tpu.matmul %445, %446, %cst_126 {dimension_numbers = #tpu.dot_dimension_numbers<[1], [0], [0], [1], [0, 0, 1, 1], [], []>} : vector<8x128xbf16>, vector<128x384xbf16>, vector<8x384xf32> -> vector<8x384xf32>
    %448 = arith.addf %447, %8 : vector<8x384xf32>
    %449 = vector.extract_strided_slice %448 {offsets = [0, 0], sizes = [8, 256], strides = [1, 1]} : vector<8x384xf32> to vector<8x256xf32>
    %450 = vector.extract_strided_slice %418 {offsets = [0, 0], sizes = [8, 256], strides = [1, 1]} : vector<8x384xf32> to vector<8x256xf32>
    %451 = arith.addf %449, %450 : vector<8x256xf32>
    %452 = arith.negf %451 : vector<8x256xf32>
    %453 = math.exp %452 : vector<8x256xf32>
    %cst_127 = arith.constant 1.000000e+00 : f32
    %454 = vector.broadcast %cst_127 : f32 to vector<8x256xf32>
    %455 = arith.addf %454, %453 : vector<8x256xf32>
    %456 = arith.divf %454, %455 : vector<8x256xf32>
    %457 = vector.extract_strided_slice %456 {offsets = [0, 0], sizes = [8, 128], strides = [1, 1]} : vector<8x256xf32> to vector<8x128xf32>
    %458 = vector.extract_strided_slice %456 {offsets = [0, 128], sizes = [8, 128], strides = [1, 1]} : vector<8x256xf32> to vector<8x128xf32>
    %459 = vector.extract_strided_slice %448 {offsets = [0, 256], sizes = [8, 128], strides = [1, 1]} : vector<8x384xf32> to vector<8x128xf32>
    %460 = vector.extract_strided_slice %418 {offsets = [0, 256], sizes = [8, 128], strides = [1, 1]} : vector<8x384xf32> to vector<8x128xf32>
    %461 = arith.addf %460, %11 : vector<8x128xf32>
    %462 = arith.mulf %457, %461 : vector<8x128xf32>
    %463 = arith.addf %459, %462 : vector<8x128xf32>
    %464 = math.tanh %463 : vector<8x128xf32>
    %cst_128 = arith.constant 1.000000e+00 : f32
    %465 = vector.broadcast %cst_128 : f32 to vector<8x128xf32>
    %466 = arith.subf %465, %458 : vector<8x128xf32>
    %467 = arith.mulf %466, %464 : vector<8x128xf32>
    %468 = arith.mulf %458, %412 : vector<8x128xf32>
    %469 = arith.addf %467, %468 : vector<8x128xf32>
    %c8_i32 = arith.constant 8 : i32
    %c0_129 = arith.constant 0 : index
    %c0_130 = arith.constant 0 : index
    %470 = vector.load %arg9[%c0_129, %c0_130] : memref<8x256xf32, #tpu.memory_space<vmem>>, vector<8x128xf32>
    tpu.vector_store %arg9[%c0_129, %c0_130], %444 {strides = array<i32>} : memref<8x256xf32, #tpu.memory_space<vmem>>, vector<8x128xf32>,
    %c0_131 = arith.constant 0 : index
    %c128_132 = arith.constant 128 : index
    %471 = vector.load %arg9[%c0_131, %c128_132] : memref<8x256xf32, #tpu.memory_space<vmem>>, vector<8x128xf32>
    tpu.vector_store %arg9[%c0_131, %c128_132], %469 {strides = array<i32>} : memref<8x256xf32, #tpu.memory_space<vmem>>, vector<8x128xf32>,
    %c0_133 = arith.constant 0 : index
    %c0_134 = arith.constant 0 : index
    %472 = vector.load %arg8[%c0_133, %c0_134] : memref<8x128xf32, #tpu.memory_space<vmem>>, vector<8x128xf32>
    tpu.vector_store %arg8[%c0_133, %c0_134], %469 {strides = array<i32>} : memref<8x128xf32, #tpu.memory_space<vmem>>, vector<8x128xf32>,
    return
  }
  func.func @transform_0(%arg0: i32) -> (i32, i32, i32) {
    %c0_i32 = arith.constant 0 : i32
    %c0_i32_0 = arith.constant 0 : i32
    %c0_i32_1 = arith.constant 0 : i32
    return %arg0, %c0_i32, %c0_i32_0 : i32, i32, i32
  }
  func.func @transform_1(%arg0: i32) -> (i32, i32) {
    %c0_i32 = arith.constant 0 : i32
    %c0_i32_0 = arith.constant 0 : i32
    %c0_i32_1 = arith.constant 0 : i32
    return %c0_i32, %c0_i32_0 : i32, i32
  }
  func.func @transform_2(%arg0: i32) -> (i32, i32) {
    %c0_i32 = arith.constant 0 : i32
    %c0_i32_0 = arith.constant 0 : i32
    %c0_i32_1 = arith.constant 0 : i32
    return %c0_i32, %c0_i32_0 : i32, i32
  }
  func.func @transform_3(%arg0: i32) -> (i32, i32) {
    %c0_i32 = arith.constant 0 : i32
    %c0_i32_0 = arith.constant 0 : i32
    %c0_i32_1 = arith.constant 0 : i32
    return %c0_i32, %c0_i32_0 : i32, i32
  }
  func.func @transform_4(%arg0: i32) -> (i32, i32) {
    %c0_i32 = arith.constant 0 : i32
    %c0_i32_0 = arith.constant 0 : i32
    %c0_i32_1 = arith.constant 0 : i32
    return %c0_i32, %c0_i32_0 : i32, i32
  }
  func.func @transform_5(%arg0: i32) -> (i32, i32) {
    %c0_i32 = arith.constant 0 : i32
    %c0_i32_0 = arith.constant 0 : i32
    %c0_i32_1 = arith.constant 0 : i32
    return %c0_i32, %c0_i32_0 : i32, i32
  }
  func.func @transform_6(%arg0: i32) -> (i32, i32) {
    %c0_i32 = arith.constant 0 : i32
    %c0_i32_0 = arith.constant 0 : i32
    %c0_i32_1 = arith.constant 0 : i32
    return %c0_i32, %c0_i32_0 : i32, i32
  }
  func.func @transform_7(%arg0: i32) -> (i32, i32) {
    %c0_i32 = arith.constant 0 : i32
    %c0_i32_0 = arith.constant 0 : i32
    %c0_i32_1 = arith.constant 0 : i32
    return %c0_i32, %c0_i32_0 : i32, i32
  }
}

</mosaic_0001>

<bundles_post_ra>
// kernel: gru_base_forward.1
= control target key start
LH: loop header
LB: loop body
LE: loop exit
PB: predicated region body
PF: predicated region fallthrough
CT: control target
= control target key end

     0   :  { %v6368_v1 = vmov 0.0   ;;  %v6322_v2 = vmov 0   ;;  %vm4139_vm0 = vmmov 0   ;;  %v4140_v28 = vmov 0.0|0.0   ;;  %s6314_s1 = inlined_call_operand.vmem [shape: bf16[128,384], index: 1, kind: input, shape index: {}]   ;;  %s6315_s4 = inlined_call_operand.vmem [shape: bf16[128,384], index: 4, kind: input, shape index: {}]   ;;  %s6316_s3 = inlined_call_operand.vmem [shape: bf16[128,384], index: 3, kind: input, shape index: {}]   ;;  %s6317_s0 = inlined_call_operand.vmem [shape: bf16[8,8,384], index: 0, kind: input, shape index: {}]   ;;  %s6318_s2 = inlined_call_operand.vmem [shape: f32[1,128], index: 2, kind: input, shape index: {}]   ;;  %s6319_s5 = inlined_call_operand.vmem [shape: f32[1,384], index: 5, kind: input, shape index: {}]   ;;  %s6320_s6 = inlined_call_operand.vmem [shape: f32[1,128], index: 6, kind: input, shape index: {}]   ;;  %s6321_s7 = inlined_call_operand.vmem [shape: f32[8,128], index: 7, kind: output, shape index: {}]  }
   0x1   :  { %v4184_v0 = vld [vmem:[%s6314_s1 + $0xac] ss:$12 sps:$4 sm:$0xff]   ;;  %3249 = vmatprep.subr.bf16.mxu1 %v6368_v1  ;;  %259 = vmatprep.mubr.bf16.mxu0 %v6322_v2  ;;  %v4191_v3 = vld [vmem:[%s6314_s1 + $0xa8] ss:$12 sps:$4 sm:$0xff]   ;;  %v4205_v5 = vld [vmem:[%s6314_s1 + $0x90] ss:$12 sps:$4 sm:$0xff]  }
   0x2   :  { %3265 = vmatprep.mubr.msk.bf16.mxu1 %vm4139_vm0, %v6368_v1  ;;  %227 = vmatprep.subr.bf16.mxu0 %v4184_v0  ;;  %v4199_v4 = vld [vmem:[%s6314_s1 + $0x94] ss:$12 sps:$4 sm:$0xff]   ;;  %v4211_v6 = vld [vmem:[%s6314_s1 + $0x7c] ss:$12 sps:$4 sm:$0xff]   ;;  %v4217_v7 = vld [vmem:[%s6314_s1 + $0x78] ss:$12 sps:$4 sm:$0xff]  }
   0x3   :  { %228 = vmatpush1.bf16.msra.mxu0 %v4191_v3  ;;  %v4223_v8 = vld [vmem:[%s6314_s1 + $0x64] ss:$12 sps:$4 sm:$0xff]   ;;  %v4234_v10 = vld [vmem:[%s6314_s1 + $0x60] ss:$12 sps:$4 sm:$0xff]   ;;  %v4252_v13 = vld [vmem:[%s6314_s1 + $0x48] ss:$12 sps:$4 sm:$0xff]  }
   0x4   :  { %229 = vmatprep.subr.bf16.mxu0 %v4199_v4  ;;  %v4228_v9 = vld [vmem:[%s6314_s1 + $0xb0] ss:$12 sps:$4 sm:$0xff]   ;;  %v4239_v11 = vld [vmem:[%s6314_s1 + $0x4c] ss:$12 sps:$4 sm:$0xff]   ;;  %v4258_v14 = vld [vmem:[%s6314_s1 + $0x34] ss:$12 sps:$4 sm:$0xff]  }
   0x5   :  { %3250 = vmatpush3.bf16.msra.mxu1 %v4228_v9  ;;  %v4246_v12 = vld [vmem:[%s6314_s1 + $0x98] ss:$12 sps:$4 sm:$0xff]   ;;  %v4265_v15 = vld [vmem:[%s6314_s1 + $0x80] ss:$12 sps:$4 sm:$0xff]   ;;  %v4272_v16 = vld [vmem:[%s6314_s1 + $0x30] ss:$12 sps:$4 sm:$0xff]  }
   0x6   :  { %3251 = vmatprep.subr.bf16.mxu1 %v6368_v1  ;;  %v4277_v17 = vld [vmem:[%s6314_s1 + $0x1c] ss:$12 sps:$4 sm:$0xff]   ;;  %v4291_v19 = vld [vmem:[%s6314_s1 + $0x18] ss:$12 sps:$4 sm:$0xff]   ;;  %v4308_v22 = vld [vmem:[%s6314_s1] ss:$12 sps:$4 sm:$0xff]  }
   0x7   :  { %230 = vmatpush1.bf16.msra.mxu0 %v4205_v5  ;;  %v4284_v18 = vld [vmem:[%s6314_s1 + $0x68] ss:$12 sps:$4 sm:$0xff]   ;;  %v4296_v20 = vld [vmem:[%s6314_s1 + $0x4] ss:$12 sps:$4 sm:$0xff]   ;;  %v4319_v24 = vld [vmem:[%s6315_s4 + $0xac] ss:$12 sps:$4 sm:$0xff]  }
   0x8   :  { %231 = vmatprep.subr.bf16.mxu0 %v4211_v6  ;;  %v4303_v21 = vld [vmem:[%s6314_s1 + $0x50] ss:$12 sps:$4 sm:$0xff]   ;;  %v4314_v23 = vld [vmem:[%s6314_s1 + $0x38] ss:$12 sps:$4 sm:$0xff]   ;;  %v4328_v25 = vld [vmem:[%s6315_s4 + $0xa8] ss:$12 sps:$4 sm:$0xff]  }
   0x9   :  { %3252 = vmatpush3.bf16.msra.mxu1 %v4246_v12  ;;  %v4335_v26 = vld [vmem:[%s6314_s1 + $0x20] ss:$12 sps:$4 sm:$0xff]   ;;  %v4349_v29 = vld [vmem:[%s6315_s4 + $0x90] ss:$12 sps:$4 sm:$0xff]   ;;  %v4356_v30 = vld [vmem:[%s6314_s1 + $0x8] ss:$12 sps:$4 sm:$0xff]  }
   0xa   :  { %3253 = vmatprep.subr.bf16.mxu1 %v6368_v1  ;;  %v4341_v27 = vld [vmem:[%s6315_s4 + $0x94] ss:$12 sps:$4 sm:$0xff]   ;;  %v4362_v31 = vld [vmem:[%s6315_s4 + $0x7c] ss:$12 sps:$4 sm:$0xff]   ;;  %v4369_v32 = vld [vmem:[%s6315_s4 + $0x78] ss:$12 sps:$4 sm:$0xff]  }
   0xb   :  { %232 = vmatpush1.bf16.msra.mxu0 %v4217_v7  ;;  %v4375_v33 = vld [vmem:[%s6315_s4 + $0xb0] ss:$12 sps:$4 sm:$0xff]   ;;  %v4385_v34 = vld [vmem:[%s6315_s4 + $0x98] ss:$12 sps:$4 sm:$0xff]   ;;  %v4400_v36 = vld [vmem:[%s6315_s4 + $0x60] ss:$12 sps:$4 sm:$0xff]  }
   0xc   :  { %233 = vmatprep.subr.bf16.mxu0 %v4223_v8  ;;  %v4395_v35 = vld [vmem:[%s6315_s4 + $0x64] ss:$12 sps:$4 sm:$0xff]   ;;  %v4405_v37 = vld [vmem:[%s6315_s4 + $0x80] ss:$12 sps:$4 sm:$0xff]   ;;  %v4419_v39 = vld [vmem:[%s6315_s4 + $0x48] ss:$12 sps:$4 sm:$0xff]  }
   0xd   :  { %3254 = vmatpush3.bf16.msra.mxu1 %v4265_v15  ;;  %v4413_v38 = vld [vmem:[%s6315_s4 + $0x4c] ss:$12 sps:$4 sm:$0xff]   ;;  %v4424_v40 = vld [vmem:[%s6315_s4 + $0x68] ss:$12 sps:$4 sm:$0xff]   ;;  %v4438_v42 = vld [vmem:[%s6315_s4 + $0x30] ss:$12 sps:$4 sm:$0xff]  }
   0xe   :  { %3255 = vmatprep.subr.bf16.mxu1 %v6368_v1  ;;  %v4432_v41 = vld [vmem:[%s6315_s4 + $0x34] ss:$12 sps:$4 sm:$0xff]   ;;  %v4443_v43 = vld [vmem:[%s6315_s4 + $0x50] ss:$12 sps:$4 sm:$0xff]   ;;  %v4457_v45 = vld [vmem:[%s6315_s4 + $0x18] ss:$12 sps:$4 sm:$0xff]  }
   0xf   :  { %234 = vmatpush1.bf16.msra.mxu0 %v4234_v10  ;;  %v4451_v44 = vld [vmem:[%s6315_s4 + $0x1c] ss:$12 sps:$4 sm:$0xff]   ;;  %6459 = vst [vmem:[#allocation4_spill] sm:$0xff] %v4457_v45  ;;  %v4462_v46 = vld [vmem:[%s6315_s4 + $0x38] ss:$12 sps:$4 sm:$0xff]  }
  0x10   :  { %235 = vmatprep.subr.bf16.mxu0 %v4239_v11  ;;  %6458 = vst [vmem:[#allocation3_spill] sm:$0xff] %v4451_v44  ;;  %6460 = vst [vmem:[#allocation5_spill] sm:$0xff] %v4462_v46  ;;  %v4470_v47 = vld [vmem:[%s6315_s4 + $0x4] ss:$12 sps:$4 sm:$0xff]   ;;  %v4476_v48 = vld [vmem:[%s6315_s4] ss:$12 sps:$4 sm:$0xff]  }
  0x11   :  { %3256 = vmatpush3.bf16.msra.mxu1 %v4284_v18  ;;  %6461 = vst [vmem:[#allocation6_spill] sm:$0xff] %v4470_v47  ;;  %6462 = vst [vmem:[#allocation7_spill] sm:$0xff] %v4476_v48  ;;  %v4481_v49 = vld [vmem:[%s6315_s4 + $0x20] ss:$12 sps:$4 sm:$0xff]   ;;  %v4490_v50 = vld [vmem:[%s6315_s4 + $0x8] ss:$12 sps:$4 sm:$0xff]  }
  0x12   :  { %3257 = vmatprep.subr.bf16.mxu1 %v6368_v1  ;;  %6463 = vst [vmem:[#allocation8_spill] sm:$0xff] %v4481_v49  ;;  %6464 = vst [vmem:[#allocation9_spill] sm:$0xff] %v4490_v50  ;;  %v4499_v51 = vld [vmem:[%s6316_s3 + $0xac] ss:$12 sps:$4 sm:$0xff]   ;;  %v4504_v52 = vld [vmem:[%s6316_s3 + $0xa8] ss:$12 sps:$4 sm:$0xff]  }
  0x13   :  { %236 = vmatpush1.bf16.msra.mxu0 %v4252_v13  ;;  %6465 = vst [vmem:[#allocation10_spill] sm:$0xff] %v4499_v51  ;;  %6466 = vst [vmem:[#allocation11_spill] sm:$0xff] %v4504_v52  ;;  %v4510_v53 = vld [vmem:[%s6316_s3 + $0xb0] ss:$12 sps:$4 sm:$0xff]   ;;  %v4520_v54 = vld [vmem:[%s6316_s3 + $0x94] ss:$12 sps:$4 sm:$0xff]  }
  0x14   :  { %237 = vmatprep.subr.bf16.mxu0 %v4258_v14  ;;  %6467 = vst [vmem:[#allocation12_spill] sm:$0xff] %v4510_v53  ;;  %6468 = vst [vmem:[#allocation13_spill] sm:$0xff] %v4520_v54  ;;  %v4526_v55 = vld [vmem:[%s6316_s3 + $0x90] ss:$12 sps:$4 sm:$0xff]   ;;  %v4531_v56 = vld [vmem:[%s6316_s3 + $0x98] ss:$12 sps:$4 sm:$0xff]  }
  0x15   :  { %3258 = vmatpush3.bf16.msra.mxu1 %v4303_v21  ;;  %6469 = vst [vmem:[#allocation14_spill] sm:$0xff] %v4526_v55  ;;  %6470 = vst [vmem:[#allocation15_spill] sm:$0xff] %v4531_v56  ;;  %v4539_v57 = vld [vmem:[%s6316_s3 + $0x7c] ss:$12 sps:$4 sm:$0xff]   ;;  %v4545_v58 = vld [vmem:[%s6316_s3 + $0x78] ss:$12 sps:$4 sm:$0xff]  }
  0x16   :  { %3259 = vmatprep.subr.bf16.mxu1 %v6368_v1  ;;  %6471 = vst [vmem:[#allocation16_spill] sm:$0xff] %v4539_v57  ;;  %6472 = vst [vmem:[#allocation17_spill] sm:$0xff] %v4545_v58  ;;  %v4550_v59 = vld [vmem:[%s6316_s3 + $0x80] ss:$12 sps:$4 sm:$0xff]   ;;  %v4558_v60 = vld [vmem:[%s6316_s3 + $0x64] ss:$12 sps:$4 sm:$0xff]  }
  0x17   :  { %238 = vmatpush1.bf16.msra.mxu0 %v4272_v16  ;;  %6473 = vst [vmem:[#allocation18_spill] sm:$0xff] %v4550_v59  ;;  %6474 = vst [vmem:[#allocation19_spill] sm:$0xff] %v4558_v60  ;;  %v4564_v61 = vld [vmem:[%s6316_s3 + $0x60] ss:$12 sps:$4 sm:$0xff]   ;;  %v4569_v62 = vld [vmem:[%s6316_s3 + $0x68] ss:$12 sps:$4 sm:$0xff]  }
  0x18   :  { %239 = vmatprep.subr.bf16.mxu0 %v4277_v17  ;;  %6475 = vst [vmem:[#allocation20_spill] sm:$0xff] %v4564_v61  ;;  %6476 = vst [vmem:[#allocation21_spill] sm:$0xff] %v4569_v62  ;;  %v4575_v63 = vld [vmem:[%s6316_s3 + $0x4c] ss:$12 sps:$4 sm:$0xff]  }
  0x19   :  { %3260 = vmatpush3.bf16.msra.mxu1 %v4314_v23  ;;  %6477 = vst [vmem:[#allocation22_spill] sm:$0xff] %v4575_v63 }
  0x1a   :  { %3261 = vmatprep.subr.bf16.mxu1 %v6368_v1 }
  0x1b   :  { %240 = vmatpush1.bf16.msra.mxu0 %v4291_v19 }
  0x1c   :  { %241 = vmatprep.subr.bf16.mxu0 %v4296_v20 }
  0x1d   :  { %3262 = vmatpush3.bf16.msra.mxu1 %v4335_v26 }
  0x1e   :  { %3263 = vmatprep.subr.bf16.mxu1 %v6368_v1 }
  0x1f   :  { %242 = vmatpush1.bf16.msra.mxu0 %v4308_v22 }
  0x20   :  { %469 = vmatprep.subr.bf16.mxu0 %v4319_v24 }
  0x21   :  { %3264 = vmatpush3.bf16.msra.mxu1 %v4356_v30 }
  0x22   :  { %260 = vmatmul.mubr.bf16.vlgmr.msra.gmra.mxu0 %v4140_v28  ;;  %3269 = vmatprep.subr.bf16.mxu1 %v6368_v1 }
  0x23   :  { %470 = vmatpush1.bf16.msra.mxu0 %v4328_v25  ;;  %501 = vmatprep.mubr.bf16.mxu0 %v6322_v2 }
  0x24   :  { %471 = vmatprep.subr.bf16.mxu0 %v4341_v27  ;;  %3266 = vmatmul.mubr.bf16.vlgmr.msra.gmra.mxu1 %v4140_v28 }
  0x25   :  { %3270 = vmatpush3.bf16.msra.mxu1 %v4375_v33  ;;  %3285 = vmatprep.mubr.msk.bf16.mxu1 %vm4139_vm0, %v6368_v1 }
  0x26   :  { %3271 = vmatprep.subr.bf16.mxu1 %v6368_v1 }
  0x27   :  { %472 = vmatpush1.bf16.msra.mxu0 %v4349_v29 }
  0x28   :  { %473 = vmatprep.subr.bf16.mxu0 %v4362_v31 }
  0x29   :  { %3272 = vmatpush3.bf16.msra.mxu1 %v4385_v34 }
  0x2a   :  { %3273 = vmatprep.subr.bf16.mxu1 %v6368_v1 }
  0x2b   :  { %474 = vmatpush1.bf16.msra.mxu0 %v4369_v32 }
  0x2c   :  { %475 = vmatprep.subr.bf16.mxu0 %v4395_v35 }
  0x2d   :  { %3274 = vmatpush3.bf16.msra.mxu1 %v4405_v37 }
  0x2e   :  { %3275 = vmatprep.subr.bf16.mxu1 %v6368_v1 }
  0x2f   :  { %476 = vmatpush1.bf16.msra.mxu0 %v4400_v36 }
  0x30   :  { %477 = vmatprep.subr.bf16.mxu0 %v4413_v38 }
  0x31   :  { %3276 = vmatpush3.bf16.msra.mxu1 %v4424_v40 }
  0x32   :  { %3277 = vmatprep.subr.bf16.mxu1 %v6368_v1 }
  0x33   :  { %478 = vmatpush1.bf16.msra.mxu0 %v4419_v39 }
  0x34   :  { %479 = vmatprep.subr.bf16.mxu0 %v4432_v41 }
  0x35   :  { %3278 = vmatpush3.bf16.msra.mxu1 %v4443_v43 }
  0x36   :  { %3279 = vmatprep.subr.bf16.mxu1 %v6368_v1 }
  0x37   :  { %480 = vmatpush1.bf16.msra.mxu0 %v4438_v42 }
  0x38   :  { %481 = vmatprep.subr.bf16.mxu0 %v4451_v44 }
  0x39   :  { %3280 = vmatpush3.bf16.msra.mxu1 %v4462_v46 }
  0x3a   :  { %3281 = vmatprep.subr.bf16.mxu1 %v6368_v1 }
  0x3b   :  { %482 = vmatpush1.bf16.msra.mxu0 %v4457_v45 }
  0x3c   :  { %483 = vmatprep.subr.bf16.mxu0 %v4470_v47 }
  0x3d   :  { %3282 = vmatpush3.bf16.msra.mxu1 %v4481_v49 }
  0x3e   :  { %3283 = vmatprep.subr.bf16.mxu1 %v6368_v1 }
  0x3f   :  { %484 = vmatpush1.bf16.msra.mxu0 %v4476_v48 }
  0x40   :  { %738 = vmatprep.subr.bf16.mxu0 %v4499_v51 }
  0x41   :  { %3284 = vmatpush3.bf16.msra.mxu1 %v4490_v50 }
  0x42   :  { %502 = vmatmul.mubr.bf16.vlgmr.msra.gmra.mxu0 %v4140_v28  ;;  %3289 = vmatprep.subr.bf16.mxu1 %v6368_v1 }
  0x43   :  { %770 = vmatprep.mubr.bf16.mxu0 %v6322_v2  ;;  %739 = vmatpush1.bf16.msra.mxu0 %v4504_v52  ;;  %v4587_v2 = vld [vmem:[%s6316_s3 + $0x50] ss:$12 sps:$4 sm:$0xff]  }
  0x44   :  { %3286 = vmatmul.mubr.bf16.vlgmr.msra.gmra.mxu1 %v4140_v28  ;;  %740 = vmatprep.subr.bf16.mxu0 %v4520_v54  ;;  %v4582_v28 = vld [vmem:[%s6316_s3 + $0x48] ss:$12 sps:$4 sm:$0xff]   ;;  %6479 = vst [vmem:[#allocation24_spill] sm:$0xff] %v4587_v2 }
  0x45   :  { %3305 = vmatprep.mubr.msk.bf16.mxu1 %vm4139_vm0, %v6368_v1  ;;  %3290 = vmatpush3.bf16.msra.mxu1 %v4510_v53  ;;  %6478 = vst [vmem:[#allocation23_spill] sm:$0xff] %v4582_v28 }
  0x46   :  { %3291 = vmatprep.subr.bf16.mxu1 %v6368_v1 }
  0x47   :  { %741 = vmatpush1.bf16.msra.mxu0 %v4526_v55 }
  0x48   :  { %742 = vmatprep.subr.bf16.mxu0 %v4539_v57 }
  0x49   :  { %3292 = vmatpush3.bf16.msra.mxu1 %v4531_v56 }
  0x4a   :  { %3293 = vmatprep.subr.bf16.mxu1 %v6368_v1 }
  0x4b   :  { %743 = vmatpush1.bf16.msra.mxu0 %v4545_v58 }
  0x4c   :  { %744 = vmatprep.subr.bf16.mxu0 %v4558_v60 }
  0x4d   :  { %3294 = vmatpush3.bf16.msra.mxu1 %v4550_v59 }
  0x4e   :  { %3295 = vmatprep.subr.bf16.mxu1 %v6368_v1 }
  0x4f   :  { %745 = vmatpush1.bf16.msra.mxu0 %v4564_v61  ;;  %v4594_v61 = vld [vmem:[%s6316_s3 + $0x34] ss:$12 sps:$4 sm:$0xff]  }
  0x50   :  { %746 = vmatprep.subr.bf16.mxu0 %v4575_v63  ;;  %6480 = vst [vmem:[#allocation25_spill] sm:$0xff] %v4594_v61  ;;  %v4606_v63 = vld [vmem:[%s6316_s3 + $0x38] ss:$12 sps:$4 sm:$0xff]  }
  0x51   :  { %3296 = vmatpush3.bf16.msra.mxu1 %v4569_v62  ;;  %v4601_v62 = vld [vmem:[%s6316_s3 + $0x30] ss:$12 sps:$4 sm:$0xff]   ;;  %6482 = vst [vmem:[#allocation27_spill] sm:$0xff] %v4606_v63 }
  0x52   :  { %3297 = vmatprep.subr.bf16.mxu1 %v6368_v1  ;;  %6481 = vst [vmem:[#allocation26_spill] sm:$0xff] %v4601_v62 }
  0x53   :  { %747 = vmatpush1.bf16.msra.mxu0 %v4582_v28  ;;  %v4613_v28 = vld [vmem:[%s6316_s3 + $0x1c] ss:$12 sps:$4 sm:$0xff]  }
  0x54   :  { %748 = vmatprep.subr.bf16.mxu0 %v4594_v61  ;;  %6483 = vst [vmem:[#allocation28_spill] sm:$0xff] %v4613_v28  ;;  %v4625_v61 = vld [vmem:[%s6316_s3 + $0x20] ss:$12 sps:$4 sm:$0xff]  }
  0x55   :  { %3298 = vmatpush3.bf16.msra.mxu1 %v4587_v2  ;;  %v4620_v2 = vld [vmem:[%s6316_s3 + $0x18] ss:$12 sps:$4 sm:$0xff]   ;;  %6485 = vst [vmem:[#allocation30_spill] sm:$0xff] %v4625_v61 }
  0x56   :  { %3299 = vmatprep.subr.bf16.mxu1 %v6368_v1  ;;  %6484 = vst [vmem:[#allocation29_spill] sm:$0xff] %v4620_v2 }
  0x57   :  { %749 = vmatpush1.bf16.msra.mxu0 %v4601_v62  ;;  %v4632_v62 = vld [vmem:[%s6316_s3 + $0x4] ss:$12 sps:$4 sm:$0xff]  }
  0x58   :  { %750 = vmatprep.subr.bf16.mxu0 %v4613_v28  ;;  %6486 = vst [vmem:[#allocation31_spill] sm:$0xff] %v4632_v62  ;;  %v4644_v28 = vld [vmem:[%s6316_s3 + $0x8] ss:$12 sps:$4 sm:$0xff]  }
  0x59   :  { %3300 = vmatpush3.bf16.msra.mxu1 %v4606_v63  ;;  %v4639_v63 = vld [vmem:[%s6316_s3] ss:$12 sps:$4 sm:$0xff]   ;;  %6488 = vst [vmem:[#allocation33_spill] sm:$0xff] %v4644_v28 }
  0x5a   :  { %3301 = vmatprep.subr.bf16.mxu1 %v6368_v1  ;;  %6487 = vst [vmem:[#allocation32_spill] sm:$0xff] %v4639_v63 }
  0x5b   :  { %751 = vmatpush1.bf16.msra.mxu0 %v4620_v2 }
  0x5c   :  { %752 = vmatprep.subr.bf16.mxu0 %v4632_v62 }
  0x5d   :  { %3302 = vmatpush3.bf16.msra.mxu1 %v4625_v61  ;;  %v550_v61 = vld [vmem:[%s6317_s0] sm:$0xff] }
  0x5e   :  { %3303 = vmatprep.subr.bf16.mxu1 %v6368_v1  ;;  %v552_v2 = vunpack.c.l.bf16 %v550_v61  ;;  %v553_v62 = vunpack.c.h.bf16 %v550_v61 }
  0x5f   :  { %753 = vmatpush1.bf16.msra.mxu0 %v4639_v63 }
  0x60   :  { %841 = vmatprep.subr.bf16.mxu0 %v4184_v0 }
  0x61   :  { %3304 = vmatpush3.bf16.msra.mxu1 %v4644_v28 }
  0x62   :  { %3309 = vmatprep.subr.bf16.mxu1 %v6368_v1 }
  0xe2   :  { %v261_v60 = vpop.f32.mrf.mxu0 }
  0xe3   :  { %v554_v59 = vadd.f32 %v552_v2, %v261_v60  ;;  %v4658_v2 = vld [vmem:[%s6318_s2] ss:$0 sm:$0xff] }
  0xe4   :  { %v263_v58 = vpop.f32.mrf.mxu0  ;;  %v302_v54 = vpop.f32.mrf.mxu1 }
  0xe5   :  { %v2963_v57 = vmul.f32 -1.442695, %v554_v59  ;;  %v555_v63 = vadd.f32 %v553_v62, %v263_v58 }
  0xe6   :  { %v265_v56 = vpop.f32.mrf.mxu0  ;;  %v3267_v53 = vpop.f32.mrf.mxu1 }
  0xe7   :  { %3829 = vpow2.f32 %v2963_v57  ;;  %v2964_v28 = vmul.f32 -1.442695, %v555_v63  ;;  %v568_v57 = vadd.f32 %v4658_v2, %v302_v54  ;;  %v6490_v54 = vmov 0  }
  0xe8   :  { %v266_v55 = vpop.f32.mrf.mxu0  ;;  %v305_v0 = vpop.f32.mrf.mxu1 }
  0xe9   :  { %3831 = vpow2.f32 %v2964_v28  ;;  %v551_v55 = vld [vmem:[%s6317_s0 + $0x8] sm:$0xf] }
  0xea   :  { %v3268_v1 = vpop.f32.mrf.mxu1  ;;  %v570_v53 = vunpack.c.l.bf16 %v551_v55 }
  0xf4   :  { %v3830_v52 = vpop.eup %3829 }
  0xf5   :  { %v562_v51 = vadd.f32 1.0, %v3830_v52 }
  0xf6   :  { %v3832_v50 = vpop.eup %3831 }
  0xf7   :  { %3833 = vrcp.f32 %v562_v51  ;;  %v563_v56 = vadd.f32 1.0, %v3832_v50  ;;  %v6489_v50 = vmov 0.0  }
  0xf9   :  { %3835 = vrcp.f32 %v563_v56 }
 0x104   :  { %v3834_v58 = vpop.eup %3833 }
 0x105   :  { %v569_v1 = vmul.f32 %v3834_v58, %v568_v57  ;;  %v6492_v58 = vld [vmem:[#allocation10_spill] sm:$0xff] }
 0x106   :  { %v3836_v51 = vpop.eup %3835 }
 0x107   :  { %v571_v59 = vadd.f32 %v570_v53, %v569_v1  ;;  %v573_v52 = vsub.f32 1.0, %v3836_v51  ;;  %v575_v62 = vmul.f32 0.0, %v3836_v51  ;;  %v6491_v53 = vld [vmem:[#allocation9_spill] sm:$0xff]  ;;  %v42_v1 = vlaneseq }
 0x109   :  { %3837 = vtanh.f32 %v571_v59  ;;  %v43_v59 = vshrl.u32 %v42_v1, 7 }
 0x10b   :  { %v44_v51 = vsub.s32 0, %v43_v59 }
 0x116   :  { %v3838_v60 = vpop.eup %3837 }
 0x117   :  { %v574_v61 = vmul.f32 %v3838_v60, %v573_v52  ;;  %v40_v52 = vld [vmem:[%s6319_s5] sm:$0x7]  ;;  %v48_v60 = vsub.s32 1, %v43_v59 }
 0x119   :  { %v4664_v63 = vadd.f32 %v575_v62, %v574_v61  ;;  %v4745_v61 = vrot.slane %v40_v52, %v44_v51 }
 0x11b   :  { %v577_v28 = vpack.c.bf16 %v4664_v63, %v4664_v63  ;;  %6493 = vst [vmem:[#allocation34_spill] sm:$0xff] %v4745_v61 }
 0x11d   :  { %771 = vmatmul.mubr.bf16.vlgmr.msra.gmra.mxu0 %v577_v28  ;;  %3306 = vmatmul.mubr.bf16.vlgmr.msra.gmra.mxu1 %v577_v28 }
 0x11e   :  { %842 = vmatpush1.bf16.msra.mxu0 %v4191_v3  ;;  %3310 = vmatpush3.bf16.msra.mxu1 %v4228_v9  ;;  %v503_v3 = vpop.f32.mrf.mxu0 }
 0x11f   :  { %843 = vmatprep.subr.bf16.mxu0 %v4199_v4  ;;  %3311 = vmatprep.subr.bf16.mxu1 %v6489_v50 }
 0x120   :  { %873 = vmatprep.mubr.bf16.mxu0 %v6490_v54  ;;  %3325 = vmatprep.mubr.msk.bf16.mxu1 %vm4139_vm0, %v6489_v50  ;;  %v4701_v4 = vpop.f32.mrf.mxu0 }
 0x122   :  { %844 = vmatpush1.bf16.msra.mxu0 %v4205_v5  ;;  %3312 = vmatpush3.bf16.msra.mxu1 %v4246_v12  ;;  %v507_v5 = vpop.f32.mrf.mxu0 }
 0x123   :  { %845 = vmatprep.subr.bf16.mxu0 %v4211_v6  ;;  %3313 = vmatprep.subr.bf16.mxu1 %v6489_v50  ;;  %v4705_v6 = vpop.f32.mrf.mxu1  ;;  %v4747_v5 = vrot.slane %v40_v52, %v48_v60 }
 0x124   :  { %v508_v0 = vpop.f32.mrf.mxu0 }
 0x125   :  { %v3287_v55 = vpop.f32.mrf.mxu1  ;;  %6494 = vst [vmem:[#allocation35_spill] sm:$0xff] %v4747_v5 }
 0x126   :  { %846 = vmatpush1.bf16.msra.mxu0 %v4217_v7  ;;  %3314 = vmatpush3.bf16.msra.mxu1 %v4265_v15 }
 0x127   :  { %847 = vmatprep.subr.bf16.mxu0 %v4223_v8  ;;  %3315 = vmatprep.subr.bf16.mxu1 %v6489_v50  ;;  %v547_v56 = vpop.f32.mrf.mxu1 }
 0x129   :  { %v3288_v57 = vpop.f32.mrf.mxu1 }
 0x12a   :  { %848 = vmatpush1.bf16.msra.mxu0 %v4234_v10  ;;  %3316 = vmatpush3.bf16.msra.mxu1 %v4284_v18 }
 0x12b   :  { %849 = vmatprep.subr.bf16.mxu0 %v4239_v11  ;;  %3317 = vmatprep.subr.bf16.mxu1 %v6489_v50 }
 0x12e   :  { %850 = vmatpush1.bf16.msra.mxu0 %v4252_v13  ;;  %3318 = vmatpush3.bf16.msra.mxu1 %v4303_v21 }
 0x12f   :  { %851 = vmatprep.subr.bf16.mxu0 %v4258_v14  ;;  %3319 = vmatprep.subr.bf16.mxu1 %v6489_v50 }
 0x132   :  { %852 = vmatpush1.bf16.msra.mxu0 %v4272_v16  ;;  %3320 = vmatpush3.bf16.msra.mxu1 %v4314_v23 }
 0x133   :  { %853 = vmatprep.subr.bf16.mxu0 %v4277_v17  ;;  %3321 = vmatprep.subr.bf16.mxu1 %v6489_v50 }
 0x136   :  { %854 = vmatpush1.bf16.msra.mxu0 %v4291_v19  ;;  %3322 = vmatpush3.bf16.msra.mxu1 %v4335_v26 }
 0x137   :  { %855 = vmatprep.subr.bf16.mxu0 %v4296_v20  ;;  %3323 = vmatprep.subr.bf16.mxu1 %v6489_v50 }
 0x13a   :  { %856 = vmatpush1.bf16.msra.mxu0 %v4308_v22  ;;  %3324 = vmatpush3.bf16.msra.mxu1 %v4356_v30 }
 0x13b   :  { %923 = vmatprep.subr.bf16.mxu0 %v4319_v24  ;;  %3329 = vmatprep.subr.bf16.mxu1 %v6489_v50 }
 0x13d   :  { %874 = vmatmul.mubr.bf16.vlgmr.msra.gmra.mxu0 %v577_v28  ;;  %3326 = vmatmul.mubr.bf16.vlgmr.msra.gmra.mxu1 %v577_v28 }
 0x13e   :  { %924 = vmatpush1.bf16.msra.mxu0 %v4328_v25  ;;  %3330 = vmatpush3.bf16.msra.mxu1 %v4375_v33 }
 0x13f   :  { %925 = vmatprep.subr.bf16.mxu0 %v4341_v27  ;;  %3331 = vmatprep.subr.bf16.mxu1 %v6489_v50 }
 0x140   :  { %955 = vmatprep.mubr.bf16.mxu0 %v6490_v54  ;;  %3345 = vmatprep.mubr.msk.bf16.mxu1 %vm4139_vm0, %v6489_v50 }
 0x142   :  { %926 = vmatpush1.bf16.msra.mxu0 %v4349_v29  ;;  %3332 = vmatpush3.bf16.msra.mxu1 %v4385_v34 }
 0x143   :  { %927 = vmatprep.subr.bf16.mxu0 %v4362_v31  ;;  %3333 = vmatprep.subr.bf16.mxu1 %v6489_v50 }
 0x146   :  { %928 = vmatpush1.bf16.msra.mxu0 %v4369_v32  ;;  %3334 = vmatpush3.bf16.msra.mxu1 %v4405_v37 }
 0x147   :  { %929 = vmatprep.subr.bf16.mxu0 %v4395_v35  ;;  %3335 = vmatprep.subr.bf16.mxu1 %v6489_v50 }
 0x14a   :  { %930 = vmatpush1.bf16.msra.mxu0 %v4400_v36  ;;  %3336 = vmatpush3.bf16.msra.mxu1 %v4424_v40 }
 0x14b   :  { %931 = vmatprep.subr.bf16.mxu0 %v4413_v38  ;;  %3337 = vmatprep.subr.bf16.mxu1 %v6489_v50 }
 0x14e   :  { %932 = vmatpush1.bf16.msra.mxu0 %v4419_v39  ;;  %3338 = vmatpush3.bf16.msra.mxu1 %v4443_v43 }
 0x14f   :  { %933 = vmatprep.subr.bf16.mxu0 %v4432_v41  ;;  %3339 = vmatprep.subr.bf16.mxu1 %v6489_v50 }
 0x152   :  { %934 = vmatpush1.bf16.msra.mxu0 %v4438_v42  ;;  %3340 = vmatpush3.bf16.msra.mxu1 %v4462_v46 }
 0x153   :  { %935 = vmatprep.subr.bf16.mxu0 %v4451_v44  ;;  %3341 = vmatprep.subr.bf16.mxu1 %v6489_v50 }
 0x156   :  { %936 = vmatpush1.bf16.msra.mxu0 %v4457_v45  ;;  %3342 = vmatpush3.bf16.msra.mxu1 %v4481_v49 }
 0x157   :  { %937 = vmatprep.subr.bf16.mxu0 %v4470_v47  ;;  %3343 = vmatprep.subr.bf16.mxu1 %v6489_v50 }
 0x15a   :  { %938 = vmatpush1.bf16.msra.mxu0 %v4476_v48  ;;  %3344 = vmatpush3.bf16.msra.mxu1 %v6491_v53 }
 0x15b   :  { %1033 = vmatprep.subr.bf16.mxu0 %v6492_v58  ;;  %3349 = vmatprep.subr.bf16.mxu1 %v6489_v50 }
 0x1dd   :  { %v772_v62 = vpop.f32.mrf.mxu0  ;;  %v813_v28 = vpop.f32.mrf.mxu1 }
 0x1de   :  { %v773_v0 = vadd.f32 %v772_v62, %v4745_v61  ;;  %v2991_v62 = vld [vmem:[%s6317_s0 + $0xc] sm:$0xff] }
 0x1df   :  { %v774_v55 = vpop.f32.mrf.mxu0  ;;  %v3307_v56 = vpop.f32.mrf.mxu1 }
 0x1e0   :  { %v819_v57 = vadd.f32 %v773_v0, %v503_v3  ;;  %v775_v58 = vadd.f32 %v774_v55, %v4747_v5  ;;  %v52_v0 = vsub.s32 2, %v43_v59  ;;  %v1007_v55 = vunpack.c.l.bf16 %v2991_v62 }
 0x1e1   :  { %v776_v1 = vpop.f32.mrf.mxu0  ;;  %v816_v53 = vpop.f32.mrf.mxu1 }
 0x1e2   :  { %v2989_v48 = vmul.f32 -1.442695, %v819_v57  ;;  %v820_v51 = vadd.f32 %v775_v58, %v4701_v4  ;;  %v4760_v53 = vrot.slane %v40_v52, %v52_v0  ;;  %v1008_v1 = vunpack.c.h.bf16 %v2991_v62 }
 0x1e3   :  { %v777_v47 = vpop.f32.mrf.mxu0  ;;  %v3308_v49 = vpop.f32.mrf.mxu1 }
 0x1e4   :  { %3839 = vpow2.f32 %v2989_v48  ;;  %v2990_v45 = vmul.f32 -1.442695, %v820_v51  ;;  %v4758_v47 = vld [vmem:[%s6320_s6] ss:$0 sm:$0xff]  ;;  %v814_v5 = vadd.f32 %v813_v28, %v4760_v53 }
 0x1e5   :  { %v833_v56 = vadd.f32 %v4758_v47, %v4705_v6 }
 0x1e6   :  { %3841 = vpow2.f32 %v2990_v45 }
 0x1f1   :  { %v3840_v44 = vpop.eup %3839 }
 0x1f2   :  { %v827_v60 = vadd.f32 1.0, %v3840_v44 }
 0x1f3   :  { %v3842_v3 = vpop.eup %3841 }
 0x1f4   :  { %3843 = vrcp.f32 %v827_v60  ;;  %v828_v48 = vadd.f32 1.0, %v3842_v3 }
 0x1f6   :  { %3845 = vrcp.f32 %v828_v48 }
 0x1fd   :  { %v875_v49 = vpop.f32.mrf.mxu0  ;;  %v916_v4 = vpop.f32.mrf.mxu1 }
 0x1fe   :  { %v1009_v45 = vadd.f32 %v1007_v55, %v875_v49 }
 0x1ff   :  { %v877_v44 = vpop.f32.mrf.mxu0  ;;  %v3327_v58 = vpop.f32.mrf.mxu1 }
 0x200   :  { %v2993_v57 = vmul.f32 -1.442695, %v1009_v45  ;;  %v1010_v0 = vadd.f32 %v1008_v1, %v877_v44  ;;  %v1023_v1 = vadd.f32 %v4658_v2, %v916_v4  ;;  %v6503_v4 = vld [vmem:[#allocation19_spill] sm:$0xff] }
 0x201   :  { %v3844_v59 = vpop.eup %3843  ;;  %v879_v51 = vpop.f32.mrf.mxu0 }
 0x202   :  { %v919_v60 = vpop.f32.mrf.mxu1  ;;  %v834_v61 = vmul.f32 %v3844_v59, %v833_v56  ;;  %3847 = vpow2.f32 %v2993_v57  ;;  %v2994_v55 = vmul.f32 -1.442695, %v1010_v0  ;;  %v6497_v57 = vld [vmem:[#allocation13_spill] sm:$0xff]  ;;  %v6499_v0 = vld [vmem:[#allocation15_spill] sm:$0xff] }
 0x203   :  { %v880_v3 = vpop.f32.mrf.mxu0  ;;  %v3846_v49 = vpop.eup %3845 }
 0x204   :  { %v3328_v46 = vpop.f32.mrf.mxu1  ;;  %v835_v52 = vadd.f32 %v834_v61, %v814_v5  ;;  %v837_v62 = vsub.f32 1.0, %v3846_v49  ;;  %v839_v51 = vmul.f32 0.0, %v3846_v49  ;;  %v6495_v61 = vld [vmem:[#allocation11_spill] sm:$0xff]  ;;  %v6496_v5 = vld [vmem:[#allocation12_spill] sm:$0xff] }
 0x205   :  { %v4772_v46 = vld [vmem:[%s6317_s0 + $0x14] ss:$12 sps:$4 sm:$0xff]   ;;  %v6500_v49 = vld [vmem:[#allocation16_spill] sm:$0xff] }
 0x206   :  { %3849 = vtanh.f32 %v835_v52  ;;  %v1025_v59 = vunpack.c.l.bf16 %v4772_v46  ;;  %v6498_v52 = vld [vmem:[#allocation14_spill] sm:$0xff] }
 0x207   :  { %3851 = vpow2.f32 %v2994_v55 }
 0x20f   :  { %v3848_v58 = vpop.eup %3847 }
 0x210   :  { %v1017_v6 = vadd.f32 1.0, %v3848_v58 }
 0x212   :  { %3853 = vrcp.f32 %v1017_v6  ;;  %v6501_v6 = vld [vmem:[#allocation17_spill] sm:$0xff] }
 0x213   :  { %v3850_v45 = vpop.eup %3849 }
 0x214   :  { %v838_v48 = vmul.f32 %v3850_v45, %v837_v62  ;;  %v3852_v56 = vpop.eup %3851  ;;  %v6502_v62 = vld [vmem:[#allocation18_spill] sm:$0xff]  ;;  %v6504_v45 = vld [vmem:[#allocation20_spill] sm:$0xff] }
 0x215   :  { %v1018_v44 = vadd.f32 1.0, %v3852_v56  ;;  %v6508_v56 = vld [vmem:[#allocation24_spill] sm:$0xff] }
 0x216   :  { %v4765_v60 = vadd.f32 %v839_v51, %v838_v48  ;;  %v6505_v48 = vld [vmem:[#allocation21_spill] sm:$0xff]  ;;  %v6506_v51 = vld [vmem:[#allocation22_spill] sm:$0xff] }
 0x217   :  { %3855 = vrcp.f32 %v1018_v44  ;;  %v6509_v44 = vld [vmem:[#allocation25_spill] sm:$0xff] }
 0x218   :  { %v922_v28 = vpack.c.bf16 %v4765_v60, %v4765_v60 }
 0x21a   :  { %956 = vmatmul.mubr.bf16.vlgmr.msra.gmra.mxu0 %v922_v28  ;;  %3346 = vmatmul.mubr.bf16.vlgmr.msra.gmra.mxu1 %v922_v28  ;;  %v6507_v28 = vld [vmem:[#allocation23_spill] sm:$0xff] }
 0x21b   :  { %1034 = vmatpush1.bf16.msra.mxu0 %v6495_v61  ;;  %3350 = vmatpush3.bf16.msra.mxu1 %v6496_v5 }
 0x21c   :  { %1035 = vmatprep.subr.bf16.mxu0 %v6497_v57  ;;  %3351 = vmatprep.subr.bf16.mxu1 %v6489_v50 }
 0x21d   :  { %1065 = vmatprep.mubr.bf16.mxu0 %v6490_v54  ;;  %3365 = vmatprep.mubr.msk.bf16.mxu1 %vm4139_vm0, %v6489_v50 }
 0x21f   :  { %v3854_v3 = vpop.eup %3853  ;;  %1036 = vmatpush1.bf16.msra.mxu0 %v6498_v52  ;;  %3352 = vmatpush3.bf16.msra.mxu1 %v6499_v0 }
 0x220   :  { %v1024_v55 = vmul.f32 %v3854_v3, %v1023_v1  ;;  %1037 = vmatprep.subr.bf16.mxu0 %v6500_v49  ;;  %3353 = vmatprep.subr.bf16.mxu1 %v6489_v50  ;;  %v6511_v3 = vld [vmem:[#allocation27_spill] sm:$0xff] }
 0x222   :  { %v1026_v58 = vadd.f32 %v1025_v59, %v1024_v55  ;;  %v6510_v59 = vld [vmem:[#allocation26_spill] sm:$0xff]  ;;  %v6512_v55 = vld [vmem:[#allocation28_spill] sm:$0xff] }
 0x223   :  { %1038 = vmatpush1.bf16.msra.mxu0 %v6501_v6  ;;  %3354 = vmatpush3.bf16.msra.mxu1 %v6502_v62 }
 0x224   :  { %3857 = vtanh.f32 %v1026_v58  ;;  %1039 = vmatprep.subr.bf16.mxu0 %v6503_v4  ;;  %3355 = vmatprep.subr.bf16.mxu1 %v6489_v50  ;;  %v3856_v1 = vpop.eup %3855 }
 0x225   :  { %v1028_v58 = vsub.f32 1.0, %v3856_v1 }
 0x227   :  { %1040 = vmatpush1.bf16.msra.mxu0 %v6504_v45  ;;  %3356 = vmatpush3.bf16.msra.mxu1 %v6505_v48  ;;  %v6513_v45 = vld [vmem:[#allocation29_spill] sm:$0xff] }
 0x228   :  { %1041 = vmatprep.subr.bf16.mxu0 %v6506_v51  ;;  %3357 = vmatprep.subr.bf16.mxu1 %v6489_v50 }
 0x22b   :  { %1042 = vmatpush1.bf16.msra.mxu0 %v6507_v28  ;;  %3358 = vmatpush3.bf16.msra.mxu1 %v6508_v56  ;;  %v1030_v28 = vmul.f32 %v3856_v1, %v4664_v63  ;;  %v6514_v56 = vld [vmem:[#allocation30_spill] sm:$0xff] }
 0x22c   :  { %1043 = vmatprep.subr.bf16.mxu0 %v6509_v44  ;;  %3359 = vmatprep.subr.bf16.mxu1 %v6489_v50  ;;  %v6515_v44 = vld [vmem:[#allocation31_spill] sm:$0xff]  ;;  %v4817_v63 = vld [vmem:[%s6314_s1 + $0xac] ss:$12 sps:$4 sm:$0xff]  }
 0x22f   :  { %1044 = vmatpush1.bf16.msra.mxu0 %v6510_v59  ;;  %3360 = vmatpush3.bf16.msra.mxu1 %v6511_v3  ;;  %v6516_v3 = vld [vmem:[#allocation32_spill] sm:$0xff] }
 0x230   :  { %1045 = vmatprep.subr.bf16.mxu0 %v6512_v55  ;;  %3361 = vmatprep.subr.bf16.mxu1 %v6489_v50  ;;  %v6517_v55 = vld [vmem:[#allocation33_spill] sm:$0xff] }
 0x231   :  { %v3858_v51 = vpop.eup %3857 }
 0x232   :  { %v1029_v48 = vmul.f32 %v3858_v51, %v1028_v58  ;;  %v4831_v51 = vld [vmem:[%s6314_s1 + $0x94] ss:$12 sps:$4 sm:$0xff]  }
 0x233   :  { %1046 = vmatpush1.bf16.msra.mxu0 %v6513_v45  ;;  %3362 = vmatpush3.bf16.msra.mxu1 %v6514_v56 }
 0x234   :  { %1047 = vmatprep.subr.bf16.mxu0 %v6515_v44  ;;  %3363 = vmatprep.subr.bf16.mxu1 %v6489_v50  ;;  %v4808_v59 = vadd.f32 %v1030_v28, %v1029_v48  ;;  %v4824_v48 = vld [vmem:[%s6314_s1 + $0xa8] ss:$12 sps:$4 sm:$0xff]   ;;  %v4841_v28 = vld [vmem:[%s6314_s1 + $0x90] ss:$12 sps:$4 sm:$0xff]  }
 0x236   :  { %v1032_v4 = vpack.c.bf16 %v4808_v59, %v4808_v59 }
 0x237   :  { %1048 = vmatpush1.bf16.msra.mxu0 %v6516_v3  ;;  %3364 = vmatpush3.bf16.msra.mxu1 %v6517_v55 }
 0x238   :  { %1136 = vmatprep.subr.bf16.mxu0 %v4817_v63  ;;  %3369 = vmatprep.subr.bf16.mxu1 %v6489_v50 }
 0x23a   :  { %1066 = vmatmul.mubr.bf16.vlgmr.msra.gmra.mxu0 %v1032_v4  ;;  %3366 = vmatmul.mubr.bf16.vlgmr.msra.gmra.mxu1 %v1032_v4 }
 0x23b   :  { %1137 = vmatpush1.bf16.msra.mxu0 %v4824_v48  ;;  %3370 = vmatpush3.bf16.msra.mxu1 %v4228_v9  ;;  %v4848_v9 = vld [vmem:[%s6314_s1 + $0x7c] ss:$12 sps:$4 sm:$0xff]  }
 0x23c   :  { %1138 = vmatprep.subr.bf16.mxu0 %v4831_v51  ;;  %3371 = vmatprep.subr.bf16.mxu1 %v6489_v50 }
 0x23d   :  { %1168 = vmatprep.mubr.bf16.mxu0 %v6490_v54  ;;  %3385 = vmatprep.mubr.msk.bf16.mxu1 %vm4139_vm0, %v6489_v50 }
 0x23f   :  { %1139 = vmatpush1.bf16.msra.mxu0 %v4841_v28  ;;  %3372 = vmatpush3.bf16.msra.mxu1 %v4246_v12  ;;  %v6522_v12 = vld [vmem:[#allocation6_spill] sm:$0xff] }
 0x240   :  { %1140 = vmatprep.subr.bf16.mxu0 %v4848_v9  ;;  %3373 = vmatprep.subr.bf16.mxu1 %v6489_v50 }
 0x243   :  { %1141 = vmatpush1.bf16.msra.mxu0 %v4217_v7  ;;  %3374 = vmatpush3.bf16.msra.mxu1 %v4265_v15  ;;  %v6518_v7 = vld [vmem:[#allocation5_spill] sm:$0xff]  ;;  %v6525_v15 = vld [vmem:[#allocation10_spill] sm:$0xff] }
 0x244   :  { %1142 = vmatprep.subr.bf16.mxu0 %v4223_v8  ;;  %3375 = vmatprep.subr.bf16.mxu1 %v6489_v50  ;;  %v6519_v8 = vld [vmem:[#allocation3_spill] sm:$0xff] }
 0x247   :  { %1143 = vmatpush1.bf16.msra.mxu0 %v4234_v10  ;;  %3376 = vmatpush3.bf16.msra.mxu1 %v4284_v18  ;;  %v6520_v10 = vld [vmem:[#allocation4_spill] sm:$0xff] }
 0x248   :  { %1144 = vmatprep.subr.bf16.mxu0 %v4239_v11  ;;  %3377 = vmatprep.subr.bf16.mxu1 %v6489_v50  ;;  %v6521_v11 = vld [vmem:[#allocation8_spill] sm:$0xff] }
 0x24b   :  { %1145 = vmatpush1.bf16.msra.mxu0 %v4252_v13  ;;  %3378 = vmatpush3.bf16.msra.mxu1 %v4303_v21  ;;  %v6523_v13 = vld [vmem:[#allocation7_spill] sm:$0xff] }
 0x24c   :  { %1146 = vmatprep.subr.bf16.mxu0 %v4258_v14  ;;  %3379 = vmatprep.subr.bf16.mxu1 %v6489_v50  ;;  %v6524_v14 = vld [vmem:[#allocation9_spill] sm:$0xff] }
 0x24f   :  { %1147 = vmatpush1.bf16.msra.mxu0 %v4272_v16  ;;  %3380 = vmatpush3.bf16.msra.mxu1 %v4314_v23 }
 0x250   :  { %1148 = vmatprep.subr.bf16.mxu0 %v4277_v17  ;;  %3381 = vmatprep.subr.bf16.mxu1 %v6489_v50 }
 0x253   :  { %1149 = vmatpush1.bf16.msra.mxu0 %v4291_v19  ;;  %3382 = vmatpush3.bf16.msra.mxu1 %v4335_v26  ;;  %v6526_v26 = vld [vmem:[#allocation34_spill] sm:$0xff] }
 0x254   :  { %1150 = vmatprep.subr.bf16.mxu0 %v4296_v20  ;;  %3383 = vmatprep.subr.bf16.mxu1 %v6489_v50 }
 0x257   :  { %1151 = vmatpush1.bf16.msra.mxu0 %v4308_v22  ;;  %3384 = vmatpush3.bf16.msra.mxu1 %v4356_v30 }
 0x258   :  { %1218 = vmatprep.subr.bf16.mxu0 %v4319_v24  ;;  %3389 = vmatprep.subr.bf16.mxu1 %v6489_v50 }
 0x25a   :  { %1169 = vmatmul.mubr.bf16.vlgmr.msra.gmra.mxu0 %v1032_v4  ;;  %3386 = vmatmul.mubr.bf16.vlgmr.msra.gmra.mxu1 %v1032_v4 }
 0x25b   :  { %1219 = vmatpush1.bf16.msra.mxu0 %v4328_v25  ;;  %3390 = vmatpush3.bf16.msra.mxu1 %v4375_v33 }
 0x25c   :  { %1220 = vmatprep.subr.bf16.mxu0 %v4341_v27  ;;  %3391 = vmatprep.subr.bf16.mxu1 %v6489_v50 }
 0x25d   :  { %1250 = vmatprep.mubr.bf16.mxu0 %v6490_v54  ;;  %3405 = vmatprep.mubr.msk.bf16.mxu1 %vm4139_vm0, %v6489_v50 }
 0x25f   :  { %1221 = vmatpush1.bf16.msra.mxu0 %v4349_v29  ;;  %3392 = vmatpush3.bf16.msra.mxu1 %v4385_v34 }
 0x260   :  { %1222 = vmatprep.subr.bf16.mxu0 %v4362_v31  ;;  %3393 = vmatprep.subr.bf16.mxu1 %v6489_v50 }
 0x263   :  { %1223 = vmatpush1.bf16.msra.mxu0 %v4369_v32  ;;  %3394 = vmatpush3.bf16.msra.mxu1 %v4405_v37  ;;  %v6527_v32 = vld [vmem:[#allocation35_spill] sm:$0xff] }
 0x264   :  { %1224 = vmatprep.subr.bf16.mxu0 %v4395_v35  ;;  %3395 = vmatprep.subr.bf16.mxu1 %v6489_v50 }
 0x267   :  { %1225 = vmatpush1.bf16.msra.mxu0 %v4400_v36  ;;  %3396 = vmatpush3.bf16.msra.mxu1 %v4424_v40 }
 0x268   :  { %1226 = vmatprep.subr.bf16.mxu0 %v4413_v38  ;;  %3397 = vmatprep.subr.bf16.mxu1 %v6489_v50 }
 0x26b   :  { %1227 = vmatpush1.bf16.msra.mxu0 %v4419_v39  ;;  %3398 = vmatpush3.bf16.msra.mxu1 %v4443_v43  ;;  %v2997_v43 = vld [vmem:[%s6317_s0 + $0x18] sm:$0xff] }
 0x26c   :  { %1228 = vmatprep.subr.bf16.mxu0 %v4432_v41  ;;  %3399 = vmatprep.subr.bf16.mxu1 %v6489_v50  ;;  %v1302_v1 = vunpack.c.l.bf16 %v2997_v43 }
 0x26f   :  { %1229 = vmatpush1.bf16.msra.mxu0 %v4438_v42  ;;  %3400 = vmatpush3.bf16.msra.mxu1 %v6518_v7 }
 0x270   :  { %1230 = vmatprep.subr.bf16.mxu0 %v6519_v8  ;;  %3401 = vmatprep.subr.bf16.mxu1 %v6489_v50 }
 0x273   :  { %1231 = vmatpush1.bf16.msra.mxu0 %v6520_v10  ;;  %3402 = vmatpush3.bf16.msra.mxu1 %v6521_v11 }
 0x274   :  { %1232 = vmatprep.subr.bf16.mxu0 %v6522_v12  ;;  %3403 = vmatprep.subr.bf16.mxu1 %v6489_v50 }
 0x277   :  { %1233 = vmatpush1.bf16.msra.mxu0 %v6523_v13  ;;  %3404 = vmatpush3.bf16.msra.mxu1 %v6524_v14 }
 0x278   :  { %1328 = vmatprep.subr.bf16.mxu0 %v6525_v15  ;;  %3409 = vmatprep.subr.bf16.mxu1 %v6489_v50  ;;  %v1303_v15 = vunpack.c.h.bf16 %v2997_v43  ;;  %v6536_v43 = vld [vmem:[#allocation27_spill] sm:$0xff] }
 0x2da   :  { %v957_v16 = vpop.f32.mrf.mxu0  ;;  %v998_v17 = vpop.f32.mrf.mxu1 }
 0x2db   :  { %v1128_v13 = vadd.f32 %v4758_v47, %v998_v17 }
 0x2dc   :  { %v959_v18 = vpop.f32.mrf.mxu0  ;;  %v3347_v19 = vpop.f32.mrf.mxu1 }
 0x2de   :  { %v961_v20 = vpop.f32.mrf.mxu0  ;;  %v1001_v21 = vpop.f32.mrf.mxu1 }
 0x2e0   :  { %v962_v22 = vpop.f32.mrf.mxu0  ;;  %v3348_v23 = vpop.f32.mrf.mxu1 }
 0x2fa   :  { %v1067_v24 = vpop.f32.mrf.mxu0  ;;  %v1108_v25 = vpop.f32.mrf.mxu1 }
 0x2fb   :  { %v1068_v27 = vadd.f32 %v1067_v24, %v6526_v26  ;;  %v1109_v20 = vadd.f32 %v1108_v25, %v4760_v53 }
 0x2fc   :  { %v1069_v29 = vpop.f32.mrf.mxu0  ;;  %v3367_v30 = vpop.f32.mrf.mxu1 }
 0x2fd   :  { %v1114_v31 = vadd.f32 %v1068_v27, %v957_v16  ;;  %v1070_v33 = vadd.f32 %v1069_v29, %v6527_v32 }
 0x2fe   :  { %v1071_v34 = vpop.f32.mrf.mxu0  ;;  %v1111_v35 = vpop.f32.mrf.mxu1 }
 0x2ff   :  { %v2995_v36 = vmul.f32 -1.442695, %v1114_v31  ;;  %v1115_v39 = vadd.f32 %v1070_v33, %v959_v18 }
 0x300   :  { %v1072_v37 = vpop.f32.mrf.mxu0  ;;  %v3368_v38 = vpop.f32.mrf.mxu1 }
 0x301   :  { %3859 = vpow2.f32 %v2995_v36  ;;  %v2996_v40 = vmul.f32 -1.442695, %v1115_v39 }
 0x303   :  { %3861 = vpow2.f32 %v2996_v40  ;;  %v1320_v40 = vunpack.c.h.bf16 %v4772_v46  ;;  %v6529_v46 = vld [vmem:[#allocation20_spill] sm:$0xff] }
 0x30e   :  { %v3860_v41 = vpop.eup %3859 }
 0x30f   :  { %v1122_v42 = vadd.f32 1.0, %v3860_v41 }
 0x310   :  { %v3862_v4 = vpop.eup %3861 }
 0x311   :  { %3863 = vrcp.f32 %v1122_v42  ;;  %v1123_v58 = vadd.f32 1.0, %v3862_v4  ;;  %v6535_v42 = vld [vmem:[#allocation26_spill] sm:$0xff]  ;;  %v6537_v4 = vld [vmem:[#allocation28_spill] sm:$0xff] }
 0x313   :  { %3865 = vrcp.f32 %v1123_v58 }
 0x31a   :  { %v1170_v7 = vpop.f32.mrf.mxu0  ;;  %v1211_v8 = vpop.f32.mrf.mxu1 }
 0x31b   :  { %v1304_v10 = vadd.f32 %v1302_v1, %v1170_v7 }
 0x31c   :  { %v1172_v11 = vpop.f32.mrf.mxu0  ;;  %v3387_v12 = vpop.f32.mrf.mxu1 }
 0x31d   :  { %v2999_v14 = vmul.f32 -1.442695, %v1304_v10  ;;  %v1305_v27 = vadd.f32 %v1303_v15, %v1172_v11  ;;  %v5014_v12 = vld [vmem:[%s6314_s1 + $0x68] ss:$12 sps:$4 sm:$0xff]   ;;  %v5033_v15 = vld [vmem:[%s6314_s1 + $0x50] ss:$12 sps:$4 sm:$0xff]  }
 0x31e   :  { %v3864_v16 = vpop.eup %3863  ;;  %v1174_v18 = vpop.f32.mrf.mxu0 }
 0x31f   :  { %v1214_v19 = vpop.f32.mrf.mxu1  ;;  %v1129_v21 = vmul.f32 %v3864_v16, %v1128_v13  ;;  %3867 = vpow2.f32 %v2999_v14  ;;  %v3000_v29 = vmul.f32 -1.442695, %v1305_v27  ;;  %v5020_v13 = vld [vmem:[%s6314_s1 + $0x4c] ss:$12 sps:$4 sm:$0xff]   ;;  %v5027_v14 = vld [vmem:[%s6314_s1 + $0x48] ss:$12 sps:$4 sm:$0xff]  }
 0x320   :  { %v1175_v22 = vpop.f32.mrf.mxu0  ;;  %v3866_v30 = vpop.eup %3865  ;;  %v5039_v16 = vld [vmem:[%s6314_s1 + $0x34] ss:$12 sps:$4 sm:$0xff]   ;;  %v5046_v18 = vld [vmem:[%s6314_s1 + $0x30] ss:$12 sps:$4 sm:$0xff]   ;;  %v5052_v19 = vld [vmem:[%s6314_s1 + $0x38] ss:$12 sps:$4 sm:$0xff]  }
 0x321   :  { %v3388_v23 = vpop.f32.mrf.mxu1  ;;  %v1130_v24 = vadd.f32 %v1129_v21, %v1109_v20  ;;  %v1132_v33 = vsub.f32 1.0, %v3866_v30  ;;  %v1134_v36 = vmul.f32 %v3866_v30, %v4765_v60  ;;  %v1318_v60 = vadd.f32 %v4658_v2, %v1211_v8  ;;  %v6528_v2 = vld [vmem:[#allocation19_spill] sm:$0xff]  ;;  %v5058_v20 = vld [vmem:[%s6314_s1 + $0x1c] ss:$12 sps:$4 sm:$0xff]  }
 0x322   :  { %v5065_v21 = vld [vmem:[%s6314_s1 + $0x18] ss:$12 sps:$4 sm:$0xff]   ;;  %v5071_v22 = vld [vmem:[%s6314_s1 + $0x20] ss:$12 sps:$4 sm:$0xff]   ;;  %v5090_v27 = vld [vmem:[%s6314_s1 + $0x8] ss:$12 sps:$4 sm:$0xff]  }
 0x323   :  { %3869 = vtanh.f32 %v1130_v24  ;;  %v5077_v23 = vld [vmem:[%s6314_s1 + $0x4] ss:$12 sps:$4 sm:$0xff]   ;;  %v5084_v24 = vld [vmem:[%s6314_s1] ss:$12 sps:$4 sm:$0xff]   ;;  %6540 = vst [vmem:[#allocation13_spill] sm:$0xff] %v5090_v27 }
 0x324   :  { %3871 = vpow2.f32 %v3000_v29  ;;  %6538 = vst [vmem:[#allocation11_spill] sm:$0xff] %v5077_v23  ;;  %6539 = vst [vmem:[#allocation12_spill] sm:$0xff] %v5084_v24  ;;  %v5096_v29 = vld [vmem:[%s6315_s4 + $0xac] ss:$12 sps:$4 sm:$0xff]   ;;  %v5103_v30 = vld [vmem:[%s6315_s4 + $0xa8] ss:$12 sps:$4 sm:$0xff]  }
 0x325   :  { %6541 = vst [vmem:[#allocation14_spill] sm:$0xff] %v5096_v29  ;;  %6542 = vst [vmem:[#allocation15_spill] sm:$0xff] %v5103_v30 }
 0x32c   :  { %v3868_v31 = vpop.eup %3867 }
 0x32d   :  { %v1312_v17 = vadd.f32 1.0, %v3868_v31  ;;  %v5109_v31 = vld [vmem:[%s6315_s4 + $0xb0] ss:$12 sps:$4 sm:$0xff]  }
 0x32e   :  { %6543 = vst [vmem:[#allocation16_spill] sm:$0xff] %v5109_v31 }
 0x32f   :  { %3873 = vrcp.f32 %v1312_v17  ;;  %v5115_v17 = vld [vmem:[%s6315_s4 + $0x94] ss:$12 sps:$4 sm:$0xff]  }
 0x330   :  { %v3870_v34 = vpop.eup %3869  ;;  %6544 = vst [vmem:[#allocation17_spill] sm:$0xff] %v5115_v17 }
 0x331   :  { %v1133_v35 = vmul.f32 %v3870_v34, %v1132_v33  ;;  %v3872_v38 = vpop.eup %3871  ;;  %v5125_v33 = vld [vmem:[%s6315_s4 + $0x90] ss:$12 sps:$4 sm:$0xff]   ;;  %v5131_v34 = vld [vmem:[%s6315_s4 + $0x98] ss:$12 sps:$4 sm:$0xff]  }
 0x332   :  { %v1313_v39 = vadd.f32 1.0, %v3872_v38  ;;  %6545 = vst [vmem:[#allocation18_spill] sm:$0xff] %v5125_v33  ;;  %6546 = vst [vmem:[#allocation29_spill] sm:$0xff] %v5131_v34  ;;  %v5156_v38 = vld [vmem:[%s6315_s4 + $0x64] ss:$12 sps:$4 sm:$0xff]  }
 0x333   :  { %v4919_v37 = vadd.f32 %v1134_v36, %v1133_v35  ;;  %v5137_v35 = vld [vmem:[%s6315_s4 + $0x7c] ss:$12 sps:$4 sm:$0xff]   ;;  %v5144_v36 = vld [vmem:[%s6315_s4 + $0x78] ss:$12 sps:$4 sm:$0xff]   ;;  %6550 = vst [vmem:[#allocation33_spill] sm:$0xff] %v5156_v38 }
 0x334   :  { %3875 = vrcp.f32 %v1313_v39  ;;  %6547 = vst [vmem:[#allocation30_spill] sm:$0xff] %v5137_v35  ;;  %6548 = vst [vmem:[#allocation31_spill] sm:$0xff] %v5144_v36  ;;  %v5163_v39 = vld [vmem:[%s6315_s4 + $0x60] ss:$12 sps:$4 sm:$0xff]  }
 0x335   :  { %v1217_v25 = vpack.c.bf16 %v4919_v37, %v4919_v37  ;;  %6551 = vst [vmem:[#allocation5_spill] sm:$0xff] %v5163_v39 }
 0x337   :  { %1251 = vmatmul.mubr.bf16.vlgmr.msra.gmra.mxu0 %v1217_v25  ;;  %3406 = vmatmul.mubr.bf16.vlgmr.msra.gmra.mxu1 %v1217_v25  ;;  %v5150_v25 = vld [vmem:[%s6315_s4 + $0x80] ss:$12 sps:$4 sm:$0xff]  }
 0x338   :  { %1329 = vmatpush1.bf16.msra.mxu0 %v6495_v61  ;;  %3410 = vmatpush3.bf16.msra.mxu1 %v6496_v5  ;;  %6549 = vst [vmem:[#allocation32_spill] sm:$0xff] %v5150_v25 }
 0x339   :  { %1330 = vmatprep.subr.bf16.mxu0 %v6497_v57  ;;  %3411 = vmatprep.subr.bf16.mxu1 %v6489_v50  ;;  %v6530_v57 = vld [vmem:[#allocation21_spill] sm:$0xff] }
 0x33a   :  { %1360 = vmatprep.mubr.bf16.mxu0 %v6490_v54  ;;  %3425 = vmatprep.mubr.msk.bf16.mxu1 %vm4139_vm0, %v6489_v50 }
 0x33c   :  { %v3874_v41 = vpop.eup %3873  ;;  %1331 = vmatpush1.bf16.msra.mxu0 %v6498_v52  ;;  %3412 = vmatpush3.bf16.msra.mxu1 %v6499_v0  ;;  %v6531_v52 = vld [vmem:[#allocation22_spill] sm:$0xff]  ;;  %v6532_v0 = vld [vmem:[#allocation23_spill] sm:$0xff] }
 0x33d   :  { %v1319_v61 = vmul.f32 %v3874_v41, %v1318_v60  ;;  %1332 = vmatprep.subr.bf16.mxu0 %v6500_v49  ;;  %3413 = vmatprep.subr.bf16.mxu1 %v6489_v50  ;;  %v6533_v49 = vld [vmem:[#allocation24_spill] sm:$0xff] }
 0x33e   :  { %v5169_v60 = vld [vmem:[%s6315_s4 + $0x68] ss:$12 sps:$4 sm:$0xff]  }
 0x33f   :  { %v1321_v5 = vadd.f32 %v1320_v40, %v1319_v61  ;;  %6552 = vst [vmem:[#allocation3_spill] sm:$0xff] %v5169_v60  ;;  %v5175_v40 = vld [vmem:[%s6315_s4 + $0x4c] ss:$12 sps:$4 sm:$0xff]   ;;  %v5182_v41 = vld [vmem:[%s6315_s4 + $0x48] ss:$12 sps:$4 sm:$0xff]  }
 0x340   :  { %1333 = vmatpush1.bf16.msra.mxu0 %v6501_v6  ;;  %3414 = vmatpush3.bf16.msra.mxu1 %v6502_v62  ;;  %v6534_v6 = vld [vmem:[#allocation25_spill] sm:$0xff]  ;;  %6553 = vst [vmem:[#allocation4_spill] sm:$0xff] %v5175_v40  ;;  %6554 = vst [vmem:[#allocation8_spill] sm:$0xff] %v5182_v41 }
 0x341   :  { %3877 = vtanh.f32 %v1321_v5  ;;  %1334 = vmatprep.subr.bf16.mxu0 %v6528_v2  ;;  %3415 = vmatprep.subr.bf16.mxu1 %v6489_v50  ;;  %v3876_v62 = vpop.eup %3875  ;;  %v5188_v61 = vld [vmem:[%s6315_s4 + $0x50] ss:$12 sps:$4 sm:$0xff]   ;;  %v5194_v5 = vld [vmem:[%s6315_s4 + $0x34] ss:$12 sps:$4 sm:$0xff]  }
 0x342   :  { %v1323_v1 = vsub.f32 1.0, %v3876_v62  ;;  %v1325_v8 = vmul.f32 %v3876_v62, %v4808_v59  ;;  %v4995_v59 = vld [vmem:[%s6314_s1 + $0x80] ss:$12 sps:$4 sm:$0xff]   ;;  %6555 = vst [vmem:[#allocation6_spill] sm:$0xff] %v5188_v61  ;;  %6556 = vst [vmem:[#allocation7_spill] sm:$0xff] %v5194_v5 }
 0x343   :  { %v5201_v2 = vld [vmem:[%s6315_s4 + $0x30] ss:$12 sps:$4 sm:$0xff]   ;;  %v5245_v62 = vld [vmem:[%s6315_s4 + $0x8] ss:$12 sps:$4 sm:$0xff]  }
 0x344   :  { %1335 = vmatpush1.bf16.msra.mxu0 %v6529_v46  ;;  %3416 = vmatpush3.bf16.msra.mxu1 %v6530_v57  ;;  %6557 = vst [vmem:[#allocation9_spill] sm:$0xff] %v5201_v2  ;;  %v5207_v46 = vld [vmem:[%s6315_s4 + $0x38] ss:$12 sps:$4 sm:$0xff]   ;;  %v5213_v57 = vld [vmem:[%s6315_s4 + $0x1c] ss:$12 sps:$4 sm:$0xff]   ;;  %6564 = vst [vmem:[#allocation24_spill] sm:$0xff] %v5245_v62 }
 0x345   :  { %1336 = vmatprep.subr.bf16.mxu0 %v6531_v52  ;;  %3417 = vmatprep.subr.bf16.mxu1 %v6489_v50  ;;  %6558 = vst [vmem:[#allocation10_spill] sm:$0xff] %v5207_v46  ;;  %6559 = vst [vmem:[#allocation19_spill] sm:$0xff] %v5213_v57  ;;  %v5220_v52 = vld [vmem:[%s6315_s4 + $0x18] ss:$12 sps:$4 sm:$0xff]  }
 0x346   :  { %6560 = vst [vmem:[#allocation20_spill] sm:$0xff] %v5220_v52 }
 0x348   :  { %1337 = vmatpush1.bf16.msra.mxu0 %v6532_v0  ;;  %3418 = vmatpush3.bf16.msra.mxu1 %v6533_v49  ;;  %v5226_v0 = vld [vmem:[%s6315_s4 + $0x20] ss:$12 sps:$4 sm:$0xff]   ;;  %v5232_v49 = vld [vmem:[%s6315_s4 + $0x4] ss:$12 sps:$4 sm:$0xff]  }
 0x349   :  { %1338 = vmatprep.subr.bf16.mxu0 %v6534_v6  ;;  %3419 = vmatprep.subr.bf16.mxu1 %v6489_v50  ;;  %6561 = vst [vmem:[#allocation21_spill] sm:$0xff] %v5226_v0  ;;  %6562 = vst [vmem:[#allocation22_spill] sm:$0xff] %v5232_v49  ;;  %v5239_v6 = vld [vmem:[%s6315_s4] ss:$12 sps:$4 sm:$0xff]  }
 0x34a   :  { %6563 = vst [vmem:[#allocation23_spill] sm:$0xff] %v5239_v6 }
 0x34c   :  { %1339 = vmatpush1.bf16.msra.mxu0 %v6535_v42  ;;  %3420 = vmatpush3.bf16.msra.mxu1 %v6536_v43  ;;  %v5251_v42 = vld [vmem:[%s6316_s3 + $0xac] ss:$12 sps:$4 sm:$0xff]  }
 0x34d   :  { %1340 = vmatprep.subr.bf16.mxu0 %v6537_v4  ;;  %3421 = vmatprep.subr.bf16.mxu1 %v6489_v50  ;;  %6565 = vst [vmem:[#allocation25_spill] sm:$0xff] %v5251_v42 }
 0x34e   :  { %v3878_v58 = vpop.eup %3877 }
 0x34f   :  { %v1324_v7 = vmul.f32 %v3878_v58, %v1323_v1 }
 0x350   :  { %1341 = vmatpush1.bf16.msra.mxu0 %v6513_v45  ;;  %3422 = vmatpush3.bf16.msra.mxu1 %v6514_v56  ;;  %v4969_v45 = vld [vmem:[%s6314_s1 + $0xb0] ss:$12 sps:$4 sm:$0xff]   ;;  %v4981_v56 = vld [vmem:[%s6314_s1 + $0x98] ss:$12 sps:$4 sm:$0xff]  }
 0x351   :  { %1342 = vmatprep.subr.bf16.mxu0 %v6515_v44  ;;  %3423 = vmatprep.subr.bf16.mxu1 %v6489_v50  ;;  %v4957_v10 = vadd.f32 %v1325_v8, %v1324_v7  ;;  %v4989_v44 = vld [vmem:[%s6314_s1 + $0x78] ss:$12 sps:$4 sm:$0xff]  }
 0x353   :  { %v1327_v11 = vpack.c.bf16 %v4957_v10, %v4957_v10 }
 0x354   :  { %1343 = vmatpush1.bf16.msra.mxu0 %v6516_v3  ;;  %3424 = vmatpush3.bf16.msra.mxu1 %v6517_v55  ;;  %v5001_v3 = vld [vmem:[%s6314_s1 + $0x64] ss:$12 sps:$4 sm:$0xff]   ;;  %v5008_v55 = vld [vmem:[%s6314_s1 + $0x60] ss:$12 sps:$4 sm:$0xff]  }
 0x355   :  { %1431 = vmatprep.subr.bf16.mxu0 %v4817_v63  ;;  %3429 = vmatprep.subr.bf16.mxu1 %v6489_v50 }
 0x357   :  { %1361 = vmatmul.mubr.bf16.vlgmr.msra.gmra.mxu0 %v1327_v11  ;;  %3426 = vmatmul.mubr.bf16.vlgmr.msra.gmra.mxu1 %v1327_v11 }
 0x358   :  { %1432 = vmatpush1.bf16.msra.mxu0 %v4824_v48  ;;  %3430 = vmatpush3.bf16.msra.mxu1 %v4969_v45 }
 0x359   :  { %1433 = vmatprep.subr.bf16.mxu0 %v4831_v51  ;;  %3431 = vmatprep.subr.bf16.mxu1 %v6489_v50 }
 0x35a   :  { %1463 = vmatprep.mubr.bf16.mxu0 %v6490_v54  ;;  %3445 = vmatprep.mubr.msk.bf16.mxu1 %vm4139_vm0, %v6489_v50 }
 0x35c   :  { %1434 = vmatpush1.bf16.msra.mxu0 %v4841_v28  ;;  %3432 = vmatpush3.bf16.msra.mxu1 %v4981_v56 }
 0x35d   :  { %1435 = vmatprep.subr.bf16.mxu0 %v4848_v9  ;;  %3433 = vmatprep.subr.bf16.mxu1 %v6489_v50 }
 0x360   :  { %1436 = vmatpush1.bf16.msra.mxu0 %v4989_v44  ;;  %3434 = vmatpush3.bf16.msra.mxu1 %v4995_v59 }
 0x361   :  { %1437 = vmatprep.subr.bf16.mxu0 %v5001_v3  ;;  %3435 = vmatprep.subr.bf16.mxu1 %v6489_v50 }
 0x364   :  { %1438 = vmatpush1.bf16.msra.mxu0 %v5008_v55  ;;  %3436 = vmatpush3.bf16.msra.mxu1 %v5014_v12 }
 0x365   :  { %1439 = vmatprep.subr.bf16.mxu0 %v5020_v13  ;;  %3437 = vmatprep.subr.bf16.mxu1 %v6489_v50 }
 0x368   :  { %1440 = vmatpush1.bf16.msra.mxu0 %v5027_v14  ;;  %3438 = vmatpush3.bf16.msra.mxu1 %v5033_v15 }
 0x369   :  { %1441 = vmatprep.subr.bf16.mxu0 %v5039_v16  ;;  %3439 = vmatprep.subr.bf16.mxu1 %v6489_v50 }
 0x36c   :  { %1442 = vmatpush1.bf16.msra.mxu0 %v5046_v18  ;;  %3440 = vmatpush3.bf16.msra.mxu1 %v5052_v19 }
 0x36d   :  { %1443 = vmatprep.subr.bf16.mxu0 %v5058_v20  ;;  %3441 = vmatprep.subr.bf16.mxu1 %v6489_v50 }
 0x370   :  { %1444 = vmatpush1.bf16.msra.mxu0 %v5065_v21  ;;  %3442 = vmatpush3.bf16.msra.mxu1 %v5071_v22 }
 0x371   :  { %1445 = vmatprep.subr.bf16.mxu0 %v5077_v23  ;;  %3443 = vmatprep.subr.bf16.mxu1 %v6489_v50 }
 0x374   :  { %1446 = vmatpush1.bf16.msra.mxu0 %v5084_v24  ;;  %3444 = vmatpush3.bf16.msra.mxu1 %v5090_v27 }
 0x375   :  { %1513 = vmatprep.subr.bf16.mxu0 %v5096_v29  ;;  %3449 = vmatprep.subr.bf16.mxu1 %v6489_v50 }
 0x377   :  { %1464 = vmatmul.mubr.bf16.vlgmr.msra.gmra.mxu0 %v1327_v11  ;;  %3446 = vmatmul.mubr.bf16.vlgmr.msra.gmra.mxu1 %v1327_v11 }
 0x378   :  { %1514 = vmatpush1.bf16.msra.mxu0 %v5103_v30  ;;  %3450 = vmatpush3.bf16.msra.mxu1 %v5109_v31 }
 0x379   :  { %1515 = vmatprep.subr.bf16.mxu0 %v5115_v17  ;;  %3451 = vmatprep.subr.bf16.mxu1 %v6489_v50 }
 0x37a   :  { %1545 = vmatprep.mubr.bf16.mxu0 %v6490_v54  ;;  %3465 = vmatprep.mubr.msk.bf16.mxu1 %vm4139_vm0, %v6489_v50 }
 0x37c   :  { %1516 = vmatpush1.bf16.msra.mxu0 %v5125_v33  ;;  %3452 = vmatpush3.bf16.msra.mxu1 %v5131_v34 }
 0x37d   :  { %1517 = vmatprep.subr.bf16.mxu0 %v5137_v35  ;;  %3453 = vmatprep.subr.bf16.mxu1 %v6489_v50 }
 0x380   :  { %1518 = vmatpush1.bf16.msra.mxu0 %v5144_v36  ;;  %3454 = vmatpush3.bf16.msra.mxu1 %v5150_v25 }
 0x381   :  { %1519 = vmatprep.subr.bf16.mxu0 %v5156_v38  ;;  %3455 = vmatprep.subr.bf16.mxu1 %v6489_v50 }
 0x384   :  { %1520 = vmatpush1.bf16.msra.mxu0 %v5163_v39  ;;  %3456 = vmatpush3.bf16.msra.mxu1 %v5169_v60 }
 0x385   :  { %1521 = vmatprep.subr.bf16.mxu0 %v5175_v40  ;;  %3457 = vmatprep.subr.bf16.mxu1 %v6489_v50 }
 0x388   :  { %1522 = vmatpush1.bf16.msra.mxu0 %v5182_v41  ;;  %3458 = vmatpush3.bf16.msra.mxu1 %v5188_v61 }
 0x389   :  { %1523 = vmatprep.subr.bf16.mxu0 %v5194_v5  ;;  %3459 = vmatprep.subr.bf16.mxu1 %v6489_v50 }
 0x38c   :  { %1524 = vmatpush1.bf16.msra.mxu0 %v5201_v2  ;;  %3460 = vmatpush3.bf16.msra.mxu1 %v5207_v46 }
 0x38d   :  { %1525 = vmatprep.subr.bf16.mxu0 %v5213_v57  ;;  %3461 = vmatprep.subr.bf16.mxu1 %v6489_v50 }
 0x390   :  { %1526 = vmatpush1.bf16.msra.mxu0 %v5220_v52  ;;  %3462 = vmatpush3.bf16.msra.mxu1 %v5226_v0 }
 0x391   :  { %1527 = vmatprep.subr.bf16.mxu0 %v5232_v49  ;;  %3463 = vmatprep.subr.bf16.mxu1 %v6489_v50 }
 0x394   :  { %1528 = vmatpush1.bf16.msra.mxu0 %v5239_v6  ;;  %3464 = vmatpush3.bf16.msra.mxu1 %v5245_v62 }
 0x395   :  { %1623 = vmatprep.subr.bf16.mxu0 %v5251_v42  ;;  %3469 = vmatprep.subr.bf16.mxu1 %v6489_v50 }
 0x3f7   :  { %v1252_v43 = vpop.f32.mrf.mxu0  ;;  %v1293_v4 = vpop.f32.mrf.mxu1 }
 0x3f9   :  { %v1254_v1 = vpop.f32.mrf.mxu0  ;;  %v3407_v58 = vpop.f32.mrf.mxu1 }
 0x3fb   :  { %v1256_v7 = vpop.f32.mrf.mxu0  ;;  %v1296_v8 = vpop.f32.mrf.mxu1 }
 0x3fd   :  { %v1257_v11 = vpop.f32.mrf.mxu0  ;;  %v3408_v6 = vpop.f32.mrf.mxu1 }
 0x417   :  { %v1362_v49 = vpop.f32.mrf.mxu0  ;;  %v1403_v0 = vpop.f32.mrf.mxu1 }
 0x418   :  { %v1363_v62 = vadd.f32 %v1362_v49, %v6526_v26  ;;  %v3003_v49 = vld [vmem:[%s6317_s0 + $0x24] sm:$0xff] }
 0x419   :  { %v1364_v52 = vpop.f32.mrf.mxu0  ;;  %v3427_v57 = vpop.f32.mrf.mxu1 }
 0x41a   :  { %v1409_v46 = vadd.f32 %v1363_v62, %v1252_v43  ;;  %v1365_v2 = vadd.f32 %v1364_v52, %v6527_v32  ;;  %v1597_v62 = vunpack.c.l.bf16 %v3003_v49 }
 0x41b   :  { %v1366_v42 = vpop.f32.mrf.mxu0  ;;  %v1406_v5 = vpop.f32.mrf.mxu1 }
 0x41c   :  { %v3001_v61 = vmul.f32 -1.442695, %v1409_v46  ;;  %v1410_v58 = vadd.f32 %v1365_v2, %v1254_v1  ;;  %v1598_v2 = vunpack.c.h.bf16 %v3003_v49 }
 0x41d   :  { %v1367_v41 = vpop.f32.mrf.mxu0  ;;  %v3428_v40 = vpop.f32.mrf.mxu1 }
 0x41e   :  { %3879 = vpow2.f32 %v3001_v61  ;;  %v3002_v7 = vmul.f32 -1.442695, %v1410_v58  ;;  %v1423_v40 = vadd.f32 %v4758_v47, %v1293_v4 }
 0x420   :  { %3881 = vpow2.f32 %v3002_v7  ;;  %v1404_v7 = vadd.f32 %v1403_v0, %v4760_v53 }
 0x42b   :  { %v3880_v8 = vpop.eup %3879 }
 0x42c   :  { %v1417_v6 = vadd.f32 1.0, %v3880_v8 }
 0x42d   :  { %v3882_v57 = vpop.eup %3881 }
 0x42e   :  { %3883 = vrcp.f32 %v1417_v6  ;;  %v1418_v43 = vadd.f32 1.0, %v3882_v57 }
 0x430   :  { %3885 = vrcp.f32 %v1418_v43 }
 0x437   :  { %v1465_v52 = vpop.f32.mrf.mxu0  ;;  %v1506_v42 = vpop.f32.mrf.mxu1 }
 0x438   :  { %v1599_v5 = vadd.f32 %v1597_v62, %v1465_v52 }
 0x439   :  { %v1467_v46 = vpop.f32.mrf.mxu0  ;;  %v3447_v41 = vpop.f32.mrf.mxu1 }
 0x43a   :  { %v3005_v61 = vmul.f32 -1.442695, %v1599_v5  ;;  %v1600_v26 = vadd.f32 %v1598_v2, %v1467_v46  ;;  %v5275_v46 = vld [vmem:[%s6316_s3 + $0xa8] ss:$12 sps:$4 sm:$0xff]   ;;  %v5297_v2 = vld [vmem:[%s6318_s2] ss:$0 sm:$0xff] }
 0x43b   :  { %v3884_v1 = vpop.eup %3883  ;;  %v1469_v11 = vpop.f32.mrf.mxu0 }
 0x43c   :  { %v1509_v58 = vpop.f32.mrf.mxu1  ;;  %v1424_v8 = vmul.f32 %v3884_v1, %v1423_v40  ;;  %3887 = vpow2.f32 %v3005_v61  ;;  %v3006_v62 = vmul.f32 -1.442695, %v1600_v26  ;;  %v5270_v26 = vld [vmem:[%s6317_s0 + $0x2c] ss:$12 sps:$4 sm:$0xff]   ;;  %v5287_v61 = vld [vmem:[%s6316_s3 + $0x94] ss:$12 sps:$4 sm:$0xff]   ;;  %v1613_v1 = vadd.f32 %v5297_v2, %v1506_v42 }
 0x43d   :  { %v1470_v6 = vpop.f32.mrf.mxu0  ;;  %v3886_v52 = vpop.eup %3885  ;;  %v1615_v58 = vunpack.c.l.bf16 %v5270_v26  ;;  %v5316_v42 = vld [vmem:[%s6316_s3 + $0x7c] ss:$12 sps:$4 sm:$0xff]  }
 0x43e   :  { %v3448_v32 = vpop.f32.mrf.mxu1  ;;  %v1425_v57 = vadd.f32 %v1424_v8, %v1404_v7  ;;  %v1427_v4 = vsub.f32 1.0, %v3886_v52  ;;  %v1429_v5 = vmul.f32 %v3886_v52, %v4919_v37  ;;  %v5281_v37 = vld [vmem:[%s6316_s3 + $0xb0] ss:$12 sps:$4 sm:$0xff]   ;;  %v5310_v6 = vld [vmem:[%s6316_s3 + $0x98] ss:$12 sps:$4 sm:$0xff]  }
 0x43f   :  { %v5304_v8 = vld [vmem:[%s6316_s3 + $0x90] ss:$12 sps:$4 sm:$0xff]   ;;  %v5323_v52 = vld [vmem:[%s6316_s3 + $0x78] ss:$12 sps:$4 sm:$0xff]  }
 0x440   :  { %3889 = vtanh.f32 %v1425_v57 }
 0x441   :  { %3891 = vpow2.f32 %v3006_v62 }
 0x449   :  { %v3888_v41 = vpop.eup %3887 }
 0x44a   :  { %v1607_v47 = vadd.f32 1.0, %v3888_v41  ;;  %v5329_v41 = vld [vmem:[%s6316_s3 + $0x80] ss:$12 sps:$4 sm:$0xff]  }
 0x44c   :  { %3893 = vrcp.f32 %v1607_v47  ;;  %v5335_v47 = vld [vmem:[%s6316_s3 + $0x64] ss:$12 sps:$4 sm:$0xff]  }
 0x44d   :  { %v3890_v49 = vpop.eup %3889 }
 0x44e   :  { %v1428_v43 = vmul.f32 %v3890_v49, %v1427_v4  ;;  %v3892_v32 = vpop.eup %3891  ;;  %v5342_v4 = vld [vmem:[%s6316_s3 + $0x60] ss:$12 sps:$4 sm:$0xff]   ;;  %v5348_v49 = vld [vmem:[%s6316_s3 + $0x68] ss:$12 sps:$4 sm:$0xff]  }
 0x44f   :  { %v1608_v40 = vadd.f32 1.0, %v3892_v32  ;;  %v5373_v32 = vld [vmem:[%s6316_s3 + $0x34] ss:$12 sps:$4 sm:$0xff]  }
 0x450   :  { %v5263_v11 = vadd.f32 %v1429_v5, %v1428_v43  ;;  %v5354_v43 = vld [vmem:[%s6316_s3 + $0x4c] ss:$12 sps:$4 sm:$0xff]   ;;  %v5361_v5 = vld [vmem:[%s6316_s3 + $0x48] ss:$12 sps:$4 sm:$0xff]   ;;  %6567 = vst [vmem:[#allocation27_spill] sm:$0xff] %v5373_v32 }
 0x451   :  { %3895 = vrcp.f32 %v1608_v40 }
 0x452   :  { %v1512_v0 = vpack.c.bf16 %v5263_v11, %v5263_v11 }
 0x454   :  { %1546 = vmatmul.mubr.bf16.vlgmr.msra.gmra.mxu0 %v1512_v0  ;;  %3466 = vmatmul.mubr.bf16.vlgmr.msra.gmra.mxu1 %v1512_v0  ;;  %v5367_v0 = vld [vmem:[%s6316_s3 + $0x50] ss:$12 sps:$4 sm:$0xff]  }
 0x455   :  { %1624 = vmatpush1.bf16.msra.mxu0 %v5275_v46  ;;  %3470 = vmatpush3.bf16.msra.mxu1 %v5281_v37  ;;  %6566 = vst [vmem:[#allocation26_spill] sm:$0xff] %v5367_v0 }
 0x456   :  { %1625 = vmatprep.subr.bf16.mxu0 %v5287_v61  ;;  %3471 = vmatprep.subr.bf16.mxu1 %v6489_v50 }
 0x457   :  { %1655 = vmatprep.mubr.bf16.mxu0 %v6490_v54  ;;  %3485 = vmatprep.mubr.msk.bf16.mxu1 %vm4139_vm0, %v6489_v50 }
 0x459   :  { %v3894_v7 = vpop.eup %3893  ;;  %1626 = vmatpush1.bf16.msra.mxu0 %v5304_v8  ;;  %3472 = vmatpush3.bf16.msra.mxu1 %v5310_v6 }
 0x45a   :  { %v1614_v57 = vmul.f32 %v3894_v7, %v1613_v1  ;;  %1627 = vmatprep.subr.bf16.mxu0 %v5316_v42  ;;  %3473 = vmatprep.subr.bf16.mxu1 %v6489_v50  ;;  %v5380_v1 = vld [vmem:[%s6316_s3 + $0x30] ss:$12 sps:$4 sm:$0xff]  }
 0x45b   :  { %6568 = vst [vmem:[#allocation28_spill] sm:$0xff] %v5380_v1  ;;  %v5392_v7 = vld [vmem:[%s6316_s3 + $0x1c] ss:$12 sps:$4 sm:$0xff]  }
 0x45c   :  { %v1616_v62 = vadd.f32 %v1615_v58, %v1614_v57  ;;  %v5386_v58 = vld [vmem:[%s6316_s3 + $0x38] ss:$12 sps:$4 sm:$0xff]  }
 0x45d   :  { %1628 = vmatpush1.bf16.msra.mxu0 %v5323_v52  ;;  %3474 = vmatpush3.bf16.msra.mxu1 %v5329_v41  ;;  %6569 = vst [vmem:[#allocation36_spill] sm:$0xff] %v5386_v58 }
 0x45e   :  { %3897 = vtanh.f32 %v1616_v62  ;;  %1629 = vmatprep.subr.bf16.mxu0 %v5335_v47  ;;  %3475 = vmatprep.subr.bf16.mxu1 %v6489_v50  ;;  %v3896_v40 = vpop.eup %3895 }
 0x45f   :  { %v1618_v57 = vsub.f32 1.0, %v3896_v40 }
 0x461   :  { %1630 = vmatpush1.bf16.msra.mxu0 %v5342_v4  ;;  %3476 = vmatpush3.bf16.msra.mxu1 %v5348_v49 }
 0x462   :  { %1631 = vmatprep.subr.bf16.mxu0 %v5354_v43  ;;  %3477 = vmatprep.subr.bf16.mxu1 %v6489_v50 }
 0x465   :  { %1632 = vmatpush1.bf16.msra.mxu0 %v5361_v5  ;;  %3478 = vmatpush3.bf16.msra.mxu1 %v5367_v0  ;;  %v5400_v0 = vld [vmem:[%s6316_s3 + $0x18] ss:$12 sps:$4 sm:$0xff]  }
 0x466   :  { %1633 = vmatprep.subr.bf16.mxu0 %v5373_v32  ;;  %3479 = vmatprep.subr.bf16.mxu1 %v6489_v50 }
 0x469   :  { %1634 = vmatpush1.bf16.msra.mxu0 %v5380_v1  ;;  %3480 = vmatpush3.bf16.msra.mxu1 %v5386_v58  ;;  %v1620_v1 = vmul.f32 %v3896_v40, %v4957_v10  ;;  %v5406_v58 = vld [vmem:[%s6316_s3 + $0x20] ss:$12 sps:$4 sm:$0xff]  }
 0x46a   :  { %1635 = vmatprep.subr.bf16.mxu0 %v5392_v7  ;;  %3481 = vmatprep.subr.bf16.mxu1 %v6489_v50  ;;  %6570 = vst [vmem:[#allocation37_spill] sm:$0xff] %v5406_v58 }
 0x46b   :  { %v3898_v62 = vpop.eup %3897 }
 0x46c   :  { %v1619_v32 = vmul.f32 %v3898_v62, %v1618_v57  ;;  %v5412_v57 = vld [vmem:[%s6316_s3 + $0x4] ss:$12 sps:$4 sm:$0xff]   ;;  %v5423_v62 = vld [vmem:[%s6316_s3] ss:$12 sps:$4 sm:$0xff]  }
 0x46d   :  { %1636 = vmatpush1.bf16.msra.mxu0 %v5400_v0  ;;  %3482 = vmatpush3.bf16.msra.mxu1 %v5406_v58  ;;  %v5429_v58 = vld [vmem:[%s6316_s3 + $0x8] ss:$12 sps:$4 sm:$0xff]  }
 0x46e   :  { %1637 = vmatprep.subr.bf16.mxu0 %v5412_v57  ;;  %3483 = vmatprep.subr.bf16.mxu1 %v6489_v50  ;;  %v5416_v10 = vadd.f32 %v1620_v1, %v1619_v32  ;;  %v6576_v32 = vld [vmem:[#allocation10_spill] sm:$0xff]  ;;  %v6577_v1 = vld [vmem:[#allocation19_spill] sm:$0xff] }
 0x470   :  { %v1622_v40 = vpack.c.bf16 %v5416_v10, %v5416_v10 }
 0x471   :  { %1638 = vmatpush1.bf16.msra.mxu0 %v5423_v62  ;;  %3484 = vmatpush3.bf16.msra.mxu1 %v5429_v58 }
 0x472   :  { %1726 = vmatprep.subr.bf16.mxu0 %v4817_v63  ;;  %3489 = vmatprep.subr.bf16.mxu1 %v6489_v50  ;;  %v6571_v63 = vld [vmem:[#allocation4_spill] sm:$0xff] }
 0x474   :  { %1656 = vmatmul.mubr.bf16.vlgmr.msra.gmra.mxu0 %v1622_v40  ;;  %3486 = vmatmul.mubr.bf16.vlgmr.msra.gmra.mxu1 %v1622_v40 }
 0x475   :  { %1727 = vmatpush1.bf16.msra.mxu0 %v4824_v48  ;;  %3490 = vmatpush3.bf16.msra.mxu1 %v4969_v45  ;;  %v6572_v48 = vld [vmem:[#allocation8_spill] sm:$0xff] }
 0x476   :  { %1728 = vmatprep.subr.bf16.mxu0 %v4831_v51  ;;  %3491 = vmatprep.subr.bf16.mxu1 %v6489_v50  ;;  %v6573_v51 = vld [vmem:[#allocation6_spill] sm:$0xff] }
 0x477   :  { %1758 = vmatprep.mubr.bf16.mxu0 %v6490_v54  ;;  %3505 = vmatprep.mubr.msk.bf16.mxu1 %vm4139_vm0, %v6489_v50 }
 0x479   :  { %1729 = vmatpush1.bf16.msra.mxu0 %v4841_v28  ;;  %3492 = vmatpush3.bf16.msra.mxu1 %v4981_v56  ;;  %v6574_v28 = vld [vmem:[#allocation7_spill] sm:$0xff] }
 0x47a   :  { %1730 = vmatprep.subr.bf16.mxu0 %v4848_v9  ;;  %3493 = vmatprep.subr.bf16.mxu1 %v6489_v50  ;;  %v6575_v9 = vld [vmem:[#allocation9_spill] sm:$0xff] }
 0x47d   :  { %1731 = vmatpush1.bf16.msra.mxu0 %v4989_v44  ;;  %3494 = vmatpush3.bf16.msra.mxu1 %v4995_v59 }
 0x47e   :  { %1732 = vmatprep.subr.bf16.mxu0 %v5001_v3  ;;  %3495 = vmatprep.subr.bf16.mxu1 %v6489_v50 }
 0x481   :  { %1733 = vmatpush1.bf16.msra.mxu0 %v5008_v55  ;;  %3496 = vmatpush3.bf16.msra.mxu1 %v5014_v12 }
 0x482   :  { %1734 = vmatprep.subr.bf16.mxu0 %v5020_v13  ;;  %3497 = vmatprep.subr.bf16.mxu1 %v6489_v50 }
 0x485   :  { %1735 = vmatpush1.bf16.msra.mxu0 %v5027_v14  ;;  %3498 = vmatpush3.bf16.msra.mxu1 %v5033_v15 }
 0x486   :  { %1736 = vmatprep.subr.bf16.mxu0 %v5039_v16  ;;  %3499 = vmatprep.subr.bf16.mxu1 %v6489_v50 }
 0x489   :  { %1737 = vmatpush1.bf16.msra.mxu0 %v5046_v18  ;;  %3500 = vmatpush3.bf16.msra.mxu1 %v5052_v19 }
 0x48a   :  { %1738 = vmatprep.subr.bf16.mxu0 %v5058_v20  ;;  %3501 = vmatprep.subr.bf16.mxu1 %v6489_v50 }
 0x48d   :  { %1739 = vmatpush1.bf16.msra.mxu0 %v5065_v21  ;;  %3502 = vmatpush3.bf16.msra.mxu1 %v5071_v22 }
 0x48e   :  { %1740 = vmatprep.subr.bf16.mxu0 %v5077_v23  ;;  %3503 = vmatprep.subr.bf16.mxu1 %v6489_v50 }
 0x491   :  { %1741 = vmatpush1.bf16.msra.mxu0 %v5084_v24  ;;  %3504 = vmatpush3.bf16.msra.mxu1 %v5090_v27 }
 0x492   :  { %1808 = vmatprep.subr.bf16.mxu0 %v5096_v29  ;;  %3509 = vmatprep.subr.bf16.mxu1 %v6489_v50 }
 0x494   :  { %1759 = vmatmul.mubr.bf16.vlgmr.msra.gmra.mxu0 %v1622_v40  ;;  %3506 = vmatmul.mubr.bf16.vlgmr.msra.gmra.mxu1 %v1622_v40  ;;  %v6578_v40 = vld [vmem:[#allocation20_spill] sm:$0xff] }
 0x495   :  { %1809 = vmatpush1.bf16.msra.mxu0 %v5103_v30  ;;  %3510 = vmatpush3.bf16.msra.mxu1 %v5109_v31 }
 0x496   :  { %1810 = vmatprep.subr.bf16.mxu0 %v5115_v17  ;;  %3511 = vmatprep.subr.bf16.mxu1 %v6489_v50 }
 0x497   :  { %1840 = vmatprep.mubr.bf16.mxu0 %v6490_v54  ;;  %3525 = vmatprep.mubr.msk.bf16.mxu1 %vm4139_vm0, %v6489_v50 }
 0x499   :  { %1811 = vmatpush1.bf16.msra.mxu0 %v5125_v33  ;;  %3512 = vmatpush3.bf16.msra.mxu1 %v5131_v34 }
 0x49a   :  { %1812 = vmatprep.subr.bf16.mxu0 %v5137_v35  ;;  %3513 = vmatprep.subr.bf16.mxu1 %v6489_v50  ;;  %v6584_v35 = vld [vmem:[#allocation34_spill] sm:$0xff] }
 0x49d   :  { %1813 = vmatpush1.bf16.msra.mxu0 %v5144_v36  ;;  %3514 = vmatpush3.bf16.msra.mxu1 %v5150_v25 }
 0x49e   :  { %1814 = vmatprep.subr.bf16.mxu0 %v5156_v38  ;;  %3515 = vmatprep.subr.bf16.mxu1 %v6489_v50 }
 0x4a1   :  { %1815 = vmatpush1.bf16.msra.mxu0 %v5163_v39  ;;  %3516 = vmatpush3.bf16.msra.mxu1 %v5169_v60  ;;  %v6580_v60 = vld [vmem:[#allocation22_spill] sm:$0xff] }
 0x4a2   :  { %1816 = vmatprep.subr.bf16.mxu0 %v6571_v63  ;;  %3517 = vmatprep.subr.bf16.mxu1 %v6489_v50  ;;  %v6579_v63 = vld [vmem:[#allocation21_spill] sm:$0xff] }
 0x4a5   :  { %1817 = vmatpush1.bf16.msra.mxu0 %v6572_v48  ;;  %3518 = vmatpush3.bf16.msra.mxu1 %v6573_v51  ;;  %v6581_v51 = vld [vmem:[#allocation23_spill] sm:$0xff]  ;;  %v6583_v48 = vld [vmem:[#allocation25_spill] sm:$0xff] }
 0x4a6   :  { %1818 = vmatprep.subr.bf16.mxu0 %v6574_v28  ;;  %3519 = vmatprep.subr.bf16.mxu1 %v6489_v50  ;;  %v6582_v28 = vld [vmem:[#allocation24_spill] sm:$0xff] }
 0x4a9   :  { %1819 = vmatpush1.bf16.msra.mxu0 %v6575_v9  ;;  %3520 = vmatpush3.bf16.msra.mxu1 %v6576_v32 }
 0x4aa   :  { %1820 = vmatprep.subr.bf16.mxu0 %v6577_v1  ;;  %3521 = vmatprep.subr.bf16.mxu1 %v6489_v50 }
 0x4ad   :  { %1821 = vmatpush1.bf16.msra.mxu0 %v6578_v40  ;;  %3522 = vmatpush3.bf16.msra.mxu1 %v6579_v63 }
 0x4ae   :  { %1822 = vmatprep.subr.bf16.mxu0 %v6580_v60  ;;  %3523 = vmatprep.subr.bf16.mxu1 %v6489_v50 }
 0x4b1   :  { %1823 = vmatpush1.bf16.msra.mxu0 %v6581_v51  ;;  %3524 = vmatpush3.bf16.msra.mxu1 %v6582_v28  ;;  %v6585_v28 = vld [vmem:[#allocation35_spill] sm:$0xff] }
 0x4b2   :  { %1918 = vmatprep.subr.bf16.mxu0 %v6583_v48  ;;  %3529 = vmatprep.subr.bf16.mxu1 %v6489_v50 }
 0x514   :  { %v1547_v32 = vpop.f32.mrf.mxu0  ;;  %v1588_v1 = vpop.f32.mrf.mxu1 }
 0x516   :  { %v1549_v9 = vpop.f32.mrf.mxu0  ;;  %v3467_v39 = vpop.f32.mrf.mxu1 }
 0x518   :  { %v1551_v38 = vpop.f32.mrf.mxu0  ;;  %v1591_v40 = vpop.f32.mrf.mxu1 }
 0x51a   :  { %v1552_v25 = vpop.f32.mrf.mxu0  ;;  %v3468_v63 = vpop.f32.mrf.mxu1 }
 0x534   :  { %v1657_v36 = vpop.f32.mrf.mxu0  ;;  %v1698_v60 = vpop.f32.mrf.mxu1 }
 0x535   :  { %v1658_v34 = vadd.f32 %v1657_v36, %v6584_v35  ;;  %v3009_v36 = vld [vmem:[%s6317_s0 + $0x30] sm:$0xff] }
 0x536   :  { %v1659_v33 = vpop.f32.mrf.mxu0  ;;  %v3487_v51 = vpop.f32.mrf.mxu1 }
 0x537   :  { %v1704_v17 = vadd.f32 %v1658_v34, %v1547_v32  ;;  %v1660_v31 = vadd.f32 %v1659_v33, %v6585_v28  ;;  %v1892_v34 = vunpack.c.l.bf16 %v3009_v36 }
 0x538   :  { %v1661_v48 = vpop.f32.mrf.mxu0  ;;  %v1701_v30 = vpop.f32.mrf.mxu1 }
 0x539   :  { %v3007_v29 = vmul.f32 -1.442695, %v1704_v17  ;;  %v1705_v39 = vadd.f32 %v1660_v31, %v1549_v9  ;;  %v1893_v9 = vunpack.c.h.bf16 %v3009_v36 }
 0x53a   :  { %v1662_v27 = vpop.f32.mrf.mxu0  ;;  %v3488_v24 = vpop.f32.mrf.mxu1 }
 0x53b   :  { %3899 = vpow2.f32 %v3007_v29  ;;  %v3008_v38 = vmul.f32 -1.442695, %v1705_v39  ;;  %v5512_v24 = vld [vmem:[%s6320_s6] ss:$0 sm:$0xff] }
 0x53c   :  { %v1718_v29 = vadd.f32 %v5512_v24, %v1588_v1 }
 0x53d   :  { %3901 = vpow2.f32 %v3008_v38 }
 0x548   :  { %v3900_v25 = vpop.eup %3899 }
 0x549   :  { %v1712_v63 = vadd.f32 1.0, %v3900_v25  ;;  %v1699_v25 = vadd.f32 %v1698_v60, %v4760_v53 }
 0x54a   :  { %v3902_v51 = vpop.eup %3901 }
 0x54b   :  { %3903 = vrcp.f32 %v1712_v63  ;;  %v1713_v32 = vadd.f32 1.0, %v3902_v51 }
 0x54d   :  { %3905 = vrcp.f32 %v1713_v32 }
 0x554   :  { %v1760_v33 = vpop.f32.mrf.mxu0  ;;  %v1801_v48 = vpop.f32.mrf.mxu1 }
 0x555   :  { %v1894_v30 = vadd.f32 %v1892_v34, %v1760_v33 }
 0x556   :  { %v1762_v17 = vpop.f32.mrf.mxu0  ;;  %v3507_v27 = vpop.f32.mrf.mxu1 }
 0x557   :  { %v3011_v31 = vmul.f32 -1.442695, %v1894_v30  ;;  %v1895_v27 = vadd.f32 %v1893_v9, %v1762_v17 }
 0x558   :  { %v3904_v40 = vpop.eup %3903  ;;  %v1764_v39 = vpop.f32.mrf.mxu0 }
 0x559   :  { %v1804_v38 = vpop.f32.mrf.mxu1  ;;  %v1719_v63 = vmul.f32 %v3904_v40, %v1718_v29  ;;  %3907 = vpow2.f32 %v3011_v31  ;;  %v3012_v28 = vmul.f32 -1.442695, %v1895_v27  ;;  %v6588_v40 = vld [vmem:[#allocation28_spill] sm:$0xff]  ;;  %v6590_v27 = vld [vmem:[#allocation37_spill] sm:$0xff] }
 0x55a   :  { %v1765_v51 = vpop.f32.mrf.mxu0  ;;  %v3906_v35 = vpop.eup %3905 }
 0x55b   :  { %v3508_v34 = vpop.f32.mrf.mxu1  ;;  %v1720_v33 = vadd.f32 %v1719_v63, %v1699_v25  ;;  %v1722_v36 = vsub.f32 1.0, %v3906_v35  ;;  %v1724_v39 = vmul.f32 %v3906_v35, %v5263_v11  ;;  %v1910_v35 = vunpack.c.h.bf16 %v5270_v26  ;;  %v6586_v26 = vld [vmem:[#allocation26_spill] sm:$0xff]  ;;  %v6589_v25 = vld [vmem:[#allocation36_spill] sm:$0xff] }
 0x55d   :  { %3909 = vtanh.f32 %v1720_v33 }
 0x55e   :  { %3911 = vpow2.f32 %v3012_v28 }
 0x566   :  { %v3908_v23 = vpop.eup %3907 }
 0x567   :  { %v1902_v1 = vadd.f32 1.0, %v3908_v23  ;;  %v1908_v23 = vadd.f32 %v5297_v2, %v1801_v48  ;;  %v6587_v48 = vld [vmem:[#allocation27_spill] sm:$0xff] }
 0x569   :  { %3913 = vrcp.f32 %v1902_v1 }
 0x56a   :  { %v3910_v30 = vpop.eup %3909 }
 0x56b   :  { %v1723_v32 = vmul.f32 %v3910_v30, %v1722_v36  ;;  %v3912_v29 = vpop.eup %3911  ;;  %v5571_v30 = vld [vmem:[%s6314_s1 + $0xa8] ss:$12 sps:$4 sm:$0xff]  }
 0x56c   :  { %v1903_v28 = vadd.f32 1.0, %v3912_v29  ;;  %v6607_v29 = vld [vmem:[#allocation8_spill] sm:$0xff] }
 0x56d   :  { %v5517_v38 = vadd.f32 %v1724_v39, %v1723_v32  ;;  %v5578_v32 = vld [vmem:[%s6314_s1 + $0x94] ss:$12 sps:$4 sm:$0xff]   ;;  %v5588_v39 = vld [vmem:[%s6314_s1 + $0x90] ss:$12 sps:$4 sm:$0xff]  }
 0x56e   :  { %3915 = vrcp.f32 %v1903_v28  ;;  %v6608_v28 = vld [vmem:[#allocation6_spill] sm:$0xff] }
 0x56f   :  { %v1807_v60 = vpack.c.bf16 %v5517_v38, %v5517_v38 }
 0x571   :  { %1841 = vmatmul.mubr.bf16.vlgmr.msra.gmra.mxu0 %v1807_v60  ;;  %3526 = vmatmul.mubr.bf16.vlgmr.msra.gmra.mxu1 %v1807_v60  ;;  %v6606_v60 = vld [vmem:[#allocation4_spill] sm:$0xff] }
 0x572   :  { %1919 = vmatpush1.bf16.msra.mxu0 %v5275_v46  ;;  %3530 = vmatpush3.bf16.msra.mxu1 %v5281_v37 }
 0x573   :  { %1920 = vmatprep.subr.bf16.mxu0 %v5287_v61  ;;  %3531 = vmatprep.subr.bf16.mxu1 %v6489_v50 }
 0x574   :  { %1950 = vmatprep.mubr.bf16.mxu0 %v6490_v54  ;;  %3545 = vmatprep.mubr.msk.bf16.mxu1 %vm4139_vm0, %v6489_v50 }
 0x576   :  { %v3914_v11 = vpop.eup %3913  ;;  %1921 = vmatpush1.bf16.msra.mxu0 %v5304_v8  ;;  %3532 = vmatpush3.bf16.msra.mxu1 %v5310_v6 }
 0x577   :  { %v1909_v17 = vmul.f32 %v3914_v11, %v1908_v23  ;;  %1922 = vmatprep.subr.bf16.mxu0 %v5316_v42  ;;  %3533 = vmatprep.subr.bf16.mxu1 %v6489_v50  ;;  %v6609_v23 = vld [vmem:[#allocation7_spill] sm:$0xff]  ;;  %v6611_v11 = vld [vmem:[#allocation10_spill] sm:$0xff] }
 0x579   :  { %v1911_v31 = vadd.f32 %v1910_v35, %v1909_v17  ;;  %v6610_v35 = vld [vmem:[#allocation9_spill] sm:$0xff]  ;;  %v6612_v17 = vld [vmem:[#allocation19_spill] sm:$0xff] }
 0x57a   :  { %1923 = vmatpush1.bf16.msra.mxu0 %v5323_v52  ;;  %3534 = vmatpush3.bf16.msra.mxu1 %v5329_v41 }
 0x57b   :  { %3917 = vtanh.f32 %v1911_v31  ;;  %1924 = vmatprep.subr.bf16.mxu0 %v5335_v47  ;;  %3535 = vmatprep.subr.bf16.mxu1 %v6489_v50  ;;  %v3916_v9 = vpop.eup %3915  ;;  %v6613_v31 = vld [vmem:[#allocation20_spill] sm:$0xff] }
 0x57c   :  { %v1913_v63 = vsub.f32 1.0, %v3916_v9  ;;  %v1915_v33 = vmul.f32 %v3916_v9, %v5416_v10  ;;  %v5564_v10 = vld [vmem:[%s6314_s1 + $0xac] ss:$12 sps:$4 sm:$0xff]   ;;  %v6614_v9 = vld [vmem:[#allocation21_spill] sm:$0xff] }
 0x57e   :  { %1925 = vmatpush1.bf16.msra.mxu0 %v5342_v4  ;;  %3536 = vmatpush3.bf16.msra.mxu1 %v5348_v49 }
 0x57f   :  { %1926 = vmatprep.subr.bf16.mxu0 %v5354_v43  ;;  %3537 = vmatprep.subr.bf16.mxu1 %v6489_v50 }
 0x582   :  { %1927 = vmatpush1.bf16.msra.mxu0 %v5361_v5  ;;  %3538 = vmatpush3.bf16.msra.mxu1 %v6586_v26 }
 0x583   :  { %1928 = vmatprep.subr.bf16.mxu0 %v6587_v48  ;;  %3539 = vmatprep.subr.bf16.mxu1 %v6489_v50 }
 0x586   :  { %1929 = vmatpush1.bf16.msra.mxu0 %v6588_v40  ;;  %3540 = vmatpush3.bf16.msra.mxu1 %v6589_v25 }
 0x587   :  { %1930 = vmatprep.subr.bf16.mxu0 %v5392_v7  ;;  %3541 = vmatprep.subr.bf16.mxu1 %v6489_v50 }
 0x588   :  { %v3918_v51 = vpop.eup %3917 }
 0x589   :  { %v1914_v34 = vmul.f32 %v3918_v51, %v1913_v63  ;;  %v6615_v63 = vld [vmem:[#allocation22_spill] sm:$0xff]  ;;  %v6616_v51 = vld [vmem:[#allocation23_spill] sm:$0xff] }
 0x58a   :  { %1931 = vmatpush1.bf16.msra.mxu0 %v5400_v0  ;;  %3542 = vmatpush3.bf16.msra.mxu1 %v6590_v27 }
 0x58b   :  { %1932 = vmatprep.subr.bf16.mxu0 %v5412_v57  ;;  %3543 = vmatprep.subr.bf16.mxu1 %v6489_v50  ;;  %v5555_v1 = vadd.f32 %v1915_v33, %v1914_v34  ;;  %v6617_v34 = vld [vmem:[#allocation24_spill] sm:$0xff]  ;;  %v6618_v33 = vld [vmem:[#allocation25_spill] sm:$0xff] }
 0x58d   :  { %v1917_v36 = vpack.c.bf16 %v5555_v1, %v5555_v1 }
 0x58e   :  { %1933 = vmatpush1.bf16.msra.mxu0 %v5423_v62  ;;  %3544 = vmatpush3.bf16.msra.mxu1 %v5429_v58 }
 0x58f   :  { %2021 = vmatprep.subr.bf16.mxu0 %v5564_v10  ;;  %3549 = vmatprep.subr.bf16.mxu1 %v6489_v50 }
 0x591   :  { %1951 = vmatmul.mubr.bf16.vlgmr.msra.gmra.mxu0 %v1917_v36  ;;  %3546 = vmatmul.mubr.bf16.vlgmr.msra.gmra.mxu1 %v1917_v36 }
 0x592   :  { %2022 = vmatpush1.bf16.msra.mxu0 %v5571_v30  ;;  %3550 = vmatpush3.bf16.msra.mxu1 %v4969_v45  ;;  %v5595_v45 = vld [vmem:[%s6314_s1 + $0x7c] ss:$12 sps:$4 sm:$0xff]  }
 0x593   :  { %2023 = vmatprep.subr.bf16.mxu0 %v5578_v32  ;;  %3551 = vmatprep.subr.bf16.mxu1 %v6489_v50 }
 0x594   :  { %2053 = vmatprep.mubr.bf16.mxu0 %v6490_v54  ;;  %3565 = vmatprep.mubr.msk.bf16.mxu1 %vm4139_vm0, %v6489_v50 }
 0x596   :  { %2024 = vmatpush1.bf16.msra.mxu0 %v5588_v39  ;;  %3552 = vmatpush3.bf16.msra.mxu1 %v4981_v56  ;;  %v6591_v56 = vld [vmem:[#allocation11_spill] sm:$0xff] }
 0x597   :  { %2025 = vmatprep.subr.bf16.mxu0 %v5595_v45  ;;  %3553 = vmatprep.subr.bf16.mxu1 %v6489_v50 }
 0x59a   :  { %2026 = vmatpush1.bf16.msra.mxu0 %v4989_v44  ;;  %3554 = vmatpush3.bf16.msra.mxu1 %v4995_v59  ;;  %v6592_v44 = vld [vmem:[#allocation12_spill] sm:$0xff]  ;;  %v6593_v59 = vld [vmem:[#allocation13_spill] sm:$0xff] }
 0x59b   :  { %2027 = vmatprep.subr.bf16.mxu0 %v5001_v3  ;;  %3555 = vmatprep.subr.bf16.mxu1 %v6489_v50  ;;  %v6594_v3 = vld [vmem:[#allocation14_spill] sm:$0xff] }
 0x59e   :  { %2028 = vmatpush1.bf16.msra.mxu0 %v5008_v55  ;;  %3556 = vmatpush3.bf16.msra.mxu1 %v5014_v12  ;;  %v6595_v55 = vld [vmem:[#allocation15_spill] sm:$0xff]  ;;  %v6596_v12 = vld [vmem:[#allocation16_spill] sm:$0xff] }
 0x59f   :  { %2029 = vmatprep.subr.bf16.mxu0 %v5020_v13  ;;  %3557 = vmatprep.subr.bf16.mxu1 %v6489_v50  ;;  %v6597_v13 = vld [vmem:[#allocation17_spill] sm:$0xff] }
 0x5a2   :  { %2030 = vmatpush1.bf16.msra.mxu0 %v5027_v14  ;;  %3558 = vmatpush3.bf16.msra.mxu1 %v5033_v15  ;;  %v6598_v14 = vld [vmem:[#allocation18_spill] sm:$0xff]  ;;  %v6599_v15 = vld [vmem:[#allocation29_spill] sm:$0xff] }
 0x5a3   :  { %2031 = vmatprep.subr.bf16.mxu0 %v5039_v16  ;;  %3559 = vmatprep.subr.bf16.mxu1 %v6489_v50  ;;  %v6600_v16 = vld [vmem:[#allocation30_spill] sm:$0xff] }
 0x5a6   :  { %2032 = vmatpush1.bf16.msra.mxu0 %v5046_v18  ;;  %3560 = vmatpush3.bf16.msra.mxu1 %v5052_v19  ;;  %v6601_v18 = vld [vmem:[#allocation31_spill] sm:$0xff]  ;;  %v6602_v19 = vld [vmem:[#allocation32_spill] sm:$0xff] }
 0x5a7   :  { %2033 = vmatprep.subr.bf16.mxu0 %v5058_v20  ;;  %3561 = vmatprep.subr.bf16.mxu1 %v6489_v50  ;;  %v6603_v20 = vld [vmem:[#allocation33_spill] sm:$0xff] }
 0x5aa   :  { %2034 = vmatpush1.bf16.msra.mxu0 %v5065_v21  ;;  %3562 = vmatpush3.bf16.msra.mxu1 %v5071_v22  ;;  %v6604_v21 = vld [vmem:[#allocation5_spill] sm:$0xff]  ;;  %v6605_v22 = vld [vmem:[#allocation3_spill] sm:$0xff] }
 0x5ab   :  { %2035 = vmatprep.subr.bf16.mxu0 %v6591_v56  ;;  %3563 = vmatprep.subr.bf16.mxu1 %v6489_v50 }
 0x5ae   :  { %2036 = vmatpush1.bf16.msra.mxu0 %v6592_v44  ;;  %3564 = vmatpush3.bf16.msra.mxu1 %v6593_v59 }
 0x5af   :  { %2103 = vmatprep.subr.bf16.mxu0 %v6594_v3  ;;  %3569 = vmatprep.subr.bf16.mxu1 %v6489_v50 }
 0x5b1   :  { %2054 = vmatmul.mubr.bf16.vlgmr.msra.gmra.mxu0 %v1917_v36  ;;  %3566 = vmatmul.mubr.bf16.vlgmr.msra.gmra.mxu1 %v1917_v36 }
 0x5b2   :  { %2104 = vmatpush1.bf16.msra.mxu0 %v6595_v55  ;;  %3570 = vmatpush3.bf16.msra.mxu1 %v6596_v12 }
 0x5b3   :  { %2105 = vmatprep.subr.bf16.mxu0 %v6597_v13  ;;  %3571 = vmatprep.subr.bf16.mxu1 %v6489_v50 }
 0x5b4   :  { %2135 = vmatprep.mubr.bf16.mxu0 %v6490_v54  ;;  %3585 = vmatprep.mubr.msk.bf16.mxu1 %vm4139_vm0, %v6489_v50 }
 0x5b6   :  { %2106 = vmatpush1.bf16.msra.mxu0 %v6598_v14  ;;  %3572 = vmatpush3.bf16.msra.mxu1 %v6599_v15 }
 0x5b7   :  { %2107 = vmatprep.subr.bf16.mxu0 %v6600_v16  ;;  %3573 = vmatprep.subr.bf16.mxu1 %v6489_v50  ;;  %v6619_v16 = vld [vmem:[#allocation34_spill] sm:$0xff] }
 0x5ba   :  { %2108 = vmatpush1.bf16.msra.mxu0 %v6601_v18  ;;  %3574 = vmatpush3.bf16.msra.mxu1 %v6602_v19 }
 0x5bb   :  { %2109 = vmatprep.subr.bf16.mxu0 %v6603_v20  ;;  %3575 = vmatprep.subr.bf16.mxu1 %v6489_v50 }
 0x5be   :  { %2110 = vmatpush1.bf16.msra.mxu0 %v6604_v21  ;;  %3576 = vmatpush3.bf16.msra.mxu1 %v6605_v22  ;;  %v6620_v22 = vld [vmem:[#allocation35_spill] sm:$0xff] }
 0x5bf   :  { %2111 = vmatprep.subr.bf16.mxu0 %v6606_v60  ;;  %3577 = vmatprep.subr.bf16.mxu1 %v6489_v50 }
 0x5c2   :  { %2112 = vmatpush1.bf16.msra.mxu0 %v6607_v29  ;;  %3578 = vmatpush3.bf16.msra.mxu1 %v6608_v28 }
 0x5c3   :  { %2113 = vmatprep.subr.bf16.mxu0 %v6609_v23  ;;  %3579 = vmatprep.subr.bf16.mxu1 %v6489_v50 }
 0x5c6   :  { %2114 = vmatpush1.bf16.msra.mxu0 %v6610_v35  ;;  %3580 = vmatpush3.bf16.msra.mxu1 %v6611_v11 }
 0x5c7   :  { %2115 = vmatprep.subr.bf16.mxu0 %v6612_v17  ;;  %3581 = vmatprep.subr.bf16.mxu1 %v6489_v50 }
 0x5ca   :  { %2116 = vmatpush1.bf16.msra.mxu0 %v6613_v31  ;;  %3582 = vmatpush3.bf16.msra.mxu1 %v6614_v9 }
 0x5cb   :  { %2117 = vmatprep.subr.bf16.mxu0 %v6615_v63  ;;  %3583 = vmatprep.subr.bf16.mxu1 %v6489_v50 }
 0x5ce   :  { %2118 = vmatpush1.bf16.msra.mxu0 %v6616_v51  ;;  %3584 = vmatpush3.bf16.msra.mxu1 %v6617_v34  ;;  %v3015_v51 = vld [vmem:[%s6317_s0 + $0x3c] sm:$0xff] }
 0x5cf   :  { %2213 = vmatprep.subr.bf16.mxu0 %v6618_v33  ;;  %3589 = vmatprep.subr.bf16.mxu1 %v6489_v50  ;;  %v2187_v33 = vunpack.c.l.bf16 %v3015_v51 }
 0x631   :  { %v1842_v36 = vpop.f32.mrf.mxu0  ;;  %v1883_v56 = vpop.f32.mrf.mxu1 }
 0x633   :  { %v1844_v44 = vpop.f32.mrf.mxu0  ;;  %v3527_v59 = vpop.f32.mrf.mxu1 }
 0x635   :  { %v1846_v3 = vpop.f32.mrf.mxu0  ;;  %v1886_v55 = vpop.f32.mrf.mxu1 }
 0x637   :  { %v1847_v12 = vpop.f32.mrf.mxu0  ;;  %v3528_v13 = vpop.f32.mrf.mxu1 }
 0x651   :  { %v1952_v14 = vpop.f32.mrf.mxu0  ;;  %v1993_v15 = vpop.f32.mrf.mxu1 }
 0x652   :  { %v1953_v18 = vadd.f32 %v1952_v14, %v6619_v16  ;;  %v2013_v14 = vadd.f32 %v5512_v24, %v1883_v56 }
 0x653   :  { %v1954_v19 = vpop.f32.mrf.mxu0  ;;  %v3547_v20 = vpop.f32.mrf.mxu1 }
 0x654   :  { %v1999_v21 = vadd.f32 %v1953_v18, %v1842_v36  ;;  %v1955_v60 = vadd.f32 %v1954_v19, %v6620_v22  ;;  %v2188_v18 = vunpack.c.h.bf16 %v3015_v51 }
 0x655   :  { %v1956_v29 = vpop.f32.mrf.mxu0  ;;  %v1996_v28 = vpop.f32.mrf.mxu1 }
 0x656   :  { %v3013_v23 = vmul.f32 -1.442695, %v1999_v21  ;;  %v2000_v17 = vadd.f32 %v1955_v60, %v1844_v44  ;;  %v1994_v60 = vadd.f32 %v1993_v15, %v4760_v53 }
 0x657   :  { %v1957_v35 = vpop.f32.mrf.mxu0  ;;  %v3548_v11 = vpop.f32.mrf.mxu1 }
 0x658   :  { %3919 = vpow2.f32 %v3013_v23  ;;  %v3014_v31 = vmul.f32 -1.442695, %v2000_v17 }
 0x65a   :  { %3921 = vpow2.f32 %v3014_v31 }
 0x665   :  { %v3920_v9 = vpop.eup %3919 }
 0x666   :  { %v2007_v63 = vadd.f32 1.0, %v3920_v9 }
 0x667   :  { %v3922_v34 = vpop.eup %3921 }
 0x668   :  { %3923 = vrcp.f32 %v2007_v63  ;;  %v2008_v36 = vadd.f32 1.0, %v3922_v34 }
 0x66a   :  { %3925 = vrcp.f32 %v2008_v36 }
 0x671   :  { %v2055_v59 = vpop.f32.mrf.mxu0  ;;  %v2096_v3 = vpop.f32.mrf.mxu1 }
 0x672   :  { %v2189_v55 = vadd.f32 %v2187_v33, %v2055_v59 }
 0x673   :  { %v2057_v12 = vpop.f32.mrf.mxu0  ;;  %v3567_v13 = vpop.f32.mrf.mxu1 }
 0x674   :  { %v3017_v44 = vmul.f32 -1.442695, %v2189_v55  ;;  %v2190_v11 = vadd.f32 %v2188_v18, %v2057_v12  ;;  %v5673_v55 = vld [vmem:[%s6317_s0 + $0x44] ss:$12 sps:$4 sm:$0xff]   ;;  %v5842_v18 = vld [vmem:[%s6314_s1 + $0x8] ss:$12 sps:$4 sm:$0xff]  }
 0x675   :  { %v3924_v19 = vpop.eup %3923  ;;  %v2059_v20 = vpop.f32.mrf.mxu0  ;;  %v2205_v13 = vunpack.c.l.bf16 %v5673_v55 }
 0x676   :  { %v2099_v21 = vpop.f32.mrf.mxu1  ;;  %v2014_v29 = vmul.f32 %v3924_v19, %v2013_v14  ;;  %3927 = vpow2.f32 %v3017_v44  ;;  %v3018_v17 = vmul.f32 -1.442695, %v2190_v11  ;;  %v5836_v44 = vld [vmem:[%s6314_s1] ss:$12 sps:$4 sm:$0xff]   ;;  %v5855_v20 = vld [vmem:[%s6315_s4 + $0xa8] ss:$12 sps:$4 sm:$0xff]  }
 0x677   :  { %v2060_v28 = vpop.f32.mrf.mxu0  ;;  %v3926_v31 = vpop.eup %3925  ;;  %v5848_v19 = vld [vmem:[%s6315_s4 + $0xac] ss:$12 sps:$4 sm:$0xff]   ;;  %v5861_v21 = vld [vmem:[%s6315_s4 + $0xb0] ss:$12 sps:$4 sm:$0xff]  }
 0x678   :  { %v3568_v23 = vpop.f32.mrf.mxu1  ;;  %v2015_v35 = vadd.f32 %v2014_v29, %v1994_v60  ;;  %v2017_v63 = vsub.f32 1.0, %v3926_v31  ;;  %v2019_v33 = vmul.f32 %v3926_v31, %v5517_v38  ;;  %v2203_v38 = vadd.f32 %v5297_v2, %v2096_v3  ;;  %v5829_v3 = vld [vmem:[%s6314_s1 + $0x4] ss:$12 sps:$4 sm:$0xff]   ;;  %v5867_v60 = vld [vmem:[%s6315_s4 + $0x94] ss:$12 sps:$4 sm:$0xff]  }
 0x679   :  { %v5877_v29 = vld [vmem:[%s6315_s4 + $0x90] ss:$12 sps:$4 sm:$0xff]   ;;  %v5883_v28 = vld [vmem:[%s6315_s4 + $0x98] ss:$12 sps:$4 sm:$0xff]   ;;  %v5902_v11 = vld [vmem:[%s6315_s4 + $0x80] ss:$12 sps:$4 sm:$0xff]  }
 0x67a   :  { %3929 = vtanh.f32 %v2015_v35  ;;  %v5889_v23 = vld [vmem:[%s6315_s4 + $0x7c] ss:$12 sps:$4 sm:$0xff]   ;;  %v5896_v35 = vld [vmem:[%s6315_s4 + $0x78] ss:$12 sps:$4 sm:$0xff]   ;;  %v5915_v31 = vld [vmem:[%s6315_s4 + $0x60] ss:$12 sps:$4 sm:$0xff]  }
 0x67b   :  { %3931 = vpow2.f32 %v3018_v17  ;;  %v5908_v17 = vld [vmem:[%s6315_s4 + $0x64] ss:$12 sps:$4 sm:$0xff]  }
 0x683   :  { %v3928_v9 = vpop.eup %3927 }
 0x684   :  { %v2197_v56 = vadd.f32 1.0, %v3928_v9  ;;  %v5921_v9 = vld [vmem:[%s6315_s4 + $0x68] ss:$12 sps:$4 sm:$0xff]  }
 0x685   :  { %6621 = vst [vmem:[#allocation26_spill] sm:$0xff] %v5921_v9 }
 0x686   :  { %3933 = vrcp.f32 %v2197_v56  ;;  %v5927_v56 = vld [vmem:[%s6315_s4 + $0x4c] ss:$12 sps:$4 sm:$0xff]  }
 0x687   :  { %v3930_v51 = vpop.eup %3929  ;;  %6622 = vst [vmem:[#allocation27_spill] sm:$0xff] %v5927_v56 }
 0x688   :  { %v2018_v34 = vmul.f32 %v3930_v51, %v2017_v63  ;;  %v3932_v59 = vpop.eup %3931  ;;  %v5934_v63 = vld [vmem:[%s6315_s4 + $0x48] ss:$12 sps:$4 sm:$0xff]   ;;  %v5940_v51 = vld [vmem:[%s6315_s4 + $0x50] ss:$12 sps:$4 sm:$0xff]  }
 0x689   :  { %v2198_v12 = vadd.f32 1.0, %v3932_v59  ;;  %6623 = vst [vmem:[#allocation28_spill] sm:$0xff] %v5934_v63  ;;  %6624 = vst [vmem:[#allocation36_spill] sm:$0xff] %v5940_v51  ;;  %v5965_v59 = vld [vmem:[%s6315_s4 + $0x1c] ss:$12 sps:$4 sm:$0xff]  }
 0x68a   :  { %v5666_v36 = vadd.f32 %v2019_v33, %v2018_v34  ;;  %v5946_v34 = vld [vmem:[%s6315_s4 + $0x34] ss:$12 sps:$4 sm:$0xff]   ;;  %v5953_v33 = vld [vmem:[%s6315_s4 + $0x30] ss:$12 sps:$4 sm:$0xff]   ;;  %6628 = vst [vmem:[#allocation13_spill] sm:$0xff] %v5965_v59 }
 0x68b   :  { %3935 = vrcp.f32 %v2198_v12  ;;  %6625 = vst [vmem:[#allocation37_spill] sm:$0xff] %v5946_v34  ;;  %6626 = vst [vmem:[#allocation11_spill] sm:$0xff] %v5953_v33  ;;  %v5972_v12 = vld [vmem:[%s6315_s4 + $0x18] ss:$12 sps:$4 sm:$0xff]  }
 0x68c   :  { %v2102_v15 = vpack.c.bf16 %v5666_v36, %v5666_v36  ;;  %6629 = vst [vmem:[#allocation14_spill] sm:$0xff] %v5972_v12 }
 0x68e   :  { %2136 = vmatmul.mubr.bf16.vlgmr.msra.gmra.mxu0 %v2102_v15  ;;  %3586 = vmatmul.mubr.bf16.vlgmr.msra.gmra.mxu1 %v2102_v15  ;;  %v5959_v15 = vld [vmem:[%s6315_s4 + $0x38] ss:$12 sps:$4 sm:$0xff]  }
 0x68f   :  { %2214 = vmatpush1.bf16.msra.mxu0 %v5275_v46  ;;  %3590 = vmatpush3.bf16.msra.mxu1 %v5281_v37  ;;  %6627 = vst [vmem:[#allocation12_spill] sm:$0xff] %v5959_v15 }
 0x690   :  { %2215 = vmatprep.subr.bf16.mxu0 %v5287_v61  ;;  %3591 = vmatprep.subr.bf16.mxu1 %v6489_v50 }
 0x691   :  { %2245 = vmatprep.mubr.bf16.mxu0 %v6490_v54  ;;  %3605 = vmatprep.mubr.msk.bf16.mxu1 %vm4139_vm0, %v6489_v50 }
 0x693   :  { %v3934_v14 = vpop.eup %3933  ;;  %2216 = vmatpush1.bf16.msra.mxu0 %v5304_v8  ;;  %3592 = vmatpush3.bf16.msra.mxu1 %v5310_v6 }
 0x694   :  { %v2204_v46 = vmul.f32 %v3934_v14, %v2203_v38  ;;  %2217 = vmatprep.subr.bf16.mxu0 %v5316_v42  ;;  %3593 = vmatprep.subr.bf16.mxu1 %v6489_v50  ;;  %v5978_v38 = vld [vmem:[%s6315_s4 + $0x20] ss:$12 sps:$4 sm:$0xff]  }
 0x695   :  { %6630 = vst [vmem:[#allocation15_spill] sm:$0xff] %v5978_v38  ;;  %v5991_v14 = vld [vmem:[%s6315_s4] ss:$12 sps:$4 sm:$0xff]  }
 0x696   :  { %v2206_v37 = vadd.f32 %v2205_v13, %v2204_v46  ;;  %v5984_v13 = vld [vmem:[%s6315_s4 + $0x4] ss:$12 sps:$4 sm:$0xff]   ;;  %6632 = vst [vmem:[#allocation17_spill] sm:$0xff] %v5991_v14  ;;  %v5997_v46 = vld [vmem:[%s6315_s4 + $0x8] ss:$12 sps:$4 sm:$0xff]  }
 0x697   :  { %2218 = vmatpush1.bf16.msra.mxu0 %v5323_v52  ;;  %3594 = vmatpush3.bf16.msra.mxu1 %v5329_v41  ;;  %6631 = vst [vmem:[#allocation16_spill] sm:$0xff] %v5984_v13  ;;  %6633 = vst [vmem:[#allocation18_spill] sm:$0xff] %v5997_v46 }
 0x698   :  { %3937 = vtanh.f32 %v2206_v37  ;;  %2219 = vmatprep.subr.bf16.mxu0 %v5335_v47  ;;  %3595 = vmatprep.subr.bf16.mxu1 %v6489_v50  ;;  %v3936_v61 = vpop.eup %3935  ;;  %v5721_v47 = vld [vmem:[%s6314_s1 + $0xb0] ss:$12 sps:$4 sm:$0xff]   ;;  %v6003_v37 = vld [vmem:[%s6316_s3 + $0xac] ss:$12 sps:$4 sm:$0xff]  }
 0x699   :  { %v2208_v2 = vsub.f32 1.0, %v3936_v61  ;;  %v2210_v42 = vmul.f32 %v3936_v61, %v5555_v1  ;;  %v5823_v1 = vld [vmem:[%s6314_s1 + $0x20] ss:$12 sps:$4 sm:$0xff]   ;;  %6634 = vst [vmem:[#allocation29_spill] sm:$0xff] %v6003_v37 }
 0x69b   :  { %2220 = vmatpush1.bf16.msra.mxu0 %v5342_v4  ;;  %3596 = vmatpush3.bf16.msra.mxu1 %v5348_v49  ;;  %v5733_v4 = vld [vmem:[%s6314_s1 + $0x98] ss:$12 sps:$4 sm:$0xff]  }
 0x69c   :  { %2221 = vmatprep.subr.bf16.mxu0 %v5354_v43  ;;  %3597 = vmatprep.subr.bf16.mxu1 %v6489_v50  ;;  %v5741_v49 = vld [vmem:[%s6314_s1 + $0x78] ss:$12 sps:$4 sm:$0xff]   ;;  %v5747_v43 = vld [vmem:[%s6314_s1 + $0x80] ss:$12 sps:$4 sm:$0xff]  }
 0x69f   :  { %2222 = vmatpush1.bf16.msra.mxu0 %v5361_v5  ;;  %3598 = vmatpush3.bf16.msra.mxu1 %v6586_v26  ;;  %v5753_v5 = vld [vmem:[%s6314_s1 + $0x64] ss:$12 sps:$4 sm:$0xff]   ;;  %v5791_v26 = vld [vmem:[%s6314_s1 + $0x34] ss:$12 sps:$4 sm:$0xff]  }
 0x6a0   :  { %2223 = vmatprep.subr.bf16.mxu0 %v6587_v48  ;;  %3599 = vmatprep.subr.bf16.mxu1 %v6489_v50  ;;  %v5798_v48 = vld [vmem:[%s6314_s1 + $0x30] ss:$12 sps:$4 sm:$0xff]  }
 0x6a3   :  { %2224 = vmatpush1.bf16.msra.mxu0 %v6588_v40  ;;  %3600 = vmatpush3.bf16.msra.mxu1 %v6589_v25  ;;  %v5804_v40 = vld [vmem:[%s6314_s1 + $0x38] ss:$12 sps:$4 sm:$0xff]   ;;  %v5810_v25 = vld [vmem:[%s6314_s1 + $0x1c] ss:$12 sps:$4 sm:$0xff]  }
 0x6a4   :  { %2225 = vmatprep.subr.bf16.mxu0 %v5392_v7  ;;  %3601 = vmatprep.subr.bf16.mxu1 %v6489_v50  ;;  %v5772_v7 = vld [vmem:[%s6314_s1 + $0x4c] ss:$12 sps:$4 sm:$0xff]  }
 0x6a5   :  { %v3938_v8 = vpop.eup %3937 }
 0x6a6   :  { %v2209_v6 = vmul.f32 %v3938_v8, %v2208_v2 }
 0x6a7   :  { %2226 = vmatpush1.bf16.msra.mxu0 %v5400_v0  ;;  %3602 = vmatpush3.bf16.msra.mxu1 %v6590_v27  ;;  %v5760_v0 = vld [vmem:[%s6314_s1 + $0x60] ss:$12 sps:$4 sm:$0xff]   ;;  %v5817_v27 = vld [vmem:[%s6314_s1 + $0x18] ss:$12 sps:$4 sm:$0xff]  }
 0x6a8   :  { %2227 = vmatprep.subr.bf16.mxu0 %v5412_v57  ;;  %3603 = vmatprep.subr.bf16.mxu1 %v6489_v50  ;;  %v5709_v52 = vadd.f32 %v2210_v42, %v2209_v6  ;;  %v5779_v57 = vld [vmem:[%s6314_s1 + $0x48] ss:$12 sps:$4 sm:$0xff]  }
 0x6aa   :  { %v2212_v41 = vpack.c.bf16 %v5709_v52, %v5709_v52 }
 0x6ab   :  { %2228 = vmatpush1.bf16.msra.mxu0 %v5423_v62  ;;  %3604 = vmatpush3.bf16.msra.mxu1 %v5429_v58  ;;  %v5766_v58 = vld [vmem:[%s6314_s1 + $0x68] ss:$12 sps:$4 sm:$0xff]   ;;  %v5785_v62 = vld [vmem:[%s6314_s1 + $0x50] ss:$12 sps:$4 sm:$0xff]  }
 0x6ac   :  { %2316 = vmatprep.subr.bf16.mxu0 %v5564_v10  ;;  %3609 = vmatprep.subr.bf16.mxu1 %v6489_v50 }
 0x6ae   :  { %2246 = vmatmul.mubr.bf16.vlgmr.msra.gmra.mxu0 %v2212_v41  ;;  %3606 = vmatmul.mubr.bf16.vlgmr.msra.gmra.mxu1 %v2212_v41 }
 0x6af   :  { %2317 = vmatpush1.bf16.msra.mxu0 %v5571_v30  ;;  %3610 = vmatpush3.bf16.msra.mxu1 %v5721_v47 }
 0x6b0   :  { %2318 = vmatprep.subr.bf16.mxu0 %v5578_v32  ;;  %3611 = vmatprep.subr.bf16.mxu1 %v6489_v50 }
 0x6b1   :  { %2348 = vmatprep.mubr.bf16.mxu0 %v6490_v54  ;;  %3625 = vmatprep.mubr.msk.bf16.mxu1 %vm4139_vm0, %v6489_v50 }
 0x6b3   :  { %2319 = vmatpush1.bf16.msra.mxu0 %v5588_v39  ;;  %3612 = vmatpush3.bf16.msra.mxu1 %v5733_v4 }
 0x6b4   :  { %2320 = vmatprep.subr.bf16.mxu0 %v5595_v45  ;;  %3613 = vmatprep.subr.bf16.mxu1 %v6489_v50 }
 0x6b7   :  { %2321 = vmatpush1.bf16.msra.mxu0 %v5741_v49  ;;  %3614 = vmatpush3.bf16.msra.mxu1 %v5747_v43 }
 0x6b8   :  { %2322 = vmatprep.subr.bf16.mxu0 %v5753_v5  ;;  %3615 = vmatprep.subr.bf16.mxu1 %v6489_v50 }
 0x6bb   :  { %2323 = vmatpush1.bf16.msra.mxu0 %v5760_v0  ;;  %3616 = vmatpush3.bf16.msra.mxu1 %v5766_v58 }
 0x6bc   :  { %2324 = vmatprep.subr.bf16.mxu0 %v5772_v7  ;;  %3617 = vmatprep.subr.bf16.mxu1 %v6489_v50 }
 0x6bf   :  { %2325 = vmatpush1.bf16.msra.mxu0 %v5779_v57  ;;  %3618 = vmatpush3.bf16.msra.mxu1 %v5785_v62 }
 0x6c0   :  { %2326 = vmatprep.subr.bf16.mxu0 %v5791_v26  ;;  %3619 = vmatprep.subr.bf16.mxu1 %v6489_v50 }
 0x6c3   :  { %2327 = vmatpush1.bf16.msra.mxu0 %v5798_v48  ;;  %3620 = vmatpush3.bf16.msra.mxu1 %v5804_v40 }
 0x6c4   :  { %2328 = vmatprep.subr.bf16.mxu0 %v5810_v25  ;;  %3621 = vmatprep.subr.bf16.mxu1 %v6489_v50 }
 0x6c7   :  { %2329 = vmatpush1.bf16.msra.mxu0 %v5817_v27  ;;  %3622 = vmatpush3.bf16.msra.mxu1 %v5823_v1 }
 0x6c8   :  { %2330 = vmatprep.subr.bf16.mxu0 %v5829_v3  ;;  %3623 = vmatprep.subr.bf16.mxu1 %v6489_v50 }
 0x6cb   :  { %2331 = vmatpush1.bf16.msra.mxu0 %v5836_v44  ;;  %3624 = vmatpush3.bf16.msra.mxu1 %v5842_v18 }
 0x6cc   :  { %2398 = vmatprep.subr.bf16.mxu0 %v5848_v19  ;;  %3629 = vmatprep.subr.bf16.mxu1 %v6489_v50 }
 0x6ce   :  { %2349 = vmatmul.mubr.bf16.vlgmr.msra.gmra.mxu0 %v2212_v41  ;;  %3626 = vmatmul.mubr.bf16.vlgmr.msra.gmra.mxu1 %v2212_v41 }
 0x6cf   :  { %2399 = vmatpush1.bf16.msra.mxu0 %v5855_v20  ;;  %3630 = vmatpush3.bf16.msra.mxu1 %v5861_v21 }
 0x6d0   :  { %2400 = vmatprep.subr.bf16.mxu0 %v5867_v60  ;;  %3631 = vmatprep.subr.bf16.mxu1 %v6489_v50 }
 0x6d1   :  { %2430 = vmatprep.mubr.bf16.mxu0 %v6490_v54  ;;  %3645 = vmatprep.mubr.msk.bf16.mxu1 %vm4139_vm0, %v6489_v50 }
 0x6d3   :  { %2401 = vmatpush1.bf16.msra.mxu0 %v5877_v29  ;;  %3632 = vmatpush3.bf16.msra.mxu1 %v5883_v28 }
 0x6d4   :  { %2402 = vmatprep.subr.bf16.mxu0 %v5889_v23  ;;  %3633 = vmatprep.subr.bf16.mxu1 %v6489_v50 }
 0x6d7   :  { %2403 = vmatpush1.bf16.msra.mxu0 %v5896_v35  ;;  %3634 = vmatpush3.bf16.msra.mxu1 %v5902_v11 }
 0x6d8   :  { %2404 = vmatprep.subr.bf16.mxu0 %v5908_v17  ;;  %3635 = vmatprep.subr.bf16.mxu1 %v6489_v50 }
 0x6db   :  { %2405 = vmatpush1.bf16.msra.mxu0 %v5915_v31  ;;  %3636 = vmatpush3.bf16.msra.mxu1 %v5921_v9 }
 0x6dc   :  { %2406 = vmatprep.subr.bf16.mxu0 %v5927_v56  ;;  %3637 = vmatprep.subr.bf16.mxu1 %v6489_v50 }
 0x6df   :  { %2407 = vmatpush1.bf16.msra.mxu0 %v5934_v63  ;;  %3638 = vmatpush3.bf16.msra.mxu1 %v5940_v51 }
 0x6e0   :  { %2408 = vmatprep.subr.bf16.mxu0 %v5946_v34  ;;  %3639 = vmatprep.subr.bf16.mxu1 %v6489_v50 }
 0x6e3   :  { %2409 = vmatpush1.bf16.msra.mxu0 %v5953_v33  ;;  %3640 = vmatpush3.bf16.msra.mxu1 %v5959_v15 }
 0x6e4   :  { %2410 = vmatprep.subr.bf16.mxu0 %v5965_v59  ;;  %3641 = vmatprep.subr.bf16.mxu1 %v6489_v50 }
 0x6e7   :  { %2411 = vmatpush1.bf16.msra.mxu0 %v5972_v12  ;;  %3642 = vmatpush3.bf16.msra.mxu1 %v5978_v38 }
 0x6e8   :  { %2412 = vmatprep.subr.bf16.mxu0 %v5984_v13  ;;  %3643 = vmatprep.subr.bf16.mxu1 %v6489_v50 }
 0x6eb   :  { %2413 = vmatpush1.bf16.msra.mxu0 %v5991_v14  ;;  %3644 = vmatpush3.bf16.msra.mxu1 %v5997_v46 }
 0x6ec   :  { %2508 = vmatprep.subr.bf16.mxu0 %v6003_v37  ;;  %3649 = vmatprep.subr.bf16.mxu1 %v6489_v50 }
 0x74e   :  { %v2137_v61 = vpop.f32.mrf.mxu0  ;;  %v2178_v2 = vpop.f32.mrf.mxu1 }
 0x750   :  { %v2139_v8 = vpop.f32.mrf.mxu0  ;;  %v3587_v6 = vpop.f32.mrf.mxu1 }
 0x752   :  { %v2141_v42 = vpop.f32.mrf.mxu0  ;;  %v2181_v41 = vpop.f32.mrf.mxu1 }
 0x754   :  { %v2142_v14 = vpop.f32.mrf.mxu0  ;;  %v3588_v13 = vpop.f32.mrf.mxu1 }
 0x76e   :  { %v2247_v38 = vpop.f32.mrf.mxu0  ;;  %v2288_v12 = vpop.f32.mrf.mxu1 }
 0x76f   :  { %v2248_v46 = vadd.f32 %v2247_v38, %v6619_v16  ;;  %v3021_v38 = vld [vmem:[%s6317_s0 + $0x48] sm:$0xff] }
 0x770   :  { %v2249_v59 = vpop.f32.mrf.mxu0  ;;  %v3607_v15 = vpop.f32.mrf.mxu1 }
 0x771   :  { %v2294_v33 = vadd.f32 %v2248_v46, %v2137_v61  ;;  %v2250_v34 = vadd.f32 %v2249_v59, %v6620_v22  ;;  %v2482_v46 = vunpack.c.l.bf16 %v3021_v38 }
 0x772   :  { %v2251_v37 = vpop.f32.mrf.mxu0  ;;  %v2291_v51 = vpop.f32.mrf.mxu1 }
 0x773   :  { %v3019_v63 = vmul.f32 -1.442695, %v2294_v33  ;;  %v2295_v6 = vadd.f32 %v2250_v34, %v2139_v8  ;;  %v2483_v34 = vunpack.c.h.bf16 %v3021_v38 }
 0x774   :  { %v2252_v56 = vpop.f32.mrf.mxu0  ;;  %v3608_v9 = vpop.f32.mrf.mxu1 }
 0x775   :  { %3939 = vpow2.f32 %v3019_v63  ;;  %v3020_v42 = vmul.f32 -1.442695, %v2295_v6  ;;  %v2308_v9 = vadd.f32 %v5512_v24, %v2178_v2 }
 0x777   :  { %3941 = vpow2.f32 %v3020_v42  ;;  %v2289_v42 = vadd.f32 %v2288_v12, %v4760_v53 }
 0x782   :  { %v3940_v14 = vpop.eup %3939 }
 0x783   :  { %v2302_v13 = vadd.f32 1.0, %v3940_v14 }
 0x784   :  { %v3942_v15 = vpop.eup %3941 }
 0x785   :  { %3943 = vrcp.f32 %v2302_v13  ;;  %v2303_v61 = vadd.f32 1.0, %v3942_v15 }
 0x787   :  { %3945 = vrcp.f32 %v2303_v61 }
 0x78e   :  { %v2350_v59 = vpop.f32.mrf.mxu0  ;;  %v2391_v37 = vpop.f32.mrf.mxu1 }
 0x78f   :  { %v2484_v51 = vadd.f32 %v2482_v46, %v2350_v59 }
 0x790   :  { %v2352_v33 = vpop.f32.mrf.mxu0  ;;  %v3627_v56 = vpop.f32.mrf.mxu1 }
 0x791   :  { %v3023_v63 = vmul.f32 -1.442695, %v2484_v51  ;;  %v2485_v16 = vadd.f32 %v2483_v34, %v2352_v33  ;;  %v6028_v33 = vld [vmem:[%s6316_s3 + $0xb0] ss:$12 sps:$4 sm:$0xff]  }
 0x792   :  { %v3944_v8 = vpop.eup %3943  ;;  %v2354_v41 = vpop.f32.mrf.mxu0 }
 0x793   :  { %v2394_v6 = vpop.f32.mrf.mxu1  ;;  %v2309_v14 = vmul.f32 %v3944_v8, %v2308_v9  ;;  %3947 = vpow2.f32 %v3023_v63  ;;  %v3024_v46 = vmul.f32 -1.442695, %v2485_v16  ;;  %v6022_v16 = vld [vmem:[%s6316_s3 + $0xa8] ss:$12 sps:$4 sm:$0xff]   ;;  %v6044_v63 = vld [vmem:[%s6318_s2] ss:$0 sm:$0xff]  ;;  %v2500_v8 = vunpack.c.h.bf16 %v5673_v55 }
 0x794   :  { %v2355_v13 = vpop.f32.mrf.mxu0  ;;  %v3946_v59 = vpop.eup %3945  ;;  %v6034_v9 = vld [vmem:[%s6316_s3 + $0x94] ss:$12 sps:$4 sm:$0xff]   ;;  %v2498_v34 = vadd.f32 %v6044_v63, %v2391_v37  ;;  %v6063_v55 = vld [vmem:[%s6316_s3 + $0x7c] ss:$12 sps:$4 sm:$0xff]  }
 0x795   :  { %v3628_v22 = vpop.f32.mrf.mxu1  ;;  %v2310_v15 = vadd.f32 %v2309_v14, %v2289_v42  ;;  %v2312_v2 = vsub.f32 1.0, %v3946_v59  ;;  %v2314_v51 = vmul.f32 %v3946_v59, %v5666_v36  ;;  %v6051_v42 = vld [vmem:[%s6316_s3 + $0x90] ss:$12 sps:$4 sm:$0xff]   ;;  %v6057_v14 = vld [vmem:[%s6316_s3 + $0x98] ss:$12 sps:$4 sm:$0xff]  }
 0x796   :  { %v6082_v59 = vld [vmem:[%s6316_s3 + $0x64] ss:$12 sps:$4 sm:$0xff]  }
 0x797   :  { %3949 = vtanh.f32 %v2310_v15  ;;  %v6070_v15 = vld [vmem:[%s6316_s3 + $0x78] ss:$12 sps:$4 sm:$0xff]  }
 0x798   :  { %3951 = vpow2.f32 %v3024_v46  ;;  %v6076_v46 = vld [vmem:[%s6316_s3 + $0x80] ss:$12 sps:$4 sm:$0xff]  }
 0x7a0   :  { %v3948_v56 = vpop.eup %3947 }
 0x7a1   :  { %v2492_v24 = vadd.f32 1.0, %v3948_v56  ;;  %v6089_v56 = vld [vmem:[%s6316_s3 + $0x60] ss:$12 sps:$4 sm:$0xff]  }
 0x7a3   :  { %3953 = vrcp.f32 %v2492_v24  ;;  %v6095_v24 = vld [vmem:[%s6316_s3 + $0x68] ss:$12 sps:$4 sm:$0xff]  }
 0x7a4   :  { %v3950_v38 = vpop.eup %3949 }
 0x7a5   :  { %v2313_v61 = vmul.f32 %v3950_v38, %v2312_v2  ;;  %v3952_v22 = vpop.eup %3951  ;;  %v6101_v2 = vld [vmem:[%s6316_s3 + $0x4c] ss:$12 sps:$4 sm:$0xff]   ;;  %v6108_v38 = vld [vmem:[%s6316_s3 + $0x48] ss:$12 sps:$4 sm:$0xff]  }
 0x7a6   :  { %v2493_v36 = vadd.f32 1.0, %v3952_v22  ;;  %v6127_v22 = vld [vmem:[%s6316_s3 + $0x30] ss:$12 sps:$4 sm:$0xff]  }
 0x7a7   :  { %v6015_v41 = vadd.f32 %v2314_v51, %v2313_v61  ;;  %v6114_v61 = vld [vmem:[%s6316_s3 + $0x50] ss:$12 sps:$4 sm:$0xff]   ;;  %v6120_v51 = vld [vmem:[%s6316_s3 + $0x34] ss:$12 sps:$4 sm:$0xff]   ;;  %6635 = vst [vmem:[#allocation30_spill] sm:$0xff] %v6127_v22 }
 0x7a8   :  { %3955 = vrcp.f32 %v2493_v36  ;;  %v6133_v36 = vld [vmem:[%s6316_s3 + $0x38] ss:$12 sps:$4 sm:$0xff]  }
 0x7a9   :  { %v2397_v12 = vpack.c.bf16 %v6015_v41, %v6015_v41  ;;  %6636 = vst [vmem:[#allocation31_spill] sm:$0xff] %v6133_v36 }
 0x7ab   :  { %2431 = vmatmul.mubr.bf16.vlgmr.msra.gmra.mxu0 %v2397_v12  ;;  %3646 = vmatmul.mubr.bf16.vlgmr.msra.gmra.mxu1 %v2397_v12 }
 0x7ac   :  { %2509 = vmatpush1.bf16.msra.mxu0 %v6022_v16  ;;  %3650 = vmatpush3.bf16.msra.mxu1 %v6028_v33 }
 0x7ad   :  { %2510 = vmatprep.subr.bf16.mxu0 %v6034_v9  ;;  %3651 = vmatprep.subr.bf16.mxu1 %v6489_v50 }
 0x7ae   :  { %2540 = vmatprep.mubr.bf16.mxu0 %v6490_v54  ;;  %3665 = vmatprep.mubr.msk.bf16.mxu1 %vm4139_vm0, %v6489_v50 }
 0x7b0   :  { %v3954_v6 = vpop.eup %3953  ;;  %2511 = vmatpush1.bf16.msra.mxu0 %v6051_v42  ;;  %3652 = vmatpush3.bf16.msra.mxu1 %v6057_v14 }
 0x7b1   :  { %v2499_v13 = vmul.f32 %v3954_v6, %v2498_v34  ;;  %2512 = vmatprep.subr.bf16.mxu0 %v6063_v55  ;;  %3653 = vmatprep.subr.bf16.mxu1 %v6489_v50  ;;  %v6139_v34 = vld [vmem:[%s6316_s3 + $0x1c] ss:$12 sps:$4 sm:$0xff]  }
 0x7b3   :  { %v2501_v37 = vadd.f32 %v2500_v8, %v2499_v13 }
 0x7b4   :  { %2513 = vmatpush1.bf16.msra.mxu0 %v6070_v15  ;;  %3654 = vmatpush3.bf16.msra.mxu1 %v6076_v46 }
 0x7b5   :  { %3957 = vtanh.f32 %v2501_v37  ;;  %2514 = vmatprep.subr.bf16.mxu0 %v6082_v59  ;;  %3655 = vmatprep.subr.bf16.mxu1 %v6489_v50  ;;  %v3956_v12 = vpop.eup %3955 }
 0x7b6   :  { %v2503_v8 = vsub.f32 1.0, %v3956_v12  ;;  %v2505_v37 = vmul.f32 %v3956_v12, %v5709_v52 }
 0x7b8   :  { %2515 = vmatpush1.bf16.msra.mxu0 %v6089_v56  ;;  %3656 = vmatpush3.bf16.msra.mxu1 %v6095_v24 }
 0x7b9   :  { %2516 = vmatprep.subr.bf16.mxu0 %v6101_v2  ;;  %3657 = vmatprep.subr.bf16.mxu1 %v6489_v50 }
 0x7bc   :  { %2517 = vmatpush1.bf16.msra.mxu0 %v6108_v38  ;;  %3658 = vmatpush3.bf16.msra.mxu1 %v6114_v61 }
 0x7bd   :  { %2518 = vmatprep.subr.bf16.mxu0 %v6120_v51  ;;  %3659 = vmatprep.subr.bf16.mxu1 %v6489_v50 }
 0x7c0   :  { %2519 = vmatpush1.bf16.msra.mxu0 %v6127_v22  ;;  %3660 = vmatpush3.bf16.msra.mxu1 %v6133_v36  ;;  %v6147_v22 = vld [vmem:[%s6316_s3 + $0x18] ss:$12 sps:$4 sm:$0xff]   ;;  %v6153_v36 = vld [vmem:[%s6316_s3 + $0x20] ss:$12 sps:$4 sm:$0xff]  }
 0x7c1   :  { %2520 = vmatprep.subr.bf16.mxu0 %v6139_v34  ;;  %3661 = vmatprep.subr.bf16.mxu1 %v6489_v50  ;;  %6637 = vst [vmem:[#allocation32_spill] sm:$0xff] %v6153_v36 }
 0x7c2   :  { %v3958_v6 = vpop.eup %3957 }
 0x7c3   :  { %v2504_v13 = vmul.f32 %v3958_v6, %v2503_v8  ;;  %v6159_v8 = vld [vmem:[%s6316_s3 + $0x4] ss:$12 sps:$4 sm:$0xff]   ;;  %v6170_v6 = vld [vmem:[%s6316_s3] ss:$12 sps:$4 sm:$0xff]  }
 0x7c4   :  { %2521 = vmatpush1.bf16.msra.mxu0 %v6147_v22  ;;  %3662 = vmatpush3.bf16.msra.mxu1 %v6153_v36  ;;  %v6176_v36 = vld [vmem:[%s6316_s3 + $0x8] ss:$12 sps:$4 sm:$0xff]  }
 0x7c5   :  { %2522 = vmatprep.subr.bf16.mxu0 %v6159_v8  ;;  %3663 = vmatprep.subr.bf16.mxu1 %v6489_v50  ;;  %v6163_v52 = vadd.f32 %v2505_v37, %v2504_v13 }
 0x7c7   :  { %v2507_v12 = vpack.c.bf16 %v6163_v52, %v6163_v52 }
 0x7c8   :  { %2523 = vmatpush1.bf16.msra.mxu0 %v6170_v6  ;;  %3664 = vmatpush3.bf16.msra.mxu1 %v6176_v36 }
 0x7c9   :  { %2611 = vmatprep.subr.bf16.mxu0 %v5564_v10  ;;  %3669 = vmatprep.subr.bf16.mxu1 %v6489_v50  ;;  %v6638_v10 = vld [vmem:[#allocation26_spill] sm:$0xff] }
 0x7cb   :  { %2541 = vmatmul.mubr.bf16.vlgmr.msra.gmra.mxu0 %v2507_v12  ;;  %3666 = vmatmul.mubr.bf16.vlgmr.msra.gmra.mxu1 %v2507_v12 }
 0x7cc   :  { %2612 = vmatpush1.bf16.msra.mxu0 %v5571_v30  ;;  %3670 = vmatpush3.bf16.msra.mxu1 %v5721_v47  ;;  %v6639_v30 = vld [vmem:[#allocation27_spill] sm:$0xff] }
 0x7cd   :  { %2613 = vmatprep.subr.bf16.mxu0 %v5578_v32  ;;  %3671 = vmatprep.subr.bf16.mxu1 %v6489_v50  ;;  %v6640_v32 = vld [vmem:[#allocation28_spill] sm:$0xff]  ;;  %v6643_v47 = vld [vmem:[#allocation11_spill] sm:$0xff] }
 0x7ce   :  { %2643 = vmatprep.mubr.bf16.mxu0 %v6490_v54  ;;  %3685 = vmatprep.mubr.msk.bf16.mxu1 %vm4139_vm0, %v6489_v50 }
 0x7d0   :  { %2614 = vmatpush1.bf16.msra.mxu0 %v5588_v39  ;;  %3672 = vmatpush3.bf16.msra.mxu1 %v5733_v4  ;;  %v6641_v39 = vld [vmem:[#allocation36_spill] sm:$0xff] }
 0x7d1   :  { %2615 = vmatprep.subr.bf16.mxu0 %v5595_v45  ;;  %3673 = vmatprep.subr.bf16.mxu1 %v6489_v50  ;;  %v6642_v45 = vld [vmem:[#allocation37_spill] sm:$0xff]  ;;  %v6644_v4 = vld [vmem:[#allocation12_spill] sm:$0xff] }
 0x7d4   :  { %2616 = vmatpush1.bf16.msra.mxu0 %v5741_v49  ;;  %3674 = vmatpush3.bf16.msra.mxu1 %v5747_v43  ;;  %v6645_v49 = vld [vmem:[#allocation13_spill] sm:$0xff]  ;;  %v6646_v43 = vld [vmem:[#allocation14_spill] sm:$0xff] }
 0x7d5   :  { %2617 = vmatprep.subr.bf16.mxu0 %v5753_v5  ;;  %3675 = vmatprep.subr.bf16.mxu1 %v6489_v50  ;;  %v6647_v5 = vld [vmem:[#allocation15_spill] sm:$0xff] }
 0x7d8   :  { %2618 = vmatpush1.bf16.msra.mxu0 %v5760_v0  ;;  %3676 = vmatpush3.bf16.msra.mxu1 %v5766_v58  ;;  %v6648_v0 = vld [vmem:[#allocation16_spill] sm:$0xff]  ;;  %v6649_v58 = vld [vmem:[#allocation17_spill] sm:$0xff] }
 0x7d9   :  { %2619 = vmatprep.subr.bf16.mxu0 %v5772_v7  ;;  %3677 = vmatprep.subr.bf16.mxu1 %v6489_v50  ;;  %v6650_v7 = vld [vmem:[#allocation18_spill] sm:$0xff] }
 0x7dc   :  { %2620 = vmatpush1.bf16.msra.mxu0 %v5779_v57  ;;  %3678 = vmatpush3.bf16.msra.mxu1 %v5785_v62  ;;  %v6651_v57 = vld [vmem:[#allocation29_spill] sm:$0xff] }
 0x7dd   :  { %2621 = vmatprep.subr.bf16.mxu0 %v5791_v26  ;;  %3679 = vmatprep.subr.bf16.mxu1 %v6489_v50 }
 0x7e0   :  { %2622 = vmatpush1.bf16.msra.mxu0 %v5798_v48  ;;  %3680 = vmatpush3.bf16.msra.mxu1 %v5804_v40 }
 0x7e1   :  { %2623 = vmatprep.subr.bf16.mxu0 %v5810_v25  ;;  %3681 = vmatprep.subr.bf16.mxu1 %v6489_v50 }
 0x7e4   :  { %2624 = vmatpush1.bf16.msra.mxu0 %v5817_v27  ;;  %3682 = vmatpush3.bf16.msra.mxu1 %v5823_v1 }
 0x7e5   :  { %2625 = vmatprep.subr.bf16.mxu0 %v5829_v3  ;;  %3683 = vmatprep.subr.bf16.mxu1 %v6489_v50 }
 0x7e8   :  { %2626 = vmatpush1.bf16.msra.mxu0 %v5836_v44  ;;  %3684 = vmatpush3.bf16.msra.mxu1 %v5842_v18 }
 0x7e9   :  { %2693 = vmatprep.subr.bf16.mxu0 %v5848_v19  ;;  %3689 = vmatprep.subr.bf16.mxu1 %v6489_v50  ;;  %v6652_v19 = vld [vmem:[#allocation34_spill] sm:$0xff] }
 0x7eb   :  { %2644 = vmatmul.mubr.bf16.vlgmr.msra.gmra.mxu0 %v2507_v12  ;;  %3686 = vmatmul.mubr.bf16.vlgmr.msra.gmra.mxu1 %v2507_v12 }
 0x7ec   :  { %2694 = vmatpush1.bf16.msra.mxu0 %v5855_v20  ;;  %3690 = vmatpush3.bf16.msra.mxu1 %v5861_v21 }
 0x7ed   :  { %2695 = vmatprep.subr.bf16.mxu0 %v5867_v60  ;;  %3691 = vmatprep.subr.bf16.mxu1 %v6489_v50 }
 0x7ee   :  { %2725 = vmatprep.mubr.bf16.mxu0 %v6490_v54  ;;  %3705 = vmatprep.mubr.msk.bf16.mxu1 %vm4139_vm0, %v6489_v50 }
 0x7f0   :  { %2696 = vmatpush1.bf16.msra.mxu0 %v5877_v29  ;;  %3692 = vmatpush3.bf16.msra.mxu1 %v5883_v28  ;;  %v6653_v28 = vld [vmem:[#allocation35_spill] sm:$0xff] }
 0x7f1   :  { %2697 = vmatprep.subr.bf16.mxu0 %v5889_v23  ;;  %3693 = vmatprep.subr.bf16.mxu1 %v6489_v50 }
 0x7f4   :  { %2698 = vmatpush1.bf16.msra.mxu0 %v5896_v35  ;;  %3694 = vmatpush3.bf16.msra.mxu1 %v5902_v11 }
 0x7f5   :  { %2699 = vmatprep.subr.bf16.mxu0 %v5908_v17  ;;  %3695 = vmatprep.subr.bf16.mxu1 %v6489_v50 }
 0x7f8   :  { %2700 = vmatpush1.bf16.msra.mxu0 %v5915_v31  ;;  %3696 = vmatpush3.bf16.msra.mxu1 %v6638_v10 }
 0x7f9   :  { %2701 = vmatprep.subr.bf16.mxu0 %v6639_v30  ;;  %3697 = vmatprep.subr.bf16.mxu1 %v6489_v50 }
 0x7fc   :  { %2702 = vmatpush1.bf16.msra.mxu0 %v6640_v32  ;;  %3698 = vmatpush3.bf16.msra.mxu1 %v6641_v39  ;;  %v3027_v32 = vld [vmem:[%s6317_s0 + $0x54] sm:$0xff] }
 0x7fd   :  { %2703 = vmatprep.subr.bf16.mxu0 %v6642_v45  ;;  %3699 = vmatprep.subr.bf16.mxu1 %v6489_v50  ;;  %v2777_v45 = vunpack.c.l.bf16 %v3027_v32 }
 0x800   :  { %2704 = vmatpush1.bf16.msra.mxu0 %v6643_v47  ;;  %3700 = vmatpush3.bf16.msra.mxu1 %v6644_v4 }
 0x801   :  { %2705 = vmatprep.subr.bf16.mxu0 %v6645_v49  ;;  %3701 = vmatprep.subr.bf16.mxu1 %v6489_v50 }
 0x804   :  { %2706 = vmatpush1.bf16.msra.mxu0 %v6646_v43  ;;  %3702 = vmatpush3.bf16.msra.mxu1 %v6647_v5 }
 0x805   :  { %2707 = vmatprep.subr.bf16.mxu0 %v6648_v0  ;;  %3703 = vmatprep.subr.bf16.mxu1 %v6489_v50 }
 0x808   :  { %2708 = vmatpush1.bf16.msra.mxu0 %v6649_v58  ;;  %3704 = vmatpush3.bf16.msra.mxu1 %v6650_v7  ;;  %v6259_v58 = vld [vmem:[%s6320_s6] ss:$0 sm:$0xff] }
 0x809   :  { %2803 = vmatprep.subr.bf16.mxu0 %v6651_v57  ;;  %3709 = vmatprep.subr.bf16.mxu1 %v6489_v50 }
 0x86b   :  { %v2432_v62 = vpop.f32.mrf.mxu0  ;;  %v2473_v26 = vpop.f32.mrf.mxu1 }
 0x86c   :  { %v2603_v7 = vadd.f32 %v6259_v58, %v2473_v26 }
 0x86d   :  { %v2434_v48 = vpop.f32.mrf.mxu0  ;;  %v3647_v40 = vpop.f32.mrf.mxu1 }
 0x86f   :  { %v2436_v25 = vpop.f32.mrf.mxu0  ;;  %v2476_v27 = vpop.f32.mrf.mxu1 }
 0x871   :  { %v2437_v1 = vpop.f32.mrf.mxu0  ;;  %v3648_v3 = vpop.f32.mrf.mxu1 }
 0x88b   :  { %v2542_v44 = vpop.f32.mrf.mxu0  ;;  %v2583_v18 = vpop.f32.mrf.mxu1 }
 0x88c   :  { %v2543_v20 = vadd.f32 %v2542_v44, %v6652_v19  ;;  %v2584_v27 = vadd.f32 %v2583_v18, %v4760_v53 }
 0x88d   :  { %v2544_v21 = vpop.f32.mrf.mxu0  ;;  %v3667_v60 = vpop.f32.mrf.mxu1 }
 0x88e   :  { %v2589_v29 = vadd.f32 %v2543_v20, %v2432_v62  ;;  %v2545_v23 = vadd.f32 %v2544_v21, %v6653_v28  ;;  %v2778_v62 = vunpack.c.h.bf16 %v3027_v32 }
 0x88f   :  { %v2546_v35 = vpop.f32.mrf.mxu0  ;;  %v2586_v11 = vpop.f32.mrf.mxu1 }
 0x890   :  { %v3025_v17 = vmul.f32 -1.442695, %v2589_v29  ;;  %v2590_v37 = vadd.f32 %v2545_v23, %v2434_v48 }
 0x891   :  { %v2547_v31 = vpop.f32.mrf.mxu0  ;;  %v3668_v13 = vpop.f32.mrf.mxu1 }
 0x892   :  { %3959 = vpow2.f32 %v3025_v17  ;;  %v3026_v12 = vmul.f32 -1.442695, %v2590_v37 }
 0x894   :  { %3961 = vpow2.f32 %v3026_v12  ;;  %v3028_v12 = vld [vmem:[%s6317_s0 + $0x5c] sm:$0xf] }
 0x89f   :  { %v3960_v10 = vpop.eup %3959 }
 0x8a0   :  { %v2597_v30 = vadd.f32 1.0, %v3960_v10 }
 0x8a1   :  { %v3962_v39 = vpop.eup %3961 }
 0x8a2   :  { %3963 = vrcp.f32 %v2597_v30  ;;  %v2598_v47 = vadd.f32 1.0, %v3962_v39  ;;  %v2795_v30 = vunpack.c.l.bf16 %v3028_v12 }
 0x8a4   :  { %3965 = vrcp.f32 %v2598_v47 }
 0x8ab   :  { %v2645_v4 = vpop.f32.mrf.mxu0  ;;  %v2686_v49 = vpop.f32.mrf.mxu1 }
 0x8ac   :  { %v2779_v43 = vadd.f32 %v2777_v45, %v2645_v4 }
 0x8ad   :  { %v2647_v5 = vpop.f32.mrf.mxu0  ;;  %v3687_v0 = vpop.f32.mrf.mxu1 }
 0x8ae   :  { %v3029_v57 = vmul.f32 -1.442695, %v2779_v43  ;;  %v2780_v21 = vadd.f32 %v2778_v62, %v2647_v5 }
 0x8af   :  { %v3964_v48 = vpop.eup %3963  ;;  %v2649_v40 = vpop.f32.mrf.mxu0 }
 0x8b0   :  { %v2689_v25 = vpop.f32.mrf.mxu1  ;;  %v2604_v1 = vmul.f32 %v3964_v48, %v2603_v7  ;;  %3967 = vpow2.f32 %v3029_v57  ;;  %v3030_v60 = vmul.f32 -1.442695, %v2780_v21 }
 0x8b1   :  { %v2650_v3 = vpop.f32.mrf.mxu0  ;;  %v3966_v29 = vpop.eup %3965 }
 0x8b2   :  { %v3688_v44 = vpop.f32.mrf.mxu1  ;;  %v2605_v20 = vadd.f32 %v2604_v1, %v2584_v27  ;;  %v2607_v35 = vsub.f32 1.0, %v3966_v29  ;;  %v2609_v31 = vmul.f32 %v3966_v29, %v6015_v41  ;;  %v2793_v41 = vadd.f32 %v6044_v63, %v2686_v49  ;;  %v6655_v63 = vld [vmem:[#allocation31_spill] sm:$0xff] }
 0x8b4   :  { %3969 = vtanh.f32 %v2605_v20 }
 0x8b5   :  { %3971 = vpow2.f32 %v3030_v60 }
 0x8bd   :  { %v3968_v23 = vpop.eup %3967 }
 0x8be   :  { %v2787_v26 = vadd.f32 1.0, %v3968_v23 }
 0x8c0   :  { %3973 = vrcp.f32 %v2787_v26 }
 0x8c1   :  { %v3970_v11 = vpop.eup %3969 }
 0x8c2   :  { %v2608_v17 = vmul.f32 %v3970_v11, %v2607_v35  ;;  %v3972_v37 = vpop.eup %3971 }
 0x8c3   :  { %v2788_v10 = vadd.f32 1.0, %v3972_v37 }
 0x8c4   :  { %v6264_v13 = vadd.f32 %v2609_v31, %v2608_v17 }
 0x8c5   :  { %3975 = vrcp.f32 %v2788_v10 }
 0x8c6   :  { %v2692_v18 = vpack.c.bf16 %v6264_v13, %v6264_v13 }
 0x8c8   :  { %2726 = vmatmul.mubr.bf16.vlgmr.msra.gmra.mxu0 %v2692_v18  ;;  %3706 = vmatmul.mubr.bf16.vlgmr.msra.gmra.mxu1 %v2692_v18 }
 0x8c9   :  { %2804 = vmatpush1.bf16.msra.mxu0 %v6022_v16  ;;  %3710 = vmatpush3.bf16.msra.mxu1 %v6028_v33 }
 0x8ca   :  { %2805 = vmatprep.subr.bf16.mxu0 %v6034_v9  ;;  %3711 = vmatprep.subr.bf16.mxu1 %v6489_v50  ;;  %v6654_v9 = vld [vmem:[#allocation30_spill] sm:$0xff] }
 0x8cb   :  { %2835 = vmatprep.mubr.bf16.mxu0 %v6490_v54  ;;  %3725 = vmatprep.mubr.msk.bf16.mxu1 %vm4139_vm0, %v6489_v50 }
 0x8cd   :  { %v3974_v32 = vpop.eup %3973  ;;  %2806 = vmatpush1.bf16.msra.mxu0 %v6051_v42  ;;  %3712 = vmatpush3.bf16.msra.mxu1 %v6057_v14 }
 0x8ce   :  { %v2794_v16 = vmul.f32 %v3974_v32, %v2793_v41  ;;  %2807 = vmatprep.subr.bf16.mxu0 %v6063_v55  ;;  %3713 = vmatprep.subr.bf16.mxu1 %v6489_v50 }
 0x8d0   :  { %v2796_v33 = vadd.f32 %v2795_v30, %v2794_v16 }
 0x8d1   :  { %2808 = vmatpush1.bf16.msra.mxu0 %v6070_v15  ;;  %3714 = vmatpush3.bf16.msra.mxu1 %v6076_v46  ;;  %v6656_v46 = vld [vmem:[#allocation32_spill] sm:$0xff] }
 0x8d2   :  { %3977 = vtanh.f32 %v2796_v33  ;;  %2809 = vmatprep.subr.bf16.mxu0 %v6082_v59  ;;  %3715 = vmatprep.subr.bf16.mxu1 %v6489_v50  ;;  %v3976_v54 = vpop.eup %3975 }
 0x8d3   :  { %v2798_v42 = vsub.f32 1.0, %v3976_v54  ;;  %v2800_v15 = vmul.f32 %v3976_v54, %v6163_v52 }
 0x8d5   :  { %2810 = vmatpush1.bf16.msra.mxu0 %v6089_v56  ;;  %3716 = vmatpush3.bf16.msra.mxu1 %v6095_v24 }
 0x8d6   :  { %2811 = vmatprep.subr.bf16.mxu0 %v6101_v2  ;;  %3717 = vmatprep.subr.bf16.mxu1 %v6489_v50 }
 0x8d9   :  { %2812 = vmatpush1.bf16.msra.mxu0 %v6108_v38  ;;  %3718 = vmatpush3.bf16.msra.mxu1 %v6114_v61 }
 0x8da   :  { %2813 = vmatprep.subr.bf16.mxu0 %v6120_v51  ;;  %3719 = vmatprep.subr.bf16.mxu1 %v6489_v50 }
 0x8dd   :  { %2814 = vmatpush1.bf16.msra.mxu0 %v6654_v9  ;;  %3720 = vmatpush3.bf16.msra.mxu1 %v6655_v63 }
 0x8de   :  { %2815 = vmatprep.subr.bf16.mxu0 %v6139_v34  ;;  %3721 = vmatprep.subr.bf16.mxu1 %v6489_v50 }
 0x8df   :  { %v3978_v14 = vpop.eup %3977 }
 0x8e0   :  { %v2799_v55 = vmul.f32 %v3978_v14, %v2798_v42 }
 0x8e1   :  { %2816 = vmatpush1.bf16.msra.mxu0 %v6147_v22  ;;  %3722 = vmatpush3.bf16.msra.mxu1 %v6656_v46 }
 0x8e2   :  { %2817 = vmatprep.subr.bf16.mxu0 %v6159_v8  ;;  %3723 = vmatprep.subr.bf16.mxu1 %v6489_v50  ;;  %v2801_v59 = vadd.f32 %v2800_v15, %v2799_v55 }
 0x8e4   :  { %v2802_v56 = vpack.c.bf16 %v2801_v59, %v2801_v59 }
 0x8e5   :  { %2818 = vmatpush1.bf16.msra.mxu0 %v6170_v6  ;;  %3724 = vmatpush3.bf16.msra.mxu1 %v6176_v36 }
 0x8e8   :  { %2836 = vmatmul.mubr.bf16.vlgmr.msra.gmra.mxu0 %v2802_v56  ;;  %3726 = vmatmul.mubr.bf16.vlgmr.msra.gmra.mxu1 %v2802_v56 }
 0x988   :  { %v2727_v24 = vpop.f32.mrf.mxu0  ;;  %v2768_v2 = vpop.f32.mrf.mxu1 }
 0x98a   :  { %v2729_v38 = vpop.f32.mrf.mxu0  ;;  %v3707_v61 = vpop.f32.mrf.mxu1 }
 0x98c   :  { %v2731_v51 = vpop.f32.mrf.mxu0  ;;  %v2771_v22 = vpop.f32.mrf.mxu1 }
 0x98e   :  { %v2732_v34 = vpop.f32.mrf.mxu0  ;;  %v3708_v52 = vpop.f32.mrf.mxu1 }
 0x9a8   :  { %v2837_v39 = vpop.f32.mrf.mxu0  ;;  %v2878_v8 = vpop.f32.mrf.mxu1 }
 0x9a9   :  { %v2838_v50 = vadd.f32 %v2837_v39, %v6652_v19  ;;  %v2898_v19 = vadd.f32 %v6259_v58, %v2768_v2  ;;  %v2879_v1 = vadd.f32 %v2878_v8, %v4760_v53 }
 0x9aa   :  { %v2839_v45 = vpop.f32.mrf.mxu0  ;;  %v3727_v47 = vpop.f32.mrf.mxu1 }
 0x9ab   :  { %v2884_v4 = vadd.f32 %v2838_v50, %v2727_v24  ;;  %v2840_v43 = vadd.f32 %v2839_v45, %v6653_v28 }
 0x9ac   :  { %v2841_v6 = vpop.f32.mrf.mxu0  ;;  %v2881_v49 = vpop.f32.mrf.mxu1 }
 0x9ad   :  { %v3031_v36 = vmul.f32 -1.442695, %v2884_v4  ;;  %v2885_v7 = vadd.f32 %v2840_v43, %v2729_v38 }
 0x9ae   :  { %v2842_v5 = vpop.f32.mrf.mxu0  ;;  %v3728_v0 = vpop.f32.mrf.mxu1 }
 0x9af   :  { %3979 = vpow2.f32 %v3031_v36  ;;  %v3032_v57 = vmul.f32 -1.442695, %v2885_v7 }
 0x9b1   :  { %3981 = vpow2.f32 %v3032_v57 }
 0x9bc   :  { %v3980_v62 = vpop.eup %3979 }
 0x9bd   :  { %v2892_v48 = vadd.f32 1.0, %v3980_v62 }
 0x9be   :  { %v3982_v40 = vpop.eup %3981 }
 0x9bf   :  { %3983 = vrcp.f32 %v2892_v48  ;;  %v2893_v25 = vadd.f32 1.0, %v3982_v40 }
 0x9c1   :  { %3985 = vrcp.f32 %v2893_v25 }
 0x9cc   :  { %v3984_v27 = vpop.eup %3983 }
 0x9cd   :  { %v2899_v3 = vmul.f32 %v3984_v27, %v2898_v19 }
 0x9ce   :  { %v3986_v28 = vpop.eup %3985 }
 0x9cf   :  { %v2900_v44 = vadd.f32 %v2899_v3, %v2879_v1  ;;  %v2902_v20 = vsub.f32 1.0, %v3986_v28  ;;  %v2904_v29 = vmul.f32 %v3986_v28, %v6264_v13 }
 0x9d1   :  { %3987 = vtanh.f32 %v2900_v44 }
 0x9de   :  { %v3988_v21 = vpop.eup %3987 }
 0x9df   :  { %v2903_v60 = vmul.f32 %v3988_v21, %v2902_v20 }
 0x9e1   :  { %v2905_v23 = vadd.f32 %v2904_v29, %v2903_v60 }
 0x9e3   :  { %2908 = vst [vmem:[%s6321_s7] sm:$0xff] %v2905_v23 }

</bundles_post_ra>
